<compile_context>
chip_gen: v7x
topology: tpu7x:2x2x1
jax: 0.10.0
libtpu: 0.0.40
codegen_flags: <defaults>
</compile_context>

<pallas_src>
import jax
import jax.numpy as jnp
from jax import lax
from jax.experimental import pallas as pl
from jax.experimental.pallas import tpu as pltpu

IN_DIM = 28 * 28     # 784
HID = 64
OUT_DIM = 10
N_STEPS = 8          # fixed RK4 steps over t in [0, 1]

# Lane-dense padded dims (multiples of 128).
IN_PAD = 896         # 7 * 128
HID_PAD = 128
OUT_PAD = 128


def _round_up(n, m):
    return ((n + m - 1) // m) * m


def _pad2(a, shape):
    out = jnp.zeros(shape, a.dtype)
    return out.at[: a.shape[0], : a.shape[1]].set(a)


def _default_tile_b():
    """TB=256 fills the 256x256 MXU on v6e/v7x; v5e's MXU is 128x128."""
    try:
        kind = jax.devices()[0].device_kind.lower()
        if "v5 lite" in kind or "v5e" in kind or "v5litepod" in kind:
            return 128
    except Exception:
        pass
    return 256


def ode_model_kernel(x_ref, w1_ref, b1_ref, w2_ref, b2_ref, w3_ref, b3_ref,
                     wfc_ref, bfc_ref, out_ref):
    """One batch tile: RK4 integration of the MLP vector field + fc head."""
    y0 = x_ref[...]                       # (tb, IN_PAD) f32
    tb = y0.shape[0]

    # Hoist bias broadcasts out of the RK4 loop (JAX does not CSE
    # broadcast_in_dim; f() runs 32 times per tile).
    b1 = jnp.broadcast_to(b1_ref[...], (tb, HID_PAD))
    b2 = jnp.broadcast_to(b2_ref[...], (tb, HID_PAD))
    b3 = jnp.broadcast_to(b3_ref[...], (tb, IN_PAD))

    bf16 = jnp.bfloat16

    def f(z):
        # ODEFunc.net: Linear(784,64) -> Tanh -> Linear(64,64) -> Tanh -> Linear(64,784)
        # bf16 operands at the dots (weights already bf16), f32 accumulation,
        # f32 bias add / tanh / state.
        h1 = jnp.tanh(jnp.dot(z.astype(bf16), w1_ref[...],
                              preferred_element_type=jnp.float32) + b1)
        h2 = jnp.tanh(jnp.dot(h1.astype(bf16), w2_ref[...],
                              preferred_element_type=jnp.float32) + b2)
        return jnp.dot(h2.astype(bf16), w3_ref[...],
                       preferred_element_type=jnp.float32) + b3

    dt = jnp.float32(1.0 / N_STEPS)

    def rk4_step(_, z):
        k1 = f(z)
        k2 = f(z + (0.5 * dt) * k1)
        k3 = f(z + (0.5 * dt) * k2)
        k4 = f(z + dt * k3)
        return z + (dt / 6.0) * (k1 + 2.0 * k2 + 2.0 * k3 + k4)

    # Fixed-step RK4; fori_loop bounds live ranges / compile size at TB=256
    # (each step is ~12 matmuls, so per-iteration overhead is negligible).
    y = lax.fori_loop(0, N_STEPS, rk4_step, y0)

    # Classifier head: Linear(784, 10) (padded to 128 lanes -> unmasked stores).
    bfc = jnp.broadcast_to(bfc_ref[...], (tb, OUT_PAD))
    logits = jnp.dot(y.astype(bf16), wfc_ref[...],
                     preferred_element_type=jnp.float32) + bfc
    out_ref[...] = logits.astype(out_ref.dtype)


def prepare_params(params):
    """Pad weights to lane-dense shapes and cast them to bf16 -- do this ONCE
    (outside the per-call forward) per the review."""
    w1, b1, w2, b2, w3, b3, wfc, bfc = params
    w1p = _pad2(w1, (IN_PAD, HID_PAD)).astype(jnp.bfloat16)
    b1p = _pad2(b1, (1, HID_PAD)).astype(jnp.float32)
    w2p = _pad2(w2, (HID_PAD, HID_PAD)).astype(jnp.bfloat16)
    b2p = _pad2(b2, (1, HID_PAD)).astype(jnp.float32)
    w3p = _pad2(w3, (HID_PAD, IN_PAD)).astype(jnp.bfloat16)
    b3p = _pad2(b3, (1, IN_PAD)).astype(jnp.float32)
    wfcp = _pad2(wfc, (IN_PAD, OUT_PAD)).astype(jnp.bfloat16)
    bfcp = _pad2(bfc, (1, OUT_PAD)).astype(jnp.float32)
    return (w1p, b1p, w2p, b2p, w3p, b3p, wfcp, bfcp)


def ode_model_forward(x, prepared_params, tile_b=None):
    """x: (B, 1, 28, 28) float32 (NCHW).  prepared_params from prepare_params().
    Returns logits (B, 10)."""
    B = x.shape[0]
    x_flat = x.reshape(B, -1).astype(jnp.float32)   # == torch x.view(B, -1)

    w1p, b1p, w2p, b2p, w3p, b3p, wfcp, bfcp = prepared_params

    if tile_b is None:
        tile_b = _default_tile_b()

    # Batch tiling: cap at tile_b, multiple of 8 sublanes, and prefer >=2 grid
    # steps when B allows so v7x's second TensorCore gets work.
    tb = min(tile_b, max(8, _round_up(pl.cdiv(B, 2), 8)))
    b_pad = _round_up(max(B, tb), tb)
    x_pad = jnp.zeros((b_pad, IN_PAD), jnp.float32).at[:B, :IN_DIM].set(x_flat)

    const = lambda shape: pl.BlockSpec(shape, lambda i: (0, 0))

    out = pl.pallas_call(
        ode_model_kernel,
        out_shape=jax.ShapeDtypeStruct((b_pad, OUT_PAD), jnp.float32),
        grid=(b_pad // tb,),
        in_specs=[
            pl.BlockSpec((tb, IN_PAD), lambda i: (i, 0)),
            const((IN_PAD, HID_PAD)), const((1, HID_PAD)),
            const((HID_PAD, HID_PAD)), const((1, HID_PAD)),
            const((HID_PAD, IN_PAD)), const((1, IN_PAD)),
            const((IN_PAD, OUT_PAD)), const((1, OUT_PAD)),
        ],
        out_specs=pl.BlockSpec((tb, OUT_PAD), lambda i: (i, 0)),
        compiler_params=pltpu.CompilerParams(
            dimension_semantics=("parallel",),
            vmem_limit_bytes=32 << 20,
        ),
    )(x_pad, w1p, b1p, w2p, b2p, w3p, b3p, wfcp, bfcp)

    return out[:B, :OUT_DIM]


def init_params(key):
    """Deterministic init matching nn.Linear default U(-1/sqrt(fan_in), 1/sqrt(fan_in)).
    Weights stored as (in, out) so the kernel computes y @ W + b."""
    ks = jax.random.split(key, 8)

    def lin(kw, kb, fan_in, fan_out):
        bound = 1.0 / jnp.sqrt(jnp.float32(fan_in))
        w = jax.random.uniform(kw, (fan_in, fan_out), jnp.float32, -bound, bound)
        b = jax.random.uniform(kb, (1, fan_out), jnp.float32, -bound, bound)
        return w, b

    w1, b1 = lin(ks[0], ks[1], IN_DIM, HID)
    w2, b2 = lin(ks[2], ks[3], HID, HID)
    w3, b3 = lin(ks[4], ks[5], HID, IN_DIM)
    wfc, bfc = lin(ks[6], ks[7], IN_DIM, OUT_DIM)
    return (w1, b1, w2, b2, w3, b3, wfc, bfc)


def reference_forward_f32(x, params):
    """Pure-JAX f32 reference (HIGHEST precision dots, unpadded)."""
    w1, b1, w2, b2, w3, b3, wfc, bfc = params
    hp = lax.Precision.HIGHEST
    y = x.reshape(x.shape[0], -1).astype(jnp.float32)

    def f(z):
        h1 = jnp.tanh(jnp.dot(z, w1, precision=hp) + b1)
        h2 = jnp.tanh(jnp.dot(h1, w2, precision=hp) + b2)
        return jnp.dot(h2, w3, precision=hp) + b3

    dt = jnp.float32(1.0 / N_STEPS)
    for _ in range(N_STEPS):
        k1 = f(y)
        k2 = f(y + 0.5 * dt * k1)
        k3 = f(y + 0.5 * dt * k2)
        k4 = f(y + dt * k3)
        y = y + (dt / 6.0) * (k1 + 2.0 * k2 + 2.0 * k3 + k4)
    return jnp.dot(y, wfc, precision=hp) + bfc


def reference_forward_mixed(x, params):
    """Pure-JAX reference mirroring the kernel's exact mixed precision:
    bf16 operands at every dot, f32 accumulation / biases / state."""
    w1, b1, w2, b2, w3, b3, wfc, bfc = params
    bf16 = jnp.bfloat16

    def dot(a, w):
        return jnp.dot(a.astype(bf16), w.astype(bf16),
                       preferred_element_type=jnp.float32)

    y = x.reshape(x.shape[0], -1).astype(jnp.float32)

    def f(z):
        h1 = jnp.tanh(dot(z, w1) + b1)
        h2 = jnp.tanh(dot(h1, w2) + b2)
        return dot(h2, w3) + b3

    dt = jnp.float32(1.0 / N_STEPS)
    for _ in range(N_STEPS):
        k1 = f(y)
        k2 = f(y + (0.5 * dt) * k1)
        k3 = f(y + (0.5 * dt) * k2)
        k4 = f(y + dt * k3)
        y = y + (dt / 6.0) * (k1 + 2.0 * k2 + 2.0 * k3 + k4)
    return dot(y, wfc) + bfc


if __name__ == "__main__":
    key = jax.random.PRNGKey(0)
    k_x, k_p = jax.random.split(key)

    B = 8
    x = jax.random.normal(k_x, (B, 1, 28, 28), dtype=jnp.float32)  # NCHW
    params = init_params(k_p)
    prepared = prepare_params(params)   # pad + bf16-cast ONCE

    out = ode_model_forward(x, prepared)
    out = jax.block_until_ready(out)
    assert out.shape == (B, OUT_DIM)

    # Tight check vs a reference with identical mixed precision (verifies the
    # kernel implementation; only f32 accumulation order differs).
    ref_mixed = reference_forward_mixed(x, params)
    assert jnp.allclose(out, ref_mixed, atol=5e-3, rtol=5e-3), \
        "mismatch vs mixed-precision reference"

    # Loose check vs the pure f32 reference (bounds bf16-at-the-dot drift over
    # the 32 chained vector-field evaluations).
    ref_f32 = reference_forward_f32(x, params)
    assert jnp.allclose(out, ref_f32, atol=5e-2, rtol=5e-2), \
        "mismatch vs f32 reference"

    print("KERNEL_OK")
</pallas_src>

<mosaic_0001>
module attributes {stable_mosaic.version = 11 : i64} {
  func.func @ode_model_kernel(%arg0: i32, %arg1: memref<8x896xf32, #tpu.memory_space<vmem>>, %arg2: memref<896x128xbf16, #tpu.memory_space<vmem>>, %arg3: memref<1x128xf32, #tpu.memory_space<vmem>>, %arg4: memref<128x128xbf16, #tpu.memory_space<vmem>>, %arg5: memref<1x128xf32, #tpu.memory_space<vmem>>, %arg6: memref<128x896xbf16, #tpu.memory_space<vmem>>, %arg7: memref<1x896xf32, #tpu.memory_space<vmem>>, %arg8: memref<896x128xbf16, #tpu.memory_space<vmem>>, %arg9: memref<1x128xf32, #tpu.memory_space<vmem>>, %arg10: memref<8x128xf32, #tpu.memory_space<vmem>>) attributes {dimension_semantics = [#tpu.dimension_semantics<parallel>], iteration_bounds = array<i64: 1>, scalar_prefetch = 0 : i64, scratch_operands = 0 : i64, tpu.core_type = #tpu.core_type<tc>, window_params = [{transform_indices = @transform_0, window_bounds = array<i64: 8, 896>}, {pipeline_mode = #tpu.pipeline_mode<synchronous>, transform_indices = @transform_1, window_bounds = array<i64: 896, 128>}, {pipeline_mode = #tpu.pipeline_mode<synchronous>, transform_indices = @transform_2, window_bounds = array<i64: 1, 128>}, {pipeline_mode = #tpu.pipeline_mode<synchronous>, transform_indices = @transform_3, window_bounds = array<i64: 128, 128>}, {pipeline_mode = #tpu.pipeline_mode<synchronous>, transform_indices = @transform_4, window_bounds = array<i64: 1, 128>}, {pipeline_mode = #tpu.pipeline_mode<synchronous>, transform_indices = @transform_5, window_bounds = array<i64: 128, 896>}, {pipeline_mode = #tpu.pipeline_mode<synchronous>, transform_indices = @transform_6, window_bounds = array<i64: 1, 896>}, {pipeline_mode = #tpu.pipeline_mode<synchronous>, transform_indices = @transform_7, window_bounds = array<i64: 896, 128>}, {pipeline_mode = #tpu.pipeline_mode<synchronous>, transform_indices = @transform_8, window_bounds = array<i64: 1, 128>}, {transform_indices = @transform_9, window_bounds = array<i64: 8, 128>}]} {
    %c0 = arith.constant 0 : index
    %c0_0 = arith.constant 0 : index
    %0 = vector.load %arg1[%c0, %c0_0] : memref<8x896xf32, #tpu.memory_space<vmem>>, vector<8x896xf32>
    %c0_1 = arith.constant 0 : index
    %c0_2 = arith.constant 0 : index
    %1 = vector.load %arg3[%c0_1, %c0_2] : memref<1x128xf32, #tpu.memory_space<vmem>>, vector<1x128xf32>
    %2 = vector.shape_cast %1 : vector<1x128xf32> to vector<1x128xf32>
    %3 = vector.broadcast %2 : vector<1x128xf32> to vector<8x128xf32>
    %c0_3 = arith.constant 0 : index
    %c0_4 = arith.constant 0 : index
    %4 = vector.load %arg5[%c0_3, %c0_4] : memref<1x128xf32, #tpu.memory_space<vmem>>, vector<1x128xf32>
    %5 = vector.shape_cast %4 : vector<1x128xf32> to vector<1x128xf32>
    %6 = vector.broadcast %5 : vector<1x128xf32> to vector<8x128xf32>
    %c0_5 = arith.constant 0 : index
    %c0_6 = arith.constant 0 : index
    %7 = vector.load %arg7[%c0_5, %c0_6] : memref<1x896xf32, #tpu.memory_space<vmem>>, vector<1x896xf32>
    %8 = vector.shape_cast %7 : vector<1x896xf32> to vector<1x896xf32>
    %9 = vector.broadcast %8 : vector<1x896xf32> to vector<8x896xf32>
    %cst = arith.constant 1.250000e-01 : f32
    %c0_i32 = arith.constant 0 : i32
    %c8_i32 = arith.constant 8 : i32
    %10 = arith.addi %c0_i32, %c8_i32 : i32
    %c1_i32 = arith.constant 1 : i32
    %11 = scf.for %arg11 = %c0_i32 to %10 step %c1_i32 iter_args(%arg12 = %0) -> (vector<8x896xf32>)  : i32 {
      %20 = arith.truncf %arg12 : vector<8x896xf32> to vector<8x896xbf16>
      %c0_14 = arith.constant 0 : index
      %c0_15 = arith.constant 0 : index
      %21 = vector.load %arg2[%c0_14, %c0_15] : memref<896x128xbf16, #tpu.memory_space<vmem>>, vector<896x128xbf16>
      %cst_16 = arith.constant dense<0.000000e+00> : vector<8x128xf32>
      %22 = tpu.matmul %20, %21, %cst_16 {dimension_numbers = #tpu.dot_dimension_numbers<[1], [0], [0], [1], [0, 0, 1, 1], [], []>} : vector<8x896xbf16>, vector<896x128xbf16>, vector<8x128xf32> -> vector<8x128xf32>
      %23 = arith.addf %22, %3 : vector<8x128xf32>
      %24 = math.tanh %23 : vector<8x128xf32>
      %25 = arith.truncf %24 : vector<8x128xf32> to vector<8x128xbf16>
      %c0_17 = arith.constant 0 : index
      %c0_18 = arith.constant 0 : index
      %26 = vector.load %arg4[%c0_17, %c0_18] : memref<128x128xbf16, #tpu.memory_space<vmem>>, vector<128x128xbf16>
      %cst_19 = arith.constant dense<0.000000e+00> : vector<8x128xf32>
      %27 = tpu.matmul %25, %26, %cst_19 {dimension_numbers = #tpu.dot_dimension_numbers<[1], [0], [0], [1], [0, 0, 1, 1], [], []>} : vector<8x128xbf16>, vector<128x128xbf16>, vector<8x128xf32> -> vector<8x128xf32>
      %28 = arith.addf %27, %6 : vector<8x128xf32>
      %29 = math.tanh %28 : vector<8x128xf32>
      %30 = arith.truncf %29 : vector<8x128xf32> to vector<8x128xbf16>
      %c0_20 = arith.constant 0 : index
      %c0_21 = arith.constant 0 : index
      %31 = vector.load %arg6[%c0_20, %c0_21] : memref<128x896xbf16, #tpu.memory_space<vmem>>, vector<128x896xbf16>
      %cst_22 = arith.constant dense<0.000000e+00> : vector<8x896xf32>
      %32 = tpu.matmul %30, %31, %cst_22 {dimension_numbers = #tpu.dot_dimension_numbers<[1], [0], [0], [1], [0, 0, 1, 1], [], []>} : vector<8x128xbf16>, vector<128x896xbf16>, vector<8x896xf32> -> vector<8x896xf32>
      %33 = arith.addf %32, %9 : vector<8x896xf32>
      %cst_23 = arith.constant 5.000000e-01 : f32
      %34 = arith.mulf %cst_23, %cst : f32
      %35 = vector.broadcast %34 : f32 to vector<8x896xf32>
      %36 = arith.mulf %35, %33 : vector<8x896xf32>
      %37 = arith.addf %arg12, %36 : vector<8x896xf32>
      %38 = arith.truncf %37 : vector<8x896xf32> to vector<8x896xbf16>
      %c0_24 = arith.constant 0 : index
      %c0_25 = arith.constant 0 : index
      %39 = vector.load %arg2[%c0_24, %c0_25] : memref<896x128xbf16, #tpu.memory_space<vmem>>, vector<896x128xbf16>
      %cst_26 = arith.constant dense<0.000000e+00> : vector<8x128xf32>
      %40 = tpu.matmul %38, %39, %cst_26 {dimension_numbers = #tpu.dot_dimension_numbers<[1], [0], [0], [1], [0, 0, 1, 1], [], []>} : vector<8x896xbf16>, vector<896x128xbf16>, vector<8x128xf32> -> vector<8x128xf32>
      %41 = arith.addf %40, %3 : vector<8x128xf32>
      %42 = math.tanh %41 : vector<8x128xf32>
      %43 = arith.truncf %42 : vector<8x128xf32> to vector<8x128xbf16>
      %c0_27 = arith.constant 0 : index
      %c0_28 = arith.constant 0 : index
      %44 = vector.load %arg4[%c0_27, %c0_28] : memref<128x128xbf16, #tpu.memory_space<vmem>>, vector<128x128xbf16>
      %cst_29 = arith.constant dense<0.000000e+00> : vector<8x128xf32>
      %45 = tpu.matmul %43, %44, %cst_29 {dimension_numbers = #tpu.dot_dimension_numbers<[1], [0], [0], [1], [0, 0, 1, 1], [], []>} : vector<8x128xbf16>, vector<128x128xbf16>, vector<8x128xf32> -> vector<8x128xf32>
      %46 = arith.addf %45, %6 : vector<8x128xf32>
      %47 = math.tanh %46 : vector<8x128xf32>
      %48 = arith.truncf %47 : vector<8x128xf32> to vector<8x128xbf16>
      %c0_30 = arith.constant 0 : index
      %c0_31 = arith.constant 0 : index
      %49 = vector.load %arg6[%c0_30, %c0_31] : memref<128x896xbf16, #tpu.memory_space<vmem>>, vector<128x896xbf16>
      %cst_32 = arith.constant dense<0.000000e+00> : vector<8x896xf32>
      %50 = tpu.matmul %48, %49, %cst_32 {dimension_numbers = #tpu.dot_dimension_numbers<[1], [0], [0], [1], [0, 0, 1, 1], [], []>} : vector<8x128xbf16>, vector<128x896xbf16>, vector<8x896xf32> -> vector<8x896xf32>
      %51 = arith.addf %50, %9 : vector<8x896xf32>
      %cst_33 = arith.constant 5.000000e-01 : f32
      %52 = arith.mulf %cst_33, %cst : f32
      %53 = vector.broadcast %52 : f32 to vector<8x896xf32>
      %54 = arith.mulf %53, %51 : vector<8x896xf32>
      %55 = arith.addf %arg12, %54 : vector<8x896xf32>
      %56 = arith.truncf %55 : vector<8x896xf32> to vector<8x896xbf16>
      %c0_34 = arith.constant 0 : index
      %c0_35 = arith.constant 0 : index
      %57 = vector.load %arg2[%c0_34, %c0_35] : memref<896x128xbf16, #tpu.memory_space<vmem>>, vector<896x128xbf16>
      %cst_36 = arith.constant dense<0.000000e+00> : vector<8x128xf32>
      %58 = tpu.matmul %56, %57, %cst_36 {dimension_numbers = #tpu.dot_dimension_numbers<[1], [0], [0], [1], [0, 0, 1, 1], [], []>} : vector<8x896xbf16>, vector<896x128xbf16>, vector<8x128xf32> -> vector<8x128xf32>
      %59 = arith.addf %58, %3 : vector<8x128xf32>
      %60 = math.tanh %59 : vector<8x128xf32>
      %61 = arith.truncf %60 : vector<8x128xf32> to vector<8x128xbf16>
      %c0_37 = arith.constant 0 : index
      %c0_38 = arith.constant 0 : index
      %62 = vector.load %arg4[%c0_37, %c0_38] : memref<128x128xbf16, #tpu.memory_space<vmem>>, vector<128x128xbf16>
      %cst_39 = arith.constant dense<0.000000e+00> : vector<8x128xf32>
      %63 = tpu.matmul %61, %62, %cst_39 {dimension_numbers = #tpu.dot_dimension_numbers<[1], [0], [0], [1], [0, 0, 1, 1], [], []>} : vector<8x128xbf16>, vector<128x128xbf16>, vector<8x128xf32> -> vector<8x128xf32>
      %64 = arith.addf %63, %6 : vector<8x128xf32>
      %65 = math.tanh %64 : vector<8x128xf32>
      %66 = arith.truncf %65 : vector<8x128xf32> to vector<8x128xbf16>
      %c0_40 = arith.constant 0 : index
      %c0_41 = arith.constant 0 : index
      %67 = vector.load %arg6[%c0_40, %c0_41] : memref<128x896xbf16, #tpu.memory_space<vmem>>, vector<128x896xbf16>
      %cst_42 = arith.constant dense<0.000000e+00> : vector<8x896xf32>
      %68 = tpu.matmul %66, %67, %cst_42 {dimension_numbers = #tpu.dot_dimension_numbers<[1], [0], [0], [1], [0, 0, 1, 1], [], []>} : vector<8x128xbf16>, vector<128x896xbf16>, vector<8x896xf32> -> vector<8x896xf32>
      %69 = arith.addf %68, %9 : vector<8x896xf32>
      %70 = vector.broadcast %cst : f32 to vector<8x896xf32>
      %71 = arith.mulf %70, %69 : vector<8x896xf32>
      %72 = arith.addf %arg12, %71 : vector<8x896xf32>
      %73 = arith.truncf %72 : vector<8x896xf32> to vector<8x896xbf16>
      %c0_43 = arith.constant 0 : index
      %c0_44 = arith.constant 0 : index
      %74 = vector.load %arg2[%c0_43, %c0_44] : memref<896x128xbf16, #tpu.memory_space<vmem>>, vector<896x128xbf16>
      %cst_45 = arith.constant dense<0.000000e+00> : vector<8x128xf32>
      %75 = tpu.matmul %73, %74, %cst_45 {dimension_numbers = #tpu.dot_dimension_numbers<[1], [0], [0], [1], [0, 0, 1, 1], [], []>} : vector<8x896xbf16>, vector<896x128xbf16>, vector<8x128xf32> -> vector<8x128xf32>
      %76 = arith.addf %75, %3 : vector<8x128xf32>
      %77 = math.tanh %76 : vector<8x128xf32>
      %78 = arith.truncf %77 : vector<8x128xf32> to vector<8x128xbf16>
      %c0_46 = arith.constant 0 : index
      %c0_47 = arith.constant 0 : index
      %79 = vector.load %arg4[%c0_46, %c0_47] : memref<128x128xbf16, #tpu.memory_space<vmem>>, vector<128x128xbf16>
      %cst_48 = arith.constant dense<0.000000e+00> : vector<8x128xf32>
      %80 = tpu.matmul %78, %79, %cst_48 {dimension_numbers = #tpu.dot_dimension_numbers<[1], [0], [0], [1], [0, 0, 1, 1], [], []>} : vector<8x128xbf16>, vector<128x128xbf16>, vector<8x128xf32> -> vector<8x128xf32>
      %81 = arith.addf %80, %6 : vector<8x128xf32>
      %82 = math.tanh %81 : vector<8x128xf32>
      %83 = arith.truncf %82 : vector<8x128xf32> to vector<8x128xbf16>
      %c0_49 = arith.constant 0 : index
      %c0_50 = arith.constant 0 : index
      %84 = vector.load %arg6[%c0_49, %c0_50] : memref<128x896xbf16, #tpu.memory_space<vmem>>, vector<128x896xbf16>
      %cst_51 = arith.constant dense<0.000000e+00> : vector<8x896xf32>
      %85 = tpu.matmul %83, %84, %cst_51 {dimension_numbers = #tpu.dot_dimension_numbers<[1], [0], [0], [1], [0, 0, 1, 1], [], []>} : vector<8x128xbf16>, vector<128x896xbf16>, vector<8x896xf32> -> vector<8x896xf32>
      %86 = arith.addf %85, %9 : vector<8x896xf32>
      %cst_52 = arith.constant 6.000000e+00 : f32
      %87 = arith.divf %cst, %cst_52 : f32
      %cst_53 = arith.constant 2.000000e+00 : f32
      %88 = vector.broadcast %cst_53 : f32 to vector<8x896xf32>
      %89 = arith.mulf %88, %51 : vector<8x896xf32>
      %90 = arith.addf %33, %89 : vector<8x896xf32>
      %cst_54 = arith.constant 2.000000e+00 : f32
      %91 = vector.broadcast %cst_54 : f32 to vector<8x896xf32>
      %92 = arith.mulf %91, %69 : vector<8x896xf32>
      %93 = arith.addf %90, %92 : vector<8x896xf32>
      %94 = arith.addf %93, %86 : vector<8x896xf32>
      %95 = vector.broadcast %87 : f32 to vector<8x896xf32>
      %96 = arith.mulf %95, %94 : vector<8x896xf32>
      %97 = arith.addf %arg12, %96 : vector<8x896xf32>
      scf.yield %97 : vector<8x896xf32>
    }
    %c0_7 = arith.constant 0 : index
    %c0_8 = arith.constant 0 : index
    %12 = vector.load %arg9[%c0_7, %c0_8] : memref<1x128xf32, #tpu.memory_space<vmem>>, vector<1x128xf32>
    %13 = vector.shape_cast %12 : vector<1x128xf32> to vector<1x128xf32>
    %14 = vector.broadcast %13 : vector<1x128xf32> to vector<8x128xf32>
    %15 = arith.truncf %11 : vector<8x896xf32> to vector<8x896xbf16>
    %c0_9 = arith.constant 0 : index
    %c0_10 = arith.constant 0 : index
    %16 = vector.load %arg8[%c0_9, %c0_10] : memref<896x128xbf16, #tpu.memory_space<vmem>>, vector<896x128xbf16>
    %cst_11 = arith.constant dense<0.000000e+00> : vector<8x128xf32>
    %17 = tpu.matmul %15, %16, %cst_11 {dimension_numbers = #tpu.dot_dimension_numbers<[1], [0], [0], [1], [0, 0, 1, 1], [], []>} : vector<8x896xbf16>, vector<896x128xbf16>, vector<8x128xf32> -> vector<8x128xf32>
    %18 = arith.addf %17, %14 : vector<8x128xf32>
    %c0_12 = arith.constant 0 : index
    %c0_13 = arith.constant 0 : index
    %19 = vector.load %arg10[%c0_12, %c0_13] : memref<8x128xf32, #tpu.memory_space<vmem>>, vector<8x128xf32>
    tpu.vector_store %arg10[%c0_12, %c0_13], %18 {strides = array<i32>} : memref<8x128xf32, #tpu.memory_space<vmem>>, vector<8x128xf32>,
    return
  }
  func.func @transform_0(%arg0: i32) -> (i32, i32) {
    %c0_i32 = arith.constant 0 : i32
    %c0_i32_0 = arith.constant 0 : i32
    return %arg0, %c0_i32 : i32, i32
  }
  func.func @transform_1(%arg0: i32) -> (i32, i32) {
    %c0_i32 = arith.constant 0 : i32
    %c0_i32_0 = arith.constant 0 : i32
    %c0_i32_1 = arith.constant 0 : i32
    return %c0_i32, %c0_i32_0 : i32, i32
  }
  func.func @transform_2(%arg0: i32) -> (i32, i32) {
    %c0_i32 = arith.constant 0 : i32
    %c0_i32_0 = arith.constant 0 : i32
    %c0_i32_1 = arith.constant 0 : i32
    return %c0_i32, %c0_i32_0 : i32, i32
  }
  func.func @transform_3(%arg0: i32) -> (i32, i32) {
    %c0_i32 = arith.constant 0 : i32
    %c0_i32_0 = arith.constant 0 : i32
    %c0_i32_1 = arith.constant 0 : i32
    return %c0_i32, %c0_i32_0 : i32, i32
  }
  func.func @transform_4(%arg0: i32) -> (i32, i32) {
    %c0_i32 = arith.constant 0 : i32
    %c0_i32_0 = arith.constant 0 : i32
    %c0_i32_1 = arith.constant 0 : i32
    return %c0_i32, %c0_i32_0 : i32, i32
  }
  func.func @transform_5(%arg0: i32) -> (i32, i32) {
    %c0_i32 = arith.constant 0 : i32
    %c0_i32_0 = arith.constant 0 : i32
    %c0_i32_1 = arith.constant 0 : i32
    return %c0_i32, %c0_i32_0 : i32, i32
  }
  func.func @transform_6(%arg0: i32) -> (i32, i32) {
    %c0_i32 = arith.constant 0 : i32
    %c0_i32_0 = arith.constant 0 : i32
    %c0_i32_1 = arith.constant 0 : i32
    return %c0_i32, %c0_i32_0 : i32, i32
  }
  func.func @transform_7(%arg0: i32) -> (i32, i32) {
    %c0_i32 = arith.constant 0 : i32
    %c0_i32_0 = arith.constant 0 : i32
    %c0_i32_1 = arith.constant 0 : i32
    return %c0_i32, %c0_i32_0 : i32, i32
  }
  func.func @transform_8(%arg0: i32) -> (i32, i32) {
    %c0_i32 = arith.constant 0 : i32
    %c0_i32_0 = arith.constant 0 : i32
    %c0_i32_1 = arith.constant 0 : i32
    return %c0_i32, %c0_i32_0 : i32, i32
  }
  func.func @transform_9(%arg0: i32) -> (i32, i32) {
    %c0_i32 = arith.constant 0 : i32
    %c0_i32_0 = arith.constant 0 : i32
    return %arg0, %c0_i32 : i32, i32
  }
}

</mosaic_0001>

<bundles_post_ra>
// kernel: tpu_custom_call.1
= control target key start
LH: loop header
LB: loop body
LE: loop exit
PB: predicated region body
PF: predicated region fallthrough
CT: control target
= control target key end

     0   :  { %14 = vsyncpa [#allocation3], 0  ;;  %s6197_s0 = inlined_call_operand.hbm [shape: f32[8,896], index: 0, kind: input, shape index: {}]   ;;  %s6198_s1 = inlined_call_operand.hbm [shape: bf16[896,128], index: 1, kind: input, shape index: {}]   ;;  %s6199_s2 = inlined_call_operand.vmem [shape: f32[1,128], index: 2, kind: input, shape index: {}]   ;;  %s6200_s3 = inlined_call_operand.hbm [shape: bf16[128,128], index: 3, kind: input, shape index: {}]   ;;  %s6201_s4 = inlined_call_operand.vmem [shape: f32[1,128], index: 4, kind: input, shape index: {}]   ;;  %s6202_s5 = inlined_call_operand.hbm [shape: bf16[128,896], index: 5, kind: input, shape index: {}]   ;;  %s6203_s6 = inlined_call_operand.vmem [shape: f32[1,896], index: 6, kind: input, shape index: {}]   ;;  %s6204_s7 = inlined_call_operand.hbm [shape: bf16[896,128], index: 7, kind: input, shape index: {}]   ;;  %s6205_s8 = inlined_call_operand.vmem [shape: f32[1,128], index: 8, kind: input, shape index: {}]   ;;  %s6206_s9 = inlined_call_operand.hbm [shape: f32[8,128], index: 9, kind: output, shape index: {}]  }
   0x1   :  { %15 = vsyncpa [#allocation6], 0 }
   0x2   :  { %16 = vsyncpa [#allocation9], 0 }
   0x3   :  { %17 = vsyncpa [#allocation4], 0  ;;  %s4793_s30 = smov [#allocation5]   ;;  %s4589_s13 = scalar_lea.hbm %s6198_s1, 7168 }
   0x4   :  { %s33_s10 = sshll.u32 %s4793_s30, 4  ;;  %p4590_p0 = scmp.ne.s32.totalorder %s6198_s1, %s4589_s13  ;;  %s34_s10 = int_to_ptr.vmem [resolvable:$true] %s33_s10 }
   0x5   :  { %p4593_p1 = scmp.lt.u32.totalorder %s4589_s13, %s6198_s1 }
   0x7   :  { %p4595_p2 = pnand %p4593_p1, %p4590_p0 }
   0x9   :  { %4598 = shalt.err (!%p4595_p2)
}
   0xa   :  { %s4599_s18 = scalar_lea.vmem %s34_s10, 7168  ;;  %p4604_p4 = scmp.lt.s32.totalorder %s34_s10, %s34_s10 }
   0xb   :  { %p4600_p3 = scmp.ne.s32.totalorder %s34_s10, %s4599_s18  ;;  %p4605_p5 = scmp.lt.s32.totalorder %s4599_s18, %s4599_s18 }
   0xd   :  { %p4606_p6 = por %p4605_p5, %p4604_p4 }
   0xf   :  { %p4607_p7 = pnand %p4606_p6, %p4600_p3 }
  0x11   :  { %4610 = shalt.err (!%p4607_p7)
}
  0x12   :  { %s4794_s19 = smov 64   ;;  %s4795_s20 = smov 4  }
  0x13   :  { %39 = dma.hbm_to_vmem [thread:$0]  %s6198_s1, 7168, %s34_s10, [#allocation6], %s4794_s19, %s4794_s19, %s4795_s20  }
  0x14   :  { %s4796_s23 = smov [#allocation8]   ;;  %s4611_s27 = scalar_lea.hbm %s6202_s5, 7168 }
  0x15   :  { %s61_s24 = sshll.u32 %s4796_s23, 4  ;;  %p4612_p8 = scmp.ne.s32.totalorder %s6202_s5, %s4611_s27  ;;  %s62_s24 = int_to_ptr.vmem [resolvable:$true] %s61_s24 }
  0x16   :  { %p4615_p9 = scmp.lt.u32.totalorder %s4611_s27, %s6202_s5 }
  0x18   :  { %p4617_p10 = pnand %p4615_p9, %p4612_p8 }
  0x1a   :  { %4620 = shalt.err (!%p4617_p10)
}
  0x1b   :  { %s4621_s12 = scalar_lea.vmem %s62_s24, 7168  ;;  %p4626_p12 = scmp.lt.s32.totalorder %s62_s24, %s62_s24 }
  0x1c   :  { %p4622_p11 = scmp.ne.s32.totalorder %s62_s24, %s4621_s12  ;;  %p4627_p13 = scmp.lt.s32.totalorder %s4621_s12, %s4621_s12 }
  0x1e   :  { %p4628_p0 = por %p4627_p13, %p4626_p12 }
  0x20   :  { %p4629_p1 = pnand %p4628_p0, %p4622_p11 }
  0x22   :  { %4632 = shalt.err (!%p4629_p1)
}
  0x23   :  { %s4797_s1 = smov 448   ;;  %s4798_s10 = smov 28  }
  0x24   :  { %67 = dma.hbm_to_vmem [thread:$0]  %s6202_s5, 7168, %s62_s24, [#allocation9], %s4797_s1, %s4797_s1, %s4798_s10  }
  0x25   :  { %s4799_s15 = smov [#allocation2]   ;;  %s4800_s17 = smov [#allocation7]  }
  0x26   :  { %s24_s16 = sshll.u32 %s4799_s15, 4  ;;  %s47_s18 = sshll.u32 %s4800_s17, 4  ;;  %s25_s16 = int_to_ptr.vmem [resolvable:$true] %s24_s16  ;;  %s4885_s18 = int_to_ptr.vmem [resolvable:$true] %s47_s18 }
  0x27   :  { %s4633_s23 = scalar_lea.hbm %s6197_s0, 896 }
  0x28   :  { %p4634_p2 = scmp.ne.s32.totalorder %s6197_s0, %s4633_s23  ;;  %p4637_p3 = scmp.lt.u32.totalorder %s4633_s23, %s6197_s0 }
  0x2a   :  { %p4639_p4 = pnand %p4637_p3, %p4634_p2 }
  0x2c   :  { %4642 = shalt.err (!%p4639_p4)
}
  0x2d   :  { %s4643_s5 = scalar_lea.vmem %s25_s16, 896  ;;  %p4648_p6 = scmp.lt.s32.totalorder %s25_s16, %s25_s16 }
  0x2e   :  { %p4644_p5 = scmp.ne.s32.totalorder %s25_s16, %s4643_s5  ;;  %p4649_p7 = scmp.lt.s32.totalorder %s4643_s5, %s4643_s5 }
  0x30   :  { %p4650_p8 = por %p4649_p7, %p4648_p6 }
  0x32   :  { %p4651_p9 = pnand %p4650_p8, %p4644_p5 }
  0x34   :  { %4654 = shalt.err (!%p4651_p9)
}
  0x35   :  { %27 = dma.hbm_to_vmem [thread:$0]  %s6197_s0, 896, %s25_s16, [#allocation3]  }
  0x36   :  { %s4655_s12 = scalar_lea.hbm %s6200_s3, 1024 }
  0x37   :  { %p4656_p10 = scmp.ne.s32.totalorder %s6200_s3, %s4655_s12  ;;  %p4659_p11 = scmp.lt.u32.totalorder %s4655_s12, %s6200_s3 }
  0x39   :  { %p4661_p12 = pnand %p4659_p11, %p4656_p10 }
  0x3b   :  { %4664 = shalt.err (!%p4661_p12)
}
  0x3c   :  { %s4665_s15 = scalar_lea.vmem %s4885_s18, 1024  ;;  %p4670_p0 = scmp.lt.s32.totalorder %s4885_s18, %s4885_s18 }
  0x3d   :  { %p4666_p13 = scmp.ne.s32.totalorder %s4885_s18, %s4665_s15  ;;  %p4671_p1 = scmp.lt.s32.totalorder %s4665_s15, %s4665_s15 }
  0x3f   :  { %p4672_p2 = por %p4671_p1, %p4670_p0 }
  0x41   :  { %p4673_p3 = pnand %p4672_p2, %p4666_p13 }
  0x43   :  { %4676 = shalt.err (!%p4673_p3)
}
  0x44   :  { %53 = dma.hbm_to_vmem [thread:$0]  %s6200_s3, 1024, %s4885_s18, [#allocation6], %s4794_s19, %s4794_s19, %s4795_s20  }
  0x45   :  { %s4801_s17 = smov [#allocation10]   ;;  %s4677_s25 = scalar_lea.hbm %s6204_s7, 7168 }
  0x46   :  { %s75_s21 = sshll.u32 %s4801_s17, 4  ;;  %p4678_p4 = scmp.ne.s32.totalorder %s6204_s7, %s4677_s25  ;;  %s76_s21 = int_to_ptr.vmem [resolvable:$true] %s75_s21 }
  0x47   :  { %p4681_p5 = scmp.lt.u32.totalorder %s4677_s25, %s6204_s7 }
  0x49   :  { %p4683_p6 = pnand %p4681_p5, %p4678_p4 }
  0x4b   :  { %4686 = shalt.err (!%p4683_p6)
}
  0x4c   :  { %s4687_s24 = scalar_lea.vmem %s76_s21, 7168  ;;  %p4692_p8 = scmp.lt.s32.totalorder %s76_s21, %s76_s21 }
  0x4d   :  { %p4688_p7 = scmp.ne.s32.totalorder %s76_s21, %s4687_s24  ;;  %p4693_p9 = scmp.lt.s32.totalorder %s4687_s24, %s4687_s24 }
  0x4f   :  { %p4694_p10 = por %p4693_p9, %p4692_p8 }
  0x51   :  { %p4695_p11 = pnand %p4694_p10, %p4688_p7 }
  0x53   :  { %4698 = shalt.err (!%p4695_p11)
}
  0x54   :  { %81 = dma.hbm_to_vmem [thread:$0]  %s6204_s7, 7168, %s76_s21, [#allocation9], %s4794_s19, %s4794_s19, %s4795_s20  }
  0x55   :  { %4753 = dma.done.wait [#allocation3], 896  }
  0x56   :  { %4754 = vsyncadd [#allocation3], 4294966400 }
  0x57   :  { %4755 = dma.done.wait [#allocation6], 8192  }
  0x58   :  { %4756 = vsyncadd [#allocation6], 4294959104 }
  0x59   :  { %4757 = dma.done.wait [#allocation9], 14336  }
  0x5a   :  { %4758 = vsyncadd [#allocation9], 4294952960  ;;  %v123_v0 = vlaneseq  ;;  %v100_v3 = vld [vmem:[#allocation2] sm:$0xff]   ;;  %v101_v4 = vld [vmem:[#allocation2 + $0x8] sm:$0xff]  }
  0x5b   :  { %v102_v5 = vld [vmem:[#allocation2 + $0x10] sm:$0xff]   ;;  %v103_v9 = vld [vmem:[#allocation2 + $0x18] sm:$0xff]   ;;  %v104_v10 = vld [vmem:[#allocation2 + $0x20] sm:$0xff]  }
  0x5c   :  { %v124_v1 = vshrl.u32 %v123_v0, 7  ;;  %v105_v11 = vld [vmem:[#allocation2 + $0x28] sm:$0xff]   ;;  %v106_v15 = vld [vmem:[#allocation2 + $0x30] sm:$0xff]   ;;  %v4937_v16 = vld [vmem:[%s6199_s2] ss:$0 sm:$0xff]  ;;  %s4975_s2 = smov 0  }
  0x5d   :  { %v4942_v17 = vld [vmem:[%s6201_s4] ss:$0 sm:$0xff] }
  0x5e   :  { %v125_v2 = vsub.s32 0, %v124_v1  ;;  %v129_v6 = vsub.s32 1, %v124_v1  ;;  %v133_v7 = vsub.s32 2, %v124_v1  ;;  %v137_v8 = vsub.s32 3, %v124_v1  ;;  %v121_v18 = vld [vmem:[%s6203_s6] sm:$0xff] }
  0x5f   :  { %v141_v12 = vsub.s32 4, %v124_v1  ;;  %v145_v13 = vsub.s32 5, %v124_v1  ;;  %v149_v14 = vsub.s32 6, %v124_v1 }
  0x60   :  { %v4947_v19 = vrot.slane %v121_v18, %v125_v2  ;;  %v4949_v20 = vrot.slane %v121_v18, %v129_v6  ;;  %v4951_v21 = vrot.slane %v121_v18, %v133_v7  ;;  %v4953_v22 = vrot.slane %v121_v18, %v137_v8 }
  0x61   :  { %v4955_v23 = vrot.slane %v121_v18, %v141_v12  ;;  %v4957_v24 = vrot.slane %v121_v18, %v145_v13  ;;  %v4959_v25 = vrot.slane %v121_v18, %v149_v14 }
  0x62   :  { %6400 = vst [vmem:[#allocation16_spill] sm:$0xff] %v4947_v19  ;;  %6401 = vst [vmem:[#allocation17_spill] sm:$0xff] %v4949_v20 }
  0x63   :  { %6402 = vst [vmem:[#allocation18_spill] sm:$0xff] %v4951_v21  ;;  %6403 = vst [vmem:[#allocation19_spill] sm:$0xff] %v4953_v22 }
  0x64   :  { %6404 = vst [vmem:[#allocation20_spill] sm:$0xff] %v4955_v23  ;;  %6405 = vst [vmem:[#allocation21_spill] sm:$0xff] %v4957_v24 }
  0x65   :  { %6406 = vst [vmem:[#allocation22_spill] sm:$0xff] %v4959_v25 }
  0x66 LB: > { %6411 = vst [vmem:[#allocation23_spill] sm:$0xff] %v4763_v15  ;;  %6412 = vst [vmem:[#allocation24_spill] sm:$0xff] %v4767_v11  ;;  %v4253_v26 = vld [vmem:[#allocation5 + $0x40] sm:$0xff]   ;;  %v172_v29 = vpack.c.bf16 %v4783_v4, %v4783_v4  ;;  %v174_v30 = vpack.c.bf16 %v4775_v9, %v4775_v9  ;;  %v4257_v32 = vld [vmem:[#allocation5 + $0x48] sm:$0xff]   ;;  %v171_v59 = vpack.c.bf16 %v4787_v3, %v4787_v3  ;;  %v6226_v2 = vmov 0.0   ;;  %s163_s2 = sadd.s32 1, %s4791_s2   ;;  %v4775_v9 = vphi %v103_v9, %v6735_v9   ;;  %v4771_v10 = vphi %v104_v10, %v6734_v10   ;;  %v4767_v11 = vphi %v105_v11, %v6733_v11   ;;  %v4763_v15 = vphi %v106_v15, %v6732_v15   ;;  %s4791_s2 = sphi %s4975_s2, %s163_s2   ;;  %v4787_v3 = vphi %v100_v3, %v6738_v3   ;;  %v4783_v4 = vphi %v101_v4, %v6737_v4   ;;  %v4779_v5 = vphi %v102_v5, %v6736_v5  }
  0x67   : > { %6413 = vst [vmem:[#allocation25_spill] sm:$0xff] %v4771_v10  ;;  %v4254_v27 = vld [vmem:[#allocation5] sm:$0xff]   ;;  %3467 = vmatprep.subr.bf16.mxu0 %v4253_v26  ;;  %v5005_v33 = vld [vmem:[#allocation5 + $0x8] sm:$0xff]   ;;  %v5013_v36 = vld [vmem:[#allocation5 + $0x50] sm:$0xff]   ;;  %v173_v62 = vpack.c.bf16 %v4779_v5, %v4779_v5  ;;  %v176_v63 = vpack.c.bf16 %v4767_v11, %v4767_v11  ;;  %vm4803_vm0 = vmmov 0   ;;  %p160_p12 = scmp.ge.s32.totalorder %s163_s2, 8  }
  0x68   : > { %v4255_v28 = vld [vmem:[#allocation5 + $0xc0] sm:$0xff]   ;;  %3468 = vmatpush3.bf16.msra.mxu0 %v4254_v27  ;;  %658 = vmatprep.mubr.bf16.mxu0 %v172_v29  ;;  %v5007_v34 = vld [vmem:[#allocation5 + $0xc8] sm:$0xff]   ;;  %v5016_v37 = vld [vmem:[#allocation5 + $0x10] sm:$0xff]   ;;  %vm4806_vm1 = vmmov (%p160_p12), 0   ;;  %s4807_s12 = smov (%p160_p12), [#allocation11]  }
  0x69   : > { %v6408_v20 = vld [vmem:[#allocation17_spill] sm:$0xff]  ;;  %v6410_v19 = vld [vmem:[#allocation16_spill] sm:$0xff]  ;;  %v4256_v31 = vld [vmem:[#allocation5 + $0x80] sm:$0xff]   ;;  %3489 = vmatprep.subr.bf16.mxu1 %v4255_v28  ;;  %698 = vmatprep.mubr.bf16.mxu1 %v174_v30 }
  0x6a   : > { %v6407_v22 = vld [vmem:[#allocation19_spill] sm:$0xff]  ;;  %v6409_v21 = vld [vmem:[#allocation18_spill] sm:$0xff]  ;;  %3490 = vmatpush3.bf16.msra.mxu1 %v4256_v31  ;;  %3469 = vmatprep.subr.bf16.mxu0 %v4257_v32  ;;  %v5010_v35 = vld [vmem:[#allocation5 + $0x88] sm:$0xff]  }
  0x6b   : > { %3491 = vmatprep.subr.bf16.mxu1 %v5007_v34  ;;  %v5019_v38 = vld [vmem:[#allocation5 + $0xd0] sm:$0xff]   ;;  %v5025_v40 = vld [vmem:[#allocation5 + $0x58] sm:$0xff]   ;;  %v5037_v44 = vld [vmem:[#allocation5 + $0x60] sm:$0xff]  }
  0x6c   : > { %3470 = vmatpush3.bf16.msra.mxu0 %v5005_v33  ;;  %v5022_v39 = vld [vmem:[#allocation5 + $0x90] sm:$0xff]   ;;  %v5028_v41 = vld [vmem:[#allocation5 + $0x18] sm:$0xff]   ;;  %v5040_v45 = vld [vmem:[#allocation5 + $0x20] sm:$0xff]  }
  0x6d   : > { %3471 = vmatprep.subr.bf16.mxu0 %v5013_v36  ;;  %v5031_v42 = vld [vmem:[#allocation5 + $0xd8] sm:$0xff]   ;;  %v5043_v46 = vld [vmem:[#allocation5 + $0xe0] sm:$0xff]   ;;  %v5049_v48 = vld [vmem:[#allocation5 + $0x68] sm:$0xff]  }
  0x6e   : > { %3492 = vmatpush3.bf16.msra.mxu1 %v5010_v35  ;;  %v5034_v43 = vld [vmem:[#allocation5 + $0x98] sm:$0xff]   ;;  %v5046_v47 = vld [vmem:[#allocation5 + $0xa0] sm:$0xff]   ;;  %v5052_v49 = vld [vmem:[#allocation5 + $0x28] sm:$0xff]  }
  0x6f   : > { %3493 = vmatprep.subr.bf16.mxu1 %v5019_v38  ;;  %v5055_v50 = vld [vmem:[#allocation5 + $0xe8] sm:$0xff]   ;;  %v5061_v52 = vld [vmem:[#allocation5 + $0x70] sm:$0xff]   ;;  %v5073_v56 = vld [vmem:[#allocation5 + $0x78] sm:$0xff]  }
  0x70   : > { %3472 = vmatpush3.bf16.msra.mxu0 %v5016_v37  ;;  %v5058_v51 = vld [vmem:[#allocation5 + $0xa8] sm:$0xff]   ;;  %v5064_v53 = vld [vmem:[#allocation5 + $0x30] sm:$0xff]   ;;  %v5076_v57 = vld [vmem:[#allocation5 + $0x38] sm:$0xff]  }
  0x71   : > { %3473 = vmatprep.subr.bf16.mxu0 %v5025_v40  ;;  %v5067_v54 = vld [vmem:[#allocation5 + $0xf0] sm:$0xff]   ;;  %v5079_v58 = vld [vmem:[#allocation5 + $0xf8] sm:$0xff]   ;;  %v5087_v61 = vld [vmem:[#allocation5 + $0x140] sm:$0xff]  }
  0x72   : > { %3494 = vmatpush3.bf16.msra.mxu1 %v5022_v39  ;;  %v5070_v55 = vld [vmem:[#allocation5 + $0xb0] sm:$0xff]   ;;  %v5084_v60 = vld [vmem:[#allocation5 + $0xb8] sm:$0xff]   ;;  %v5094_v0 = vld [vmem:[#allocation5 + $0x100] sm:$0xff]  }
  0x73   : > { %3495 = vmatprep.subr.bf16.mxu1 %v5031_v42  ;;  %v5097_v1 = vld [vmem:[#allocation5 + $0x180] sm:$0xff]   ;;  %v5101_v6 = vld [vmem:[#allocation5 + $0x148] sm:$0xff]   ;;  %v5110_v12 = vld [vmem:[#allocation5 + $0x150] sm:$0xff]  }
  0x74   : > { %3474 = vmatpush3.bf16.msra.mxu0 %v5028_v41  ;;  %v5103_v7 = vld [vmem:[#allocation5 + $0x108] sm:$0xff]   ;;  %6414 = vst [vmem:[#allocation26_spill] sm:$0xff] %v5110_v12  ;;  %v5115_v13 = vld [vmem:[#allocation5 + $0x110] sm:$0xff]   ;;  %v5121_v18 = vld [vmem:[#allocation5 + $0x158] sm:$0xff]  }
  0x75   : > { %3475 = vmatprep.subr.bf16.mxu0 %v5037_v44  ;;  %v5107_v8 = vld [vmem:[#allocation5 + $0x188] sm:$0xff]   ;;  %6415 = vst [vmem:[#allocation27_spill] sm:$0xff] %v5115_v13  ;;  %v5118_v14 = vld [vmem:[#allocation5 + $0x190] sm:$0xff]   ;;  %6417 = vst [vmem:[#allocation29_spill] sm:$0xff] %v5121_v18 }
  0x76   : > { %3496 = vmatpush3.bf16.msra.mxu1 %v5034_v43  ;;  %6416 = vst [vmem:[#allocation28_spill] sm:$0xff] %v5118_v14  ;;  %v5125_v26 = vld [vmem:[#allocation5 + $0x118] sm:$0xff]   ;;  %v5128_v27 = vld [vmem:[#allocation5 + $0x160] sm:$0xff]   ;;  %v5138_v30 = vld [vmem:[#allocation5 + $0x168] sm:$0xff]  }
  0x77   : > { %3497 = vmatprep.subr.bf16.mxu1 %v5043_v46  ;;  %6418 = vst [vmem:[#allocation30_spill] sm:$0xff] %v5125_v26  ;;  %6419 = vst [vmem:[#allocation31_spill] sm:$0xff] %v5128_v27  ;;  %v5131_v28 = vld [vmem:[#allocation5 + $0x198] sm:$0xff]   ;;  %v5135_v29 = vld [vmem:[#allocation5 + $0x120] sm:$0xff]  }
  0x78   : > { %3476 = vmatpush3.bf16.msra.mxu0 %v5040_v45  ;;  %6420 = vst [vmem:[#allocation32_spill] sm:$0xff] %v5131_v28  ;;  %6421 = vst [vmem:[#allocation33_spill] sm:$0xff] %v5135_v29  ;;  %v5141_v31 = vld [vmem:[#allocation5 + $0x1a0] sm:$0xff]   ;;  %v5145_v32 = vld [vmem:[#allocation5 + $0x128] sm:$0xff]  }
  0x79   : > { %3477 = vmatprep.subr.bf16.mxu0 %v5049_v48  ;;  %6422 = vst [vmem:[#allocation34_spill] sm:$0xff] %v5138_v30  ;;  %6423 = vst [vmem:[#allocation35_spill] sm:$0xff] %v5141_v31  ;;  %v5157_v11 = vld [vmem:[#allocation5 + $0x1b0] sm:$0xff]   ;;  %v5159_v24 = vld [vmem:[#allocation5 + $0x178] sm:$0xff]  }
  0x7a   : > { %3498 = vmatpush3.bf16.msra.mxu1 %v5046_v47  ;;  %6424 = vst [vmem:[#allocation36_spill] sm:$0xff] %v5145_v32  ;;  %6428 = vst [vmem:[#allocation40_spill] sm:$0xff] %v5157_v11  ;;  %v5163_v25 = vld [vmem:[#allocation5 + $0x138] sm:$0xff]  }
  0x7b   : > { %3499 = vmatprep.subr.bf16.mxu1 %v5055_v50  ;;  %6429 = vst [vmem:[#allocation41_spill] sm:$0xff] %v5159_v24  ;;  %6430 = vst [vmem:[#allocation42_spill] sm:$0xff] %v5163_v25  ;;  %v5167_v23 = vld [vmem:[#allocation5 + $0x1b8] sm:$0xff]  }
  0x7c   : > { %3478 = vmatpush3.bf16.msra.mxu0 %v5052_v49  ;;  %6431 = vst [vmem:[#allocation43_spill] sm:$0xff] %v5167_v23 }
  0x7d   : > { %3479 = vmatprep.subr.bf16.mxu0 %v5061_v52 }
  0x7e   : > { %3500 = vmatpush3.bf16.msra.mxu1 %v5058_v51 }
  0x7f   : > { %3501 = vmatprep.subr.bf16.mxu1 %v5067_v54 }
  0x80   : > { %3480 = vmatpush3.bf16.msra.mxu0 %v5064_v53 }
  0x81   : > { %3481 = vmatprep.subr.bf16.mxu0 %v5073_v56 }
  0x82   : > { %3502 = vmatpush3.bf16.msra.mxu1 %v5070_v55 }
  0x83   : > { %3503 = vmatprep.subr.bf16.mxu1 %v5079_v58 }
  0x84   : > { %3482 = vmatpush3.bf16.msra.mxu0 %v5076_v57 }
  0x85   : > { %3511 = vmatprep.subr.bf16.mxu0 %v5087_v61 }
  0x86   : > { %3504 = vmatpush3.bf16.msra.mxu1 %v5084_v60 }
  0x87   : > { %659 = vmatmul.mubr.bf16.vlgmr.msra.gmra.mrb[0].mxu0 %v171_v59  ;;  %3914 = vmatprep.subr.bf16.mxu1 %v6226_v2  ;;  %v5148_v59 = vld [vmem:[#allocation5 + $0x170] sm:$0xff]  }
  0x88   : > { %3512 = vmatpush3.bf16.msra.mxu0 %v5094_v0  ;;  %738 = vmatprep.mubr.bf16.mxu0 %v176_v63  ;;  %6425 = vst [vmem:[#allocation37_spill] sm:$0xff] %v5148_v59  ;;  %v5154_v63 = vld [vmem:[#allocation5 + $0x130] sm:$0xff]  }
  0x89   : > { %699 = vmatmul.mubr.bf16.vlgmr.msra.gmra.mrb[0].mxu1 %v173_v62  ;;  %3513 = vmatprep.subr.bf16.mxu0 %v5101_v6  ;;  %v5151_v62 = vld [vmem:[#allocation5 + $0x1a8] sm:$0xff]   ;;  %6427 = vst [vmem:[#allocation39_spill] sm:$0xff] %v5154_v63 }
  0x8a   : > { %3915 = vmatpush3.bf16.msra.mxu1 %v5097_v1  ;;  %3930 = vmatprep.mubr.msk.bf16.mxu1 %vm4803_vm0, %v6226_v2  ;;  %6426 = vst [vmem:[#allocation38_spill] sm:$0xff] %v5151_v62 }
  0x8b   : > { %3916 = vmatprep.subr.bf16.mxu1 %v6226_v2 }
  0x8c   : > { %3514 = vmatpush3.bf16.msra.mxu0 %v5103_v7 }
  0x8d   : > { %3515 = vmatprep.subr.bf16.mxu0 %v5110_v12 }
  0x8e   : > { %3917 = vmatpush3.bf16.msra.mxu1 %v5107_v8 }
  0x8f   : > { %3918 = vmatprep.subr.bf16.mxu1 %v6226_v2 }
  0x90   : > { %3516 = vmatpush3.bf16.msra.mxu0 %v5115_v13 }
  0x91   : > { %3517 = vmatprep.subr.bf16.mxu0 %v5121_v18 }
  0x92   : > { %3919 = vmatpush3.bf16.msra.mxu1 %v5118_v14 }
  0x93   : > { %3920 = vmatprep.subr.bf16.mxu1 %v6226_v2 }
  0x94   : > { %3518 = vmatpush3.bf16.msra.mxu0 %v5125_v26 }
  0x95   : > { %3519 = vmatprep.subr.bf16.mxu0 %v5128_v27 }
  0x96   : > { %3921 = vmatpush3.bf16.msra.mxu1 %v5131_v28 }
  0x97   : > { %3922 = vmatprep.subr.bf16.mxu1 %v6226_v2 }
  0x98   : > { %3520 = vmatpush3.bf16.msra.mxu0 %v5135_v29 }
  0x99   : > { %3521 = vmatprep.subr.bf16.mxu0 %v5138_v30 }
  0x9a   : > { %3923 = vmatpush3.bf16.msra.mxu1 %v5141_v31 }
  0x9b   : > { %3924 = vmatprep.subr.bf16.mxu1 %v6226_v2 }
  0x9c   : > { %3522 = vmatpush3.bf16.msra.mxu0 %v5145_v32  ;;  %v175_v32 = vpack.c.bf16 %v4771_v10, %v4771_v10 }
  0x9d   : > { %3523 = vmatprep.subr.bf16.mxu0 %v5148_v59  ;;  %v177_v59 = vpack.c.bf16 %v4763_v15, %v4763_v15  ;;  %v5218_v15 = vld [vmem:[#allocation8 + $0x3c] ss:$28 sps:$4 sm:$0xff]  }
  0x9e   : > { %3925 = vmatpush3.bf16.msra.mxu1 %v5151_v62  ;;  %6443 = vst [vmem:[#allocation55_spill] sm:$0xff] %v5218_v15 }
  0x9f   : > { %3926 = vmatprep.subr.bf16.mxu1 %v6226_v2 }
  0xa0   : > { %3524 = vmatpush3.bf16.msra.mxu0 %v5154_v63 }
  0xa1   : > { %3525 = vmatprep.subr.bf16.mxu0 %v5159_v24  ;;  %v5181_v24 = vld [vmem:[#allocation7] sm:$0xff]  }
  0xa2   : > { %3927 = vmatpush3.bf16.msra.mxu1 %v5157_v11  ;;  %6432 = vst [vmem:[#allocation44_spill] sm:$0xff] %v5181_v24  ;;  %v5184_v11 = vld [vmem:[#allocation7 + $0x8] sm:$0xff]  }
  0xa3   : > { %3928 = vmatprep.subr.bf16.mxu1 %v6226_v2  ;;  %6433 = vst [vmem:[#allocation45_spill] sm:$0xff] %v5184_v11 }
  0xa4   : > { %3526 = vmatpush3.bf16.msra.mxu0 %v5163_v25  ;;  %v5188_v25 = vld [vmem:[#allocation7 + $0x10] sm:$0xff]  }
  0xa5   : > { %3934 = vmatprep.subr.bf16.mxu0 %v6226_v2  ;;  %6434 = vst [vmem:[#allocation46_spill] sm:$0xff] %v5188_v25 }
  0xa6   : > { %3929 = vmatpush3.bf16.msra.mxu1 %v5167_v23  ;;  %v5216_v23 = vld [vmem:[#allocation8] ss:$28 sps:$4 sm:$0xff]  }
  0xa7   : > { %739 = vmatmul.mubr.bf16.vlgmr.msra.gmra.mrb[4].mxu0 %v175_v32  ;;  %v5193_v32 = vld [vmem:[#allocation7 + $0x18] sm:$0xff]   ;;  %6442 = vst [vmem:[#allocation54_spill] sm:$0xff] %v5216_v23 }
  0xa8   : > { %3950 = vmatprep.mubr.msk.bf16.mxu0 %vm4803_vm0, %v6226_v2  ;;  %3935 = vmatpush3.bf16.msra.mxu0 %v5181_v24  ;;  %6435 = vst [vmem:[#allocation47_spill] sm:$0xff] %v5193_v32  ;;  %v5212_v24 = vld [vmem:[#allocation8 + $0x4] ss:$28 sps:$4 sm:$0xff]  }
  0xa9   : > { %3931 = vmatmul.mubr.bf16.vlgmr.msra.gmra.mrb[4].mxu1 %v177_v59  ;;  %3936 = vmatprep.subr.bf16.mxu0 %v6226_v2  ;;  %v5197_v59 = vld [vmem:[#allocation7 + $0x20] sm:$0xff]   ;;  %6440 = vst [vmem:[#allocation52_spill] sm:$0xff] %v5212_v24 }
  0xaa   : > { %6436 = vst [vmem:[#allocation48_spill] sm:$0xff] %v5197_v59  ;;  %1246 = vmatprep.subr.bf16.mxu1 %v5212_v24  ;;  %v5235_v24 = vld [vmem:[#allocation8 + $0xa8] ss:$28 sps:$4 sm:$0xff]  }
  0xab   : > { %1247 = vmatpush1.bf16.msra.mxu1 %v5216_v23  ;;  %6448 = vst [vmem:[#allocation60_spill] sm:$0xff] %v5235_v24 }
  0xac   : > { %3937 = vmatpush3.bf16.msra.mxu0 %v5184_v11  ;;  %v5201_v11 = vld [vmem:[#allocation7 + $0x28] sm:$0xff]   ;;  %1248 = vmatprep.subr.bf16.mxu1 %v5218_v15 }
  0xad   : > { %3938 = vmatprep.subr.bf16.mxu0 %v6226_v2  ;;  %6437 = vst [vmem:[#allocation49_spill] sm:$0xff] %v5201_v11 }
  0xb0   : > { %3939 = vmatpush3.bf16.msra.mxu0 %v5188_v25  ;;  %v5205_v25 = vld [vmem:[#allocation7 + $0x30] sm:$0xff]  }
  0xb1   : > { %3940 = vmatprep.subr.bf16.mxu0 %v6226_v2  ;;  %6438 = vst [vmem:[#allocation50_spill] sm:$0xff] %v5205_v25 }
  0xb4   : > { %3941 = vmatpush3.bf16.msra.mxu0 %v5193_v32  ;;  %v5209_v32 = vld [vmem:[#allocation7 + $0x38] sm:$0xff]  }
  0xb5   : > { %3942 = vmatprep.subr.bf16.mxu0 %v6226_v2  ;;  %6439 = vst [vmem:[#allocation51_spill] sm:$0xff] %v5209_v32 }
  0xb8   : > { %3943 = vmatpush3.bf16.msra.mxu0 %v5197_v59  ;;  %v5214_v59 = vld [vmem:[#allocation8 + $0xc] ss:$28 sps:$4 sm:$0xff]  }
  0xb9   : > { %3944 = vmatprep.subr.bf16.mxu0 %v6226_v2  ;;  %6441 = vst [vmem:[#allocation53_spill] sm:$0xff] %v5214_v59 }
  0xbc   : > { %3945 = vmatpush3.bf16.msra.mxu0 %v5201_v11  ;;  %v5232_v11 = vld [vmem:[#allocation8 + $0xac] ss:$28 sps:$4 sm:$0xff]  }
  0xbd   : > { %3946 = vmatprep.subr.bf16.mxu0 %v6226_v2  ;;  %6447 = vst [vmem:[#allocation59_spill] sm:$0xff] %v5232_v11 }
  0xc0   : > { %3947 = vmatpush3.bf16.msra.mxu0 %v5205_v25  ;;  %v5223_v25 = vld [vmem:[#allocation8 + $0x38] ss:$28 sps:$4 sm:$0xff]  }
  0xc1   : > { %3948 = vmatprep.subr.bf16.mxu0 %v6226_v2  ;;  %6444 = vst [vmem:[#allocation56_spill] sm:$0xff] %v5223_v25  ;;  %v5226_v2 = vld [vmem:[#allocation8 + $0x74] ss:$28 sps:$4 sm:$0xff]   ;;  %1249 = vmatpush1.bf16.msra.mxu1 %v5223_v25 }
  0xc2   : > { %6445 = vst [vmem:[#allocation57_spill] sm:$0xff] %v5226_v2  ;;  %1250 = vmatprep.subr.bf16.mxu1 %v5226_v2 }
  0xc4   : > { %3949 = vmatpush3.bf16.msra.mxu0 %v5209_v32  ;;  %v5229_v32 = vld [vmem:[#allocation8 + $0x70] ss:$28 sps:$4 sm:$0xff]  }
  0xc5   : > { %1287 = vmatprep.subr.bf16.mxu0 %v5214_v59  ;;  %6446 = vst [vmem:[#allocation58_spill] sm:$0xff] %v5229_v32  ;;  %1251 = vmatpush1.bf16.msra.mxu1 %v5229_v32  ;;  %v5238_v59 = vld [vmem:[#allocation8 + $0xe4] ss:$28 sps:$4 sm:$0xff]  }
  0xc6   : > { %1252 = vmatprep.subr.bf16.mxu1 %v5232_v11  ;;  %6449 = vst [vmem:[#allocation61_spill] sm:$0xff] %v5238_v59 }
  0xc9   : > { %1253 = vmatpush1.bf16.msra.mxu1 %v5235_v24 }
  0xca   : > { %1254 = vmatprep.subr.bf16.mxu1 %v5238_v59 }
 0x15a   : > { %v3483_v15 = vpop.f32.mrb[0].mxu0 }
 0x15b   : > { %v3484_v25 = vpop.f32.mrb[1].mxu0 }
 0x15c   : > { %v3485_v23 = vadd.f32 %v3484_v25, %v3483_v15  ;;  %v3486_v10 = vpop.f32.mrb[2].mxu0  ;;  %v3505_v63 = vpop.f32.mrb[0].mxu1 }
 0x15d   : > { %v3487_v2 = vpop.f32.mrb[3].mxu0  ;;  %v3506_v62 = vpop.f32.mrb[1].mxu1 }
 0x15e   : > { %v661_v30 = vadd.f32 %v3485_v23, %v4937_v16  ;;  %v3507_v32 = vadd.f32 %v3506_v62, %v3505_v63  ;;  %v3508_v31 = vpop.f32.mrb[2].mxu1  ;;  %v5243_v2 = vld [vmem:[#allocation8 + $0x8] ss:$28 sps:$4 sm:$0xff]   ;;  %v5285_v63 = vld [vmem:[#allocation8 + $0x154] ss:$28 sps:$4 sm:$0xff]  }
 0x15f   : > { %v3509_v29 = vpop.f32.mrb[3].mxu1  ;;  %v5245_v62 = vld [vmem:[#allocation8 + $0x44] ss:$28 sps:$4 sm:$0xff]  }
 0x160   : > { %v701_v27 = vadd.f32 %v3507_v32, %v661_v30  ;;  %6450 = vst [vmem:[#allocation62_spill] sm:$0xff] %v5245_v62  ;;  %v5248_v29 = vld [vmem:[#allocation8 + $0x40] ss:$28 sps:$4 sm:$0xff]   ;;  %v5277_v30 = vld [vmem:[#allocation8 + $0x118] ss:$28 sps:$4 sm:$0xff]  }
 0x161   : > { %6451 = vst [vmem:[#allocation63_spill] sm:$0xff] %v5248_v29  ;;  %v5279_v31 = vld [vmem:[#allocation8 + $0x120] ss:$28 sps:$4 sm:$0xff]  }
 0x162   : > { %6459 = vst [vmem:[#allocation71_spill] sm:$0xff] %v5279_v31  ;;  %v5287_v32 = vld [vmem:[#allocation8 + $0x15c] ss:$28 sps:$4 sm:$0xff]  }
 0x163   : > { %6460 = vst [vmem:[#allocation72_spill] sm:$0xff] %v5287_v32 }
 0x17a   : > { %v3527_v11 = vpop.f32.mrb[4].mxu0 }
 0x17b   : > { %v3528_v28 = vpop.f32.mrb[5].mxu0 }
 0x17c   : > { %v3529_v26 = vadd.f32 %v3528_v28, %v3527_v11  ;;  %v3530_v18 = vpop.f32.mrb[6].mxu0  ;;  %v780_v24 = vpop.f32.mrb[4].mxu1  ;;  %v5251_v11 = vld [vmem:[#allocation8 + $0x7c] ss:$28 sps:$4 sm:$0xff]   ;;  %v5275_v28 = vld [vmem:[#allocation8 + $0x124] ss:$28 sps:$4 sm:$0xff]  }
 0x17d   : > { %v3531_v14 = vpop.f32.mrb[7].mxu0  ;;  %v3932_v59 = vpop.f32.mrb[5].mxu1  ;;  %6452 = vst [vmem:[#allocation64_spill] sm:$0xff] %v5251_v11  ;;  %v5267_v18 = vld [vmem:[#allocation8 + $0xe0] ss:$28 sps:$4 sm:$0xff]   ;;  %6458 = vst [vmem:[#allocation70_spill] sm:$0xff] %v5275_v28 }
 0x17e   : > { %v741_v13 = vadd.f32 %v3529_v26, %v701_v27  ;;  %v783_v12 = vpop.f32.mrb[6].mxu1  ;;  %v5263_v14 = vld [vmem:[#allocation8 + $0xec] ss:$28 sps:$4 sm:$0xff]   ;;  %1255 = vmatpush1.bf16.msra.mxu1 %v5267_v18  ;;  %v5273_v27 = vld [vmem:[#allocation8 + $0x11c] ss:$28 sps:$4 sm:$0xff]  }
 0x17f   : > { %v3933_v15 = vpop.f32.mrb[7].mxu1  ;;  %v5254_v12 = vld [vmem:[#allocation8 + $0x78] ss:$28 sps:$4 sm:$0xff]   ;;  %6456 = vst [vmem:[#allocation68_spill] sm:$0xff] %v5263_v14  ;;  %v5269_v26 = vld [vmem:[#allocation8 + $0xe8] ss:$28 sps:$4 sm:$0xff]   ;;  %1256 = vmatprep.subr.bf16.mxu1 %v5273_v27 }
 0x180   : > { %v781_v10 = vadd.f32 %v780_v24, %v741_v13  ;;  %6453 = vst [vmem:[#allocation65_spill] sm:$0xff] %v5254_v12  ;;  %v5257_v24 = vld [vmem:[#allocation8 + $0xb4] ss:$28 sps:$4 sm:$0xff]   ;;  %6457 = vst [vmem:[#allocation69_spill] sm:$0xff] %v5269_v26 }
 0x181   : > { %6454 = vst [vmem:[#allocation66_spill] sm:$0xff] %v5257_v24  ;;  %v5260_v13 = vld [vmem:[#allocation8 + $0xb0] ss:$28 sps:$4 sm:$0xff]   ;;  %v5291_v15 = vld [vmem:[#allocation8 + $0x158] ss:$28 sps:$4 sm:$0xff]  }
 0x182   : > { %4397 = vtanh.f32 %v781_v10  ;;  %6455 = vst [vmem:[#allocation67_spill] sm:$0xff] %v5260_v13  ;;  %1257 = vmatpush1.bf16.msra.mxu1 %v5277_v30  ;;  %v5289_v59 = vld [vmem:[#allocation8 + $0x150] ss:$28 sps:$4 sm:$0xff]   ;;  %6461 = vst [vmem:[#allocation73_spill] sm:$0xff] %v5291_v15 }
 0x183   : > { %1258 = vmatprep.subr.bf16.mxu1 %v5285_v63  ;;  %v5297_v10 = vld [vmem:[#allocation8 + $0x18c] ss:$28 sps:$4 sm:$0xff]  }
 0x186   : > { %1259 = vmatpush1.bf16.msra.mxu1 %v5289_v59 }
 0x187   : > { %1260 = vmatprep.subr.bf16.mxu1 %v5297_v10 }
 0x18c   : > { %v4398_v25 = vpop.eup %4397 }
 0x18d   : > { %v787_v23 = vpack.c.bf16 %v4398_v25, %v4398_v25  ;;  %v5299_v25 = vld [vmem:[#allocation8 + $0x194] ss:$28 sps:$4 sm:$0xff]  }
 0x18e   : > { %6462 = vst [vmem:[#allocation74_spill] sm:$0xff] %v5299_v25 }
 0x18f   : > { %3951 = vmatmul.mubr.bf16.vlgmr.msra.gmra.mrb[8].mxu0 %v787_v23  ;;  %v5301_v23 = vld [vmem:[#allocation8 + $0x188] ss:$28 sps:$4 sm:$0xff]  }
 0x190   : > { %1288 = vmatpush1.bf16.msra.mxu0 %v5243_v2  ;;  %1261 = vmatpush1.bf16.msra.mxu1 %v5301_v23 }
 0x191   : > { %1289 = vmatprep.subr.bf16.mxu0 %v5245_v62  ;;  %v5320_v62 = vld [vmem:[#allocation8 + $0x4c] ss:$28 sps:$4 sm:$0xff]  }
 0x192   : > { %6466 = vst [vmem:[#allocation77_spill] sm:$0xff] %v5320_v62 }
 0x194   : > { %1290 = vmatpush1.bf16.msra.mxu0 %v5248_v29 }
 0x195   : > { %1291 = vmatprep.subr.bf16.mxu0 %v5251_v11  ;;  %v5318_v11 = vld [vmem:[#allocation8 + $0x18] ss:$28 sps:$4 sm:$0xff]  }
 0x196   : > { %6465 = vst [vmem:[#allocation76_spill] sm:$0xff] %v5318_v11 }
 0x198   : > { %1292 = vmatpush1.bf16.msra.mxu0 %v5254_v12 }
 0x199   : > { %1293 = vmatprep.subr.bf16.mxu0 %v5257_v24 }
 0x19c   : > { %1294 = vmatpush1.bf16.msra.mxu0 %v5260_v13 }
 0x19d   : > { %1295 = vmatprep.subr.bf16.mxu0 %v5263_v14 }
 0x1a0   : > { %1296 = vmatpush1.bf16.msra.mxu0 %v5269_v26 }
 0x1a1   : > { %1297 = vmatprep.subr.bf16.mxu0 %v5275_v28  ;;  %v6464_v28 = vmov 0.0  }
 0x1a4   : > { %1298 = vmatpush1.bf16.msra.mxu0 %v5279_v31  ;;  %v5303_v31 = vld [vmem:[#allocation8 + $0x190] ss:$28 sps:$4 sm:$0xff]  }
 0x1a5   : > { %1299 = vmatprep.subr.bf16.mxu0 %v5287_v32  ;;  %6463 = vst [vmem:[#allocation75_spill] sm:$0xff] %v5303_v31  ;;  %v5309_v32 = vld [vmem:[#allocation8 + $0x14] ss:$28 sps:$4 sm:$0xff]  }
 0x1a6   : > { %1328 = vmatprep.subr.bf16.mxu1 %v5309_v32 }
 0x1a8   : > { %1300 = vmatpush1.bf16.msra.mxu0 %v5291_v15  ;;  %v6268_v15 = vmov 0  }
 0x1a9   : > { %1301 = vmatprep.subr.bf16.mxu0 %v5299_v25  ;;  %1278 = vmatprep.mubr.bf16.mxu1 %v6268_v15 }
 0x1aa   : > { %1319 = vmatprep.mubr.bf16.mxu0 %v6268_v15  ;;  %v5324_v15 = vld [vmem:[#allocation8 + $0x48] ss:$28 sps:$4 sm:$0xff]  }
 0x1ab   : > { %6467 = vst [vmem:[#allocation78_spill] sm:$0xff] %v5324_v15 }
 0x1ac   : > { %1302 = vmatpush1.bf16.msra.mxu0 %v5303_v31  ;;  %v5316_v31 = vld [vmem:[#allocation8 + $0x10] ss:$28 sps:$4 sm:$0xff]  }
 0x1ad   : > { %3954 = vmatprep.subr.bf16.mxu0 %v6464_v28 }
 0x262   : > { %v886_v26 = vpop.f32.mrb[8].mxu0 }
 0x263   : > { %v887_v14 = vadd.f32 %v4942_v17, %v886_v26  ;;  %v3952_v13 = vpop.f32.mrb[9].mxu0  ;;  %v5339_v26 = vld [vmem:[#allocation8 + $0x88] ss:$28 sps:$4 sm:$0xff]  }
 0x264   : > { %v889_v25 = vpop.f32.mrb[10].mxu0  ;;  %v5326_v13 = vld [vmem:[#allocation8 + $0x50] ss:$28 sps:$4 sm:$0xff]   ;;  %6472 = vst [vmem:[#allocation82_spill] sm:$0xff] %v5339_v26 }
 0x265   : > { %4399 = vtanh.f32 %v887_v14  ;;  %v3953_v24 = vpop.f32.mrb[11].mxu0  ;;  %6468 = vst [vmem:[#allocation79_spill] sm:$0xff] %v5326_v13  ;;  %v6470_v14 = vmov 0   ;;  %v5343_v25 = vld [vmem:[#allocation8 + $0xbc] ss:$28 sps:$4 sm:$0xff]  }
 0x266   : > { %v5330_v24 = vld [vmem:[#allocation8 + $0x84] ss:$28 sps:$4 sm:$0xff]   ;;  %6473 = vst [vmem:[#allocation83_spill] sm:$0xff] %v5343_v25 }
 0x267   : > { %6469 = vst [vmem:[#allocation80_spill] sm:$0xff] %v5330_v24 }
 0x26f   : > { %v4400_v12 = vpop.eup %4399 }
 0x270   : > { %v893_v29 = vpack.c.bf16 %v4400_v12, %v4400_v12  ;;  %v5337_v12 = vld [vmem:[#allocation8 + $0x80] ss:$28 sps:$4 sm:$0xff]  }
 0x271   : > { %6471 = vst [vmem:[#allocation81_spill] sm:$0xff] %v5337_v12 }
 0x272   : > { %1279 = vmatmul.mubr.bf16.vlgmr.msra.gmra.mrb[8].mxu1 %v893_v29  ;;  %1320 = vmatmul.mubr.bf16.vlgmr.msra.gmra.mrb[12].mxu0 %v893_v29 }
 0x273   : > { %1329 = vmatpush1.bf16.msra.mxu1 %v5316_v31  ;;  %3955 = vmatpush3.bf16.msra.mxu0 %v5318_v11  ;;  %v5349_v11 = vld [vmem:[#allocation8 + $0xc0] ss:$28 sps:$4 sm:$0xff]  }
 0x274   : > { %1330 = vmatprep.subr.bf16.mxu1 %v5320_v62  ;;  %3956 = vmatprep.subr.bf16.mxu0 %v6464_v28  ;;  %v5347_v62 = vld [vmem:[#allocation8 + $0xb8] ss:$28 sps:$4 sm:$0xff]   ;;  %6475 = vst [vmem:[#allocation85_spill] sm:$0xff] %v5349_v11 }
 0x275   : > { %1360 = vmatprep.mubr.bf16.mxu1 %v6470_v14  ;;  %3970 = vmatprep.mubr.msk.bf16.mxu0 %vm4803_vm0, %v6464_v28  ;;  %6474 = vst [vmem:[#allocation84_spill] sm:$0xff] %v5347_v62 }
 0x277   : > { %1331 = vmatpush1.bf16.msra.mxu1 %v5324_v15  ;;  %3957 = vmatpush3.bf16.msra.mxu0 %v5326_v13  ;;  %v5353_v13 = vld [vmem:[#allocation8 + $0xf4] ss:$28 sps:$4 sm:$0xff]  }
 0x278   : > { %1332 = vmatprep.subr.bf16.mxu1 %v5330_v24  ;;  %3958 = vmatprep.subr.bf16.mxu0 %v6464_v28  ;;  %6476 = vst [vmem:[#allocation86_spill] sm:$0xff] %v5353_v13  ;;  %v5357_v24 = vld [vmem:[#allocation8 + $0xf0] ss:$28 sps:$4 sm:$0xff]   ;;  %v5359_v15 = vld [vmem:[#allocation8 + $0xf8] ss:$28 sps:$4 sm:$0xff]  }
 0x279   : > { %6477 = vst [vmem:[#allocation87_spill] sm:$0xff] %v5357_v24  ;;  %6478 = vst [vmem:[#allocation88_spill] sm:$0xff] %v5359_v15 }
 0x27b   : > { %1333 = vmatpush1.bf16.msra.mxu1 %v5337_v12  ;;  %3959 = vmatpush3.bf16.msra.mxu0 %v5339_v26  ;;  %v5363_v26 = vld [vmem:[#allocation8 + $0x12c] ss:$28 sps:$4 sm:$0xff]  }
 0x27c   : > { %1334 = vmatprep.subr.bf16.mxu1 %v5343_v25  ;;  %3960 = vmatprep.subr.bf16.mxu0 %v6464_v28  ;;  %6479 = vst [vmem:[#allocation89_spill] sm:$0xff] %v5363_v26  ;;  %v5367_v25 = vld [vmem:[#allocation8 + $0x128] ss:$28 sps:$4 sm:$0xff]   ;;  %v5369_v12 = vld [vmem:[#allocation8 + $0x130] ss:$28 sps:$4 sm:$0xff]  }
 0x27d   : > { %6480 = vst [vmem:[#allocation90_spill] sm:$0xff] %v5369_v12 }
 0x27f   : > { %1335 = vmatpush1.bf16.msra.mxu1 %v5347_v62  ;;  %3961 = vmatpush3.bf16.msra.mxu0 %v5349_v11  ;;  %v5373_v11 = vld [vmem:[#allocation8 + $0x164] ss:$28 sps:$4 sm:$0xff]  }
 0x280   : > { %1336 = vmatprep.subr.bf16.mxu1 %v5353_v13  ;;  %3962 = vmatprep.subr.bf16.mxu0 %v6464_v28  ;;  %6481 = vst [vmem:[#allocation91_spill] sm:$0xff] %v5373_v11  ;;  %v5377_v13 = vld [vmem:[#allocation8 + $0x160] ss:$28 sps:$4 sm:$0xff]   ;;  %v5379_v62 = vld [vmem:[#allocation8 + $0x168] ss:$28 sps:$4 sm:$0xff]  }
 0x281   : > { %6482 = vst [vmem:[#allocation92_spill] sm:$0xff] %v5379_v62 }
 0x283   : > { %1337 = vmatpush1.bf16.msra.mxu1 %v5357_v24  ;;  %3963 = vmatpush3.bf16.msra.mxu0 %v5359_v15  ;;  %v5383_v15 = vld [vmem:[#allocation8 + $0x19c] ss:$28 sps:$4 sm:$0xff]  }
 0x284   : > { %1338 = vmatprep.subr.bf16.mxu1 %v5363_v26  ;;  %3964 = vmatprep.subr.bf16.mxu0 %v6464_v28  ;;  %6483 = vst [vmem:[#allocation93_spill] sm:$0xff] %v5383_v15  ;;  %v5387_v26 = vld [vmem:[#allocation8 + $0x198] ss:$28 sps:$4 sm:$0xff]   ;;  %v5389_v24 = vld [vmem:[#allocation8 + $0x1a0] ss:$28 sps:$4 sm:$0xff]  }
 0x285   : > { %6484 = vst [vmem:[#allocation94_spill] sm:$0xff] %v5387_v26 }
 0x287   : > { %1339 = vmatpush1.bf16.msra.mxu1 %v5367_v25  ;;  %3965 = vmatpush3.bf16.msra.mxu0 %v5369_v12  ;;  %v5398_v12 = vld [vmem:[#allocation5 + $0xc0] sm:$0xff]  }
 0x288   : > { %1340 = vmatprep.subr.bf16.mxu1 %v5373_v11  ;;  %3966 = vmatprep.subr.bf16.mxu0 %v6464_v28  ;;  %v5395_v11 = vld [vmem:[#allocation5 + $0x40] sm:$0xff]  }
 0x28b   : > { %1341 = vmatpush1.bf16.msra.mxu1 %v5377_v13  ;;  %3967 = vmatpush3.bf16.msra.mxu0 %v5379_v62  ;;  %v5401_v62 = vld [vmem:[#allocation5] sm:$0xff]  }
 0x28c   : > { %1342 = vmatprep.subr.bf16.mxu1 %v5383_v15  ;;  %3968 = vmatprep.subr.bf16.mxu0 %v6464_v28  ;;  %6485 = vst [vmem:[#allocation95_spill] sm:$0xff] %v5401_v62  ;;  %v5404_v15 = vld [vmem:[#allocation5 + $0x80] sm:$0xff]  }
 0x28d   : > { %6486 = vst [vmem:[#allocation96_spill] sm:$0xff] %v5404_v15 }
 0x28f   : > { %1343 = vmatpush1.bf16.msra.mxu1 %v5387_v26  ;;  %3969 = vmatpush3.bf16.msra.mxu0 %v5389_v24  ;;  %v5407_v26 = vld [vmem:[#allocation5 + $0x48] sm:$0xff]  }
 0x290   : > { %3560 = vmatprep.subr.bf16.mxu1 %v5395_v11  ;;  %3582 = vmatprep.subr.bf16.mxu0 %v5398_v12  ;;  %6487 = vst [vmem:[#allocation97_spill] sm:$0xff] %v5407_v26 }
 0x292   : > { %1361 = vmatmul.mubr.bf16.vlgmr.msra.gmra.mrb[12].mxu1 %v893_v29  ;;  %3971 = vmatmul.mubr.bf16.vlgmr.msra.gmra.mrb[16].mxu0 %v893_v29  ;;  %v6501_v29 = vld [vmem:[#allocation34_spill] sm:$0xff] }
 0x293   : > { %3561 = vmatpush3.bf16.msra.mxu1 %v5401_v62  ;;  %3583 = vmatpush3.bf16.msra.mxu0 %v5404_v15 }
 0x294   : > { %3562 = vmatprep.subr.bf16.mxu1 %v5407_v26  ;;  %3584 = vmatprep.subr.bf16.mxu0 %v5007_v34 }
 0x297   : > { %3563 = vmatpush3.bf16.msra.mxu1 %v5005_v33  ;;  %3585 = vmatpush3.bf16.msra.mxu0 %v5010_v35 }
 0x298   : > { %3564 = vmatprep.subr.bf16.mxu1 %v5013_v36  ;;  %3586 = vmatprep.subr.bf16.mxu0 %v5019_v38 }
 0x29b   : > { %3565 = vmatpush3.bf16.msra.mxu1 %v5016_v37  ;;  %3587 = vmatpush3.bf16.msra.mxu0 %v5022_v39 }
 0x29c   : > { %3566 = vmatprep.subr.bf16.mxu1 %v5025_v40  ;;  %3588 = vmatprep.subr.bf16.mxu0 %v5031_v42 }
 0x29f   : > { %3567 = vmatpush3.bf16.msra.mxu1 %v5028_v41  ;;  %3589 = vmatpush3.bf16.msra.mxu0 %v5034_v43 }
 0x2a0   : > { %3568 = vmatprep.subr.bf16.mxu1 %v5037_v44  ;;  %3590 = vmatprep.subr.bf16.mxu0 %v5043_v46 }
 0x2a3   : > { %3569 = vmatpush3.bf16.msra.mxu1 %v5040_v45  ;;  %3591 = vmatpush3.bf16.msra.mxu0 %v5046_v47 }
 0x2a4   : > { %3570 = vmatprep.subr.bf16.mxu1 %v5049_v48  ;;  %3592 = vmatprep.subr.bf16.mxu0 %v5055_v50 }
 0x2a7   : > { %3571 = vmatpush3.bf16.msra.mxu1 %v5052_v49  ;;  %3593 = vmatpush3.bf16.msra.mxu0 %v5058_v51 }
 0x2a8   : > { %3572 = vmatprep.subr.bf16.mxu1 %v5061_v52  ;;  %3594 = vmatprep.subr.bf16.mxu0 %v5067_v54 }
 0x2ab   : > { %3573 = vmatpush3.bf16.msra.mxu1 %v5064_v53  ;;  %3595 = vmatpush3.bf16.msra.mxu0 %v5070_v55 }
 0x2ac   : > { %3574 = vmatprep.subr.bf16.mxu1 %v5073_v56  ;;  %3596 = vmatprep.subr.bf16.mxu0 %v5079_v58  ;;  %v6493_v58 = vld [vmem:[#allocation27_spill] sm:$0xff] }
 0x2af   : > { %3575 = vmatpush3.bf16.msra.mxu1 %v5076_v57  ;;  %3597 = vmatpush3.bf16.msra.mxu0 %v5084_v60  ;;  %v6492_v57 = vld [vmem:[#allocation26_spill] sm:$0xff]  ;;  %v6494_v60 = vld [vmem:[#allocation28_spill] sm:$0xff] }
 0x2b0   : > { %3604 = vmatprep.subr.bf16.mxu1 %v5087_v61  ;;  %3974 = vmatprep.subr.bf16.mxu0 %v6464_v28  ;;  %v6495_v61 = vld [vmem:[#allocation29_spill] sm:$0xff] }
 0x345   : > { %v1280_v33 = vpop.f32.mrb[8].mxu1  ;;  %v1321_v34 = vpop.f32.mrb[12].mxu0 }
 0x346   : > { %v5440_v35 = vadd.f32 %v1280_v33, %v6410_v19  ;;  %v5443_v36 = vadd.f32 %v1321_v34, %v6409_v21  ;;  %v1282_v37 = vpop.f32.mrb[9].mxu1  ;;  %v1323_v38 = vpop.f32.mrb[13].mxu0 }
 0x347   : > { %v5446_v39 = vadd.f32 %v1282_v37, %v6408_v20  ;;  %v5449_v40 = vadd.f32 %v1323_v38, %v6407_v22  ;;  %v1284_v41 = vpop.f32.mrb[10].mxu1  ;;  %v1325_v42 = vpop.f32.mrb[14].mxu0  ;;  %v6502_v37 = vld [vmem:[#allocation36_spill] sm:$0xff]  ;;  %v6503_v38 = vld [vmem:[#allocation38_spill] sm:$0xff] }
 0x348   : > { %6488 = vst [vmem:[#allocation98_spill] sm:$0xff] %v5440_v35  ;;  %6489 = vst [vmem:[#allocation99_spill] sm:$0xff] %v5443_v36  ;;  %v1409_v43 = vmul.f32 0.0625, %v5440_v35  ;;  %v1411_v44 = vmul.f32 0.0625, %v5443_v36  ;;  %v1285_v45 = vpop.f32.mrb[11].mxu1  ;;  %v1326_v46 = vpop.f32.mrb[15].mxu0 }
 0x349   : > { %6490 = vst [vmem:[#allocation100_spill] sm:$0xff] %v5446_v39  ;;  %6491 = vst [vmem:[#allocation101_spill] sm:$0xff] %v5449_v40  ;;  %v1410_v47 = vmul.f32 0.0625, %v5446_v39  ;;  %v1412_v48 = vmul.f32 0.0625, %v5449_v40  ;;  %v6504_v41 = vld [vmem:[#allocation20_spill] sm:$0xff]  ;;  %v5618_v40 = vld [vmem:[#allocation5 + $0x90] sm:$0xff]  }
 0x34a   : > { %v1416_v49 = vadd.f32 %v4787_v3, %v1409_v43  ;;  %v1418_v50 = vadd.f32 %v4779_v5, %v1411_v44  ;;  %v6506_v43 = vld [vmem:[#allocation22_spill] sm:$0xff]  ;;  %6576 = vst [vmem:[#allocation34_spill] sm:$0xff] %v5618_v40 }
 0x34b   : > { %v1417_v51 = vadd.f32 %v4783_v4, %v1410_v47  ;;  %v1419_v52 = vadd.f32 %v4775_v9, %v1412_v48  ;;  %v6508_v47 = vld [vmem:[#allocation37_spill] sm:$0xff]  ;;  %v5621_v39 = vld [vmem:[#allocation5 + $0x58] sm:$0xff]  }
 0x34c   : > { %v1423_v55 = vpack.c.bf16 %v1416_v49, %v1416_v49  ;;  %v1425_v56 = vpack.c.bf16 %v1418_v50, %v1418_v50  ;;  %v6509_v48 = vld [vmem:[#allocation21_spill] sm:$0xff]  ;;  %6577 = vst [vmem:[#allocation36_spill] sm:$0xff] %v5621_v39  ;;  %v5624_v36 = vld [vmem:[#allocation5 + $0xd8] sm:$0xff]  }
 0x34d   : > { %v1424_v53 = vpack.c.bf16 %v1417_v51, %v1417_v51  ;;  %v1426_v54 = vpack.c.bf16 %v1419_v52, %v1419_v52  ;;  %6578 = vst [vmem:[#allocation38_spill] sm:$0xff] %v5624_v36  ;;  %v5627_v35 = vld [vmem:[#allocation5 + $0x18] sm:$0xff]  }
 0x34e   : > { %6579 = vst [vmem:[#allocation37_spill] sm:$0xff] %v5627_v35 }
 0x34f   : > { %1462 = vmatprep.mubr.bf16.mxu1 %v1424_v53  ;;  %1502 = vmatprep.mubr.bf16.mxu0 %v1426_v54 }
 0x350   : > { %1463 = vmatmul.mubr.bf16.vlgmr.msra.gmra.mrb[16].mxu1 %v1423_v55  ;;  %1503 = vmatmul.mubr.bf16.vlgmr.msra.gmra.mrb[20].mxu0 %v1425_v56 }
 0x351   : > { %3605 = vmatpush3.bf16.msra.mxu1 %v5094_v0  ;;  %3975 = vmatpush3.bf16.msra.mxu0 %v5097_v1  ;;  %v6496_v0 = vld [vmem:[#allocation30_spill] sm:$0xff]  ;;  %v6497_v1 = vld [vmem:[#allocation32_spill] sm:$0xff] }
 0x352   : > { %3606 = vmatprep.subr.bf16.mxu1 %v5101_v6  ;;  %3976 = vmatprep.subr.bf16.mxu0 %v6464_v28  ;;  %v6498_v6 = vld [vmem:[#allocation31_spill] sm:$0xff] }
 0x353   : > { %3990 = vmatprep.mubr.msk.bf16.mxu0 %vm4803_vm0, %v6464_v28 }
 0x355   : > { %3607 = vmatpush3.bf16.msra.mxu1 %v5103_v7  ;;  %3977 = vmatpush3.bf16.msra.mxu0 %v5107_v8  ;;  %v6499_v7 = vld [vmem:[#allocation33_spill] sm:$0xff]  ;;  %v6500_v8 = vld [vmem:[#allocation35_spill] sm:$0xff] }
 0x356   : > { %3608 = vmatprep.subr.bf16.mxu1 %v6492_v57  ;;  %3978 = vmatprep.subr.bf16.mxu0 %v6464_v28  ;;  %v6511_v57 = vld [vmem:[#allocation39_spill] sm:$0xff] }
 0x359   : > { %3609 = vmatpush3.bf16.msra.mxu1 %v6493_v58  ;;  %3979 = vmatpush3.bf16.msra.mxu0 %v6494_v60  ;;  %v6512_v58 = vld [vmem:[#allocation40_spill] sm:$0xff]  ;;  %v6513_v60 = vld [vmem:[#allocation25_spill] sm:$0xff] }
 0x35a   : > { %3610 = vmatprep.subr.bf16.mxu1 %v6495_v61  ;;  %3980 = vmatprep.subr.bf16.mxu0 %v6464_v28 }
 0x35d   : > { %3611 = vmatpush3.bf16.msra.mxu1 %v6496_v0  ;;  %3981 = vmatpush3.bf16.msra.mxu0 %v6497_v1  ;;  %v6514_v0 = vld [vmem:[#allocation23_spill] sm:$0xff] }
 0x35e   : > { %3612 = vmatprep.subr.bf16.mxu1 %v6498_v6  ;;  %3982 = vmatprep.subr.bf16.mxu0 %v6464_v28  ;;  %v6515_v6 = vld [vmem:[#allocation41_spill] sm:$0xff] }
 0x361   : > { %3613 = vmatpush3.bf16.msra.mxu1 %v6499_v7  ;;  %3983 = vmatpush3.bf16.msra.mxu0 %v6500_v8  ;;  %v6516_v7 = vld [vmem:[#allocation24_spill] sm:$0xff] }
 0x362   : > { %3614 = vmatprep.subr.bf16.mxu1 %v6501_v29  ;;  %3984 = vmatprep.subr.bf16.mxu0 %v6464_v28  ;;  %v6517_v29 = vld [vmem:[#allocation42_spill] sm:$0xff] }
 0x365   : > { %v1362_v33 = vpop.f32.mrb[12].mxu1  ;;  %v1403_v34 = vpop.f32.mrb[16].mxu0  ;;  %3615 = vmatpush3.bf16.msra.mxu1 %v6502_v37  ;;  %3985 = vmatpush3.bf16.msra.mxu0 %v6503_v38 }
 0x366   : > { %v5484_v42 = vadd.f32 %v1362_v33, %v6504_v41  ;;  %v5487_v44 = vadd.f32 %v1403_v34, %v6506_v43  ;;  %v1364_v45 = vpop.f32.mrb[13].mxu1  ;;  %v3972_v46 = vpop.f32.mrb[17].mxu0  ;;  %3616 = vmatprep.subr.bf16.mxu1 %v6508_v47  ;;  %3986 = vmatprep.subr.bf16.mxu0 %v6464_v28  ;;  %v6518_v33 = vld [vmem:[#allocation43_spill] sm:$0xff]  ;;  %v6521_v47 = vld [vmem:[#allocation54_spill] sm:$0xff] }
 0x367   : > { %v5492_v49 = vadd.f32 %v1364_v45, %v6509_v48  ;;  %v1366_v50 = vpop.f32.mrb[14].mxu1  ;;  %v1406_v51 = vpop.f32.mrb[18].mxu0  ;;  %v6519_v45 = vld [vmem:[#allocation52_spill] sm:$0xff] }
 0x368   : > { %6505 = vst [vmem:[#allocation26_spill] sm:$0xff] %v5484_v42  ;;  %6507 = vst [vmem:[#allocation27_spill] sm:$0xff] %v5487_v44  ;;  %v1413_v52 = vmul.f32 0.0625, %v5484_v42  ;;  %v1415_v53 = vmul.f32 0.0625, %v5487_v44  ;;  %v1367_v54 = vpop.f32.mrb[15].mxu1  ;;  %v3973_v55 = vpop.f32.mrb[19].mxu0 }
 0x369   : > { %6510 = vst [vmem:[#allocation28_spill] sm:$0xff] %v5492_v49  ;;  %v1414_v56 = vmul.f32 0.0625, %v5492_v49  ;;  %3617 = vmatpush3.bf16.msra.mxu1 %v6511_v57  ;;  %3987 = vmatpush3.bf16.msra.mxu0 %v6512_v58  ;;  %v6520_v46 = vld [vmem:[#allocation44_spill] sm:$0xff]  ;;  %v6522_v50 = vld [vmem:[#allocation55_spill] sm:$0xff]  ;;  %v6523_v51 = vld [vmem:[#allocation45_spill] sm:$0xff] }
 0x36a   : > { %v1420_v61 = vadd.f32 %v6513_v60, %v1413_v52  ;;  %v1422_v1 = vadd.f32 %v6514_v0, %v1415_v53  ;;  %3618 = vmatprep.subr.bf16.mxu1 %v6515_v6  ;;  %3988 = vmatprep.subr.bf16.mxu0 %v6464_v28  ;;  %v6524_v52 = vld [vmem:[#allocation56_spill] sm:$0xff]  ;;  %v6525_v53 = vld [vmem:[#allocation57_spill] sm:$0xff]  ;;  %v6526_v54 = vld [vmem:[#allocation46_spill] sm:$0xff] }
 0x36b   : > { %v1421_v8 = vadd.f32 %v6516_v7, %v1414_v56  ;;  %v6527_v55 = vld [vmem:[#allocation58_spill] sm:$0xff]  ;;  %v6528_v56 = vld [vmem:[#allocation59_spill] sm:$0xff]  ;;  %v6530_v58 = vld [vmem:[#allocation60_spill] sm:$0xff] }
 0x36c   : > { %v1427_v37 = vpack.c.bf16 %v1420_v61, %v1420_v61  ;;  %v1429_v38 = vpack.c.bf16 %v1422_v1, %v1422_v1  ;;  %v6529_v57 = vld [vmem:[#allocation47_spill] sm:$0xff]  ;;  %v6531_v61 = vld [vmem:[#allocation61_spill] sm:$0xff]  ;;  %v6532_v1 = vld [vmem:[#allocation48_spill] sm:$0xff] }
 0x36d   : > { %3619 = vmatpush3.bf16.msra.mxu1 %v6517_v29  ;;  %3989 = vmatpush3.bf16.msra.mxu0 %v6518_v33  ;;  %v1428_v34 = vpack.c.bf16 %v1421_v8, %v1421_v8  ;;  %v6533_v6 = vld [vmem:[#allocation49_spill] sm:$0xff]  ;;  %v6534_v8 = vld [vmem:[#allocation50_spill] sm:$0xff]  ;;  %v6535_v29 = vld [vmem:[#allocation51_spill] sm:$0xff] }
 0x36e   : > { %3994 = vmatprep.subr.bf16.mxu1 %v6464_v28  ;;  %1634 = vmatprep.subr.bf16.mxu0 %v6519_v45  ;;  %v6536_v33 = vld [vmem:[#allocation53_spill] sm:$0xff] }
 0x36f   : > { %1542 = vmatprep.mubr.bf16.mxu1 %v1428_v34  ;;  %v5615_v42 = vld [vmem:[#allocation5 + $0x10] sm:$0xff]  }
 0x370   : > { %1543 = vmatmul.mubr.bf16.vlgmr.msra.gmra.mrb[20].mxu1 %v1427_v37  ;;  %3991 = vmatmul.mubr.bf16.vlgmr.msra.gmra.mrb[24].mxu0 %v1429_v38  ;;  %6575 = vst [vmem:[#allocation35_spill] sm:$0xff] %v5615_v42 }
 0x371   : > { %3995 = vmatpush3.bf16.msra.mxu1 %v6520_v46  ;;  %4010 = vmatprep.mubr.msk.bf16.mxu1 %vm4803_vm0, %v6464_v28 }
 0x372   : > { %3996 = vmatprep.subr.bf16.mxu1 %v6464_v28  ;;  %1635 = vmatpush1.bf16.msra.mxu0 %v6521_v47 }
 0x373   : > { %1636 = vmatprep.subr.bf16.mxu0 %v6522_v50  ;;  %1666 = vmatprep.mubr.bf16.mxu0 %v6470_v14 }
 0x375   : > { %3997 = vmatpush3.bf16.msra.mxu1 %v6523_v51 }
 0x376   : > { %3998 = vmatprep.subr.bf16.mxu1 %v6464_v28  ;;  %1637 = vmatpush1.bf16.msra.mxu0 %v6524_v52 }
 0x377   : > { %1638 = vmatprep.subr.bf16.mxu0 %v6525_v53 }
 0x379   : > { %3999 = vmatpush3.bf16.msra.mxu1 %v6526_v54 }
 0x37a   : > { %4000 = vmatprep.subr.bf16.mxu1 %v6464_v28  ;;  %1639 = vmatpush1.bf16.msra.mxu0 %v6527_v55 }
 0x37b   : > { %1640 = vmatprep.subr.bf16.mxu0 %v6528_v56 }
 0x37d   : > { %4001 = vmatpush3.bf16.msra.mxu1 %v6529_v57 }
 0x37e   : > { %4002 = vmatprep.subr.bf16.mxu1 %v6464_v28  ;;  %1641 = vmatpush1.bf16.msra.mxu0 %v6530_v58 }
 0x37f   : > { %1642 = vmatprep.subr.bf16.mxu0 %v6531_v61 }
 0x381   : > { %4003 = vmatpush3.bf16.msra.mxu1 %v6532_v1 }
 0x382   : > { %4004 = vmatprep.subr.bf16.mxu1 %v6464_v28  ;;  %1643 = vmatpush1.bf16.msra.mxu0 %v5267_v18 }
 0x383   : > { %1644 = vmatprep.subr.bf16.mxu0 %v5273_v27 }
 0x385   : > { %4005 = vmatpush3.bf16.msra.mxu1 %v6533_v6 }
 0x386   : > { %4006 = vmatprep.subr.bf16.mxu1 %v6464_v28  ;;  %1645 = vmatpush1.bf16.msra.mxu0 %v5277_v30 }
 0x387   : > { %1646 = vmatprep.subr.bf16.mxu0 %v5285_v63 }
 0x389   : > { %4007 = vmatpush3.bf16.msra.mxu1 %v6534_v8 }
 0x38a   : > { %4008 = vmatprep.subr.bf16.mxu1 %v6464_v28  ;;  %1647 = vmatpush1.bf16.msra.mxu0 %v5289_v59 }
 0x38b   : > { %1648 = vmatprep.subr.bf16.mxu0 %v5297_v10 }
 0x38d   : > { %4009 = vmatpush3.bf16.msra.mxu1 %v6535_v29 }
 0x38e   : > { %1675 = vmatprep.subr.bf16.mxu1 %v6536_v33  ;;  %1649 = vmatpush1.bf16.msra.mxu0 %v5301_v23 }
 0x38f   : > { %1716 = vmatprep.subr.bf16.mxu0 %v5309_v32 }
 0x423   : > { %v3576_v34 = vpop.f32.mrb[16].mxu1  ;;  %v3598_v37 = vpop.f32.mrb[20].mxu0 }
 0x424   : > { %v3577_v38 = vpop.f32.mrb[17].mxu1  ;;  %v3599_v45 = vpop.f32.mrb[21].mxu0 }
 0x425   : > { %v3578_v46 = vadd.f32 %v3577_v38, %v3576_v34  ;;  %v3600_v47 = vadd.f32 %v3599_v45, %v3598_v37  ;;  %v3579_v50 = vpop.f32.mrb[18].mxu1  ;;  %v3601_v51 = vpop.f32.mrb[22].mxu0  ;;  %v6537_v38 = vld [vmem:[#allocation62_spill] sm:$0xff]  ;;  %v6538_v45 = vld [vmem:[#allocation63_spill] sm:$0xff] }
 0x426   : > { %v3580_v52 = vpop.f32.mrb[19].mxu1  ;;  %v3602_v53 = vpop.f32.mrb[23].mxu0  ;;  %v6541_v50 = vld [vmem:[#allocation66_spill] sm:$0xff]  ;;  %v6542_v51 = vld [vmem:[#allocation67_spill] sm:$0xff] }
 0x427   : > { %v1465_v54 = vadd.f32 %v3578_v46, %v4937_v16  ;;  %v6539_v46 = vld [vmem:[#allocation64_spill] sm:$0xff]  ;;  %v6545_v52 = vld [vmem:[#allocation70_spill] sm:$0xff] }
 0x428   : > { %v6547_v53 = vld [vmem:[#allocation72_spill] sm:$0xff] }
 0x429   : > { %v1505_v55 = vadd.f32 %v3600_v47, %v1465_v54  ;;  %v6540_v47 = vld [vmem:[#allocation65_spill] sm:$0xff] }
 0x42a   : > { %v6548_v54 = vld [vmem:[#allocation73_spill] sm:$0xff] }
 0x443   : > { %v3620_v56 = vpop.f32.mrb[20].mxu1  ;;  %v1584_v57 = vpop.f32.mrb[24].mxu0 }
 0x444   : > { %v3621_v58 = vpop.f32.mrb[21].mxu1  ;;  %v3992_v61 = vpop.f32.mrb[25].mxu0 }
 0x445   : > { %v3622_v1 = vadd.f32 %v3621_v58, %v3620_v56  ;;  %v3623_v6 = vpop.f32.mrb[22].mxu1  ;;  %v1587_v8 = vpop.f32.mrb[26].mxu0  ;;  %v6550_v56 = vld [vmem:[#allocation75_spill] sm:$0xff] }
 0x446   : > { %v3624_v29 = vpop.f32.mrb[23].mxu1  ;;  %v3993_v33 = vpop.f32.mrb[27].mxu0 }
 0x447   : > { %v1545_v49 = vadd.f32 %v3622_v1, %v1505_v55  ;;  %v6549_v55 = vld [vmem:[#allocation74_spill] sm:$0xff]  ;;  %v6551_v33 = vld [vmem:[#allocation76_spill] sm:$0xff] }
 0x449   : > { %v1585_v44 = vadd.f32 %v1584_v57, %v1545_v49  ;;  %v6544_v49 = vld [vmem:[#allocation69_spill] sm:$0xff] }
 0x44b   : > { %4401 = vtanh.f32 %v1585_v44  ;;  %v6543_v44 = vld [vmem:[#allocation68_spill] sm:$0xff] }
 0x455   : > { %v4402_v34 = vpop.eup %4401 }
 0x456   : > { %v1591_v37 = vpack.c.bf16 %v4402_v34, %v4402_v34  ;;  %v6552_v34 = vld [vmem:[#allocation77_spill] sm:$0xff] }
 0x458   : > { %4011 = vmatmul.mubr.bf16.vlgmr.msra.gmra.mrb[24].mxu1 %v1591_v37  ;;  %v6553_v37 = vld [vmem:[#allocation78_spill] sm:$0xff] }
 0x459   : > { %1676 = vmatpush1.bf16.msra.mxu1 %v5243_v2  ;;  %1707 = vmatprep.mubr.bf16.mxu1 %v6470_v14  ;;  %v6546_v2 = vld [vmem:[#allocation71_spill] sm:$0xff] }
 0x45a   : > { %1677 = vmatprep.subr.bf16.mxu1 %v6537_v38  ;;  %v6554_v38 = vld [vmem:[#allocation79_spill] sm:$0xff] }
 0x45d   : > { %1678 = vmatpush1.bf16.msra.mxu1 %v6538_v45  ;;  %v6555_v45 = vld [vmem:[#allocation80_spill] sm:$0xff] }
 0x45e   : > { %1679 = vmatprep.subr.bf16.mxu1 %v6539_v46  ;;  %v6556_v46 = vld [vmem:[#allocation81_spill] sm:$0xff] }
 0x461   : > { %1680 = vmatpush1.bf16.msra.mxu1 %v6540_v47  ;;  %v6557_v47 = vld [vmem:[#allocation82_spill] sm:$0xff] }
 0x462   : > { %1681 = vmatprep.subr.bf16.mxu1 %v6541_v50  ;;  %v6558_v50 = vld [vmem:[#allocation83_spill] sm:$0xff] }
 0x465   : > { %1682 = vmatpush1.bf16.msra.mxu1 %v6542_v51  ;;  %v6559_v51 = vld [vmem:[#allocation84_spill] sm:$0xff] }
 0x466   : > { %1683 = vmatprep.subr.bf16.mxu1 %v6543_v44  ;;  %v6560_v44 = vld [vmem:[#allocation85_spill] sm:$0xff] }
 0x469   : > { %1684 = vmatpush1.bf16.msra.mxu1 %v6544_v49  ;;  %v6561_v49 = vld [vmem:[#allocation86_spill] sm:$0xff] }
 0x46a   : > { %1685 = vmatprep.subr.bf16.mxu1 %v6545_v52  ;;  %v6562_v52 = vld [vmem:[#allocation87_spill] sm:$0xff] }
 0x46d   : > { %1686 = vmatpush1.bf16.msra.mxu1 %v6546_v2  ;;  %v6563_v2 = vld [vmem:[#allocation88_spill] sm:$0xff] }
 0x46e   : > { %1687 = vmatprep.subr.bf16.mxu1 %v6547_v53  ;;  %v6564_v53 = vld [vmem:[#allocation89_spill] sm:$0xff] }
 0x471   : > { %1688 = vmatpush1.bf16.msra.mxu1 %v6548_v54  ;;  %v6565_v54 = vld [vmem:[#allocation90_spill] sm:$0xff] }
 0x472   : > { %1689 = vmatprep.subr.bf16.mxu1 %v6549_v55  ;;  %v6566_v55 = vld [vmem:[#allocation91_spill] sm:$0xff] }
 0x475   : > { %1690 = vmatpush1.bf16.msra.mxu1 %v6550_v56  ;;  %v6567_v56 = vld [vmem:[#allocation92_spill] sm:$0xff] }
 0x476   : > { %4014 = vmatprep.subr.bf16.mxu1 %v6464_v28 }
 0x52b   : > { %v1626_v57 = vpop.f32.mrb[24].mxu1 }
 0x52c   : > { %v1627_v58 = vadd.f32 %v4942_v17, %v1626_v57  ;;  %v4012_v61 = vpop.f32.mrb[25].mxu1  ;;  %v6568_v57 = vld [vmem:[#allocation93_spill] sm:$0xff] }
 0x52d   : > { %v1629_v1 = vpop.f32.mrb[26].mxu1  ;;  %v5600_v61 = vld [vmem:[#allocation5 + $0xc8] sm:$0xff]  }
 0x52e   : > { %4403 = vtanh.f32 %v1627_v58  ;;  %v4013_v6 = vpop.f32.mrb[27].mxu1  ;;  %v6569_v58 = vld [vmem:[#allocation94_spill] sm:$0xff]  ;;  %6570 = vst [vmem:[#allocation29_spill] sm:$0xff] %v5600_v61  ;;  %v5603_v1 = vld [vmem:[#allocation5 + $0x8] sm:$0xff]  }
 0x52f   : > { %6571 = vst [vmem:[#allocation30_spill] sm:$0xff] %v5603_v1  ;;  %v5606_v6 = vld [vmem:[#allocation5 + $0x88] sm:$0xff]  }
 0x530   : > { %6572 = vst [vmem:[#allocation32_spill] sm:$0xff] %v5606_v6 }
 0x538   : > { %v4404_v8 = vpop.eup %4403 }
 0x539   : > { %v1633_v29 = vpack.c.bf16 %v4404_v8, %v4404_v8  ;;  %v5609_v8 = vld [vmem:[#allocation5 + $0x50] sm:$0xff]  }
 0x53a   : > { %6573 = vst [vmem:[#allocation31_spill] sm:$0xff] %v5609_v8 }
 0x53b   : > { %1667 = vmatmul.mubr.bf16.vlgmr.msra.gmra.mrb[28].mxu0 %v1633_v29  ;;  %1708 = vmatmul.mubr.bf16.vlgmr.msra.gmra.mrb[28].mxu1 %v1633_v29 }
 0x53c   : > { %1717 = vmatpush1.bf16.msra.mxu0 %v5316_v31  ;;  %4015 = vmatpush3.bf16.msra.mxu1 %v6551_v33 }
 0x53d   : > { %1718 = vmatprep.subr.bf16.mxu0 %v6552_v34  ;;  %4016 = vmatprep.subr.bf16.mxu1 %v6464_v28 }
 0x53e   : > { %1748 = vmatprep.mubr.bf16.mxu0 %v6470_v14  ;;  %4030 = vmatprep.mubr.msk.bf16.mxu1 %vm4803_vm0, %v6464_v28 }
 0x540   : > { %1719 = vmatpush1.bf16.msra.mxu0 %v6553_v37  ;;  %4017 = vmatpush3.bf16.msra.mxu1 %v6554_v38 }
 0x541   : > { %1720 = vmatprep.subr.bf16.mxu0 %v6555_v45  ;;  %4018 = vmatprep.subr.bf16.mxu1 %v6464_v28 }
 0x544   : > { %1721 = vmatpush1.bf16.msra.mxu0 %v6556_v46  ;;  %4019 = vmatpush3.bf16.msra.mxu1 %v6557_v47 }
 0x545   : > { %1722 = vmatprep.subr.bf16.mxu0 %v6558_v50  ;;  %4020 = vmatprep.subr.bf16.mxu1 %v6464_v28 }
 0x548   : > { %1723 = vmatpush1.bf16.msra.mxu0 %v6559_v51  ;;  %4021 = vmatpush3.bf16.msra.mxu1 %v6560_v44 }
 0x549   : > { %1724 = vmatprep.subr.bf16.mxu0 %v6561_v49  ;;  %4022 = vmatprep.subr.bf16.mxu1 %v6464_v28 }
 0x54c   : > { %1725 = vmatpush1.bf16.msra.mxu0 %v6562_v52  ;;  %4023 = vmatpush3.bf16.msra.mxu1 %v6563_v2 }
 0x54d   : > { %1726 = vmatprep.subr.bf16.mxu0 %v6564_v53  ;;  %4024 = vmatprep.subr.bf16.mxu1 %v6464_v28 }
 0x550   : > { %1727 = vmatpush1.bf16.msra.mxu0 %v5367_v25  ;;  %4025 = vmatpush3.bf16.msra.mxu1 %v6565_v54 }
 0x551   : > { %1728 = vmatprep.subr.bf16.mxu0 %v6566_v55  ;;  %4026 = vmatprep.subr.bf16.mxu1 %v6464_v28 }
 0x554   : > { %1729 = vmatpush1.bf16.msra.mxu0 %v5377_v13  ;;  %4027 = vmatpush3.bf16.msra.mxu1 %v6567_v56 }
 0x555   : > { %1730 = vmatprep.subr.bf16.mxu0 %v6568_v57  ;;  %4028 = vmatprep.subr.bf16.mxu1 %v6464_v28 }
 0x558   : > { %1731 = vmatpush1.bf16.msra.mxu0 %v6569_v58  ;;  %4029 = vmatpush3.bf16.msra.mxu1 %v5389_v24 }
 0x559   : > { %3653 = vmatprep.subr.bf16.mxu0 %v5395_v11  ;;  %3675 = vmatprep.subr.bf16.mxu1 %v5398_v12 }
 0x55b   : > { %1749 = vmatmul.mubr.bf16.vlgmr.msra.gmra.mrb[32].mxu0 %v1633_v29  ;;  %4031 = vmatmul.mubr.bf16.vlgmr.msra.gmra.mrb[32].mxu1 %v1633_v29  ;;  %v5612_v29 = vld [vmem:[#allocation5 + $0xd0] sm:$0xff]  }
 0x55c   : > { %3654 = vmatpush3.bf16.msra.mxu0 %v5401_v62  ;;  %3676 = vmatpush3.bf16.msra.mxu1 %v5404_v15  ;;  %6574 = vst [vmem:[#allocation33_spill] sm:$0xff] %v5612_v29 }
 0x55d   : > { %3655 = vmatprep.subr.bf16.mxu0 %v5407_v26  ;;  %3677 = vmatprep.subr.bf16.mxu1 %v5600_v61 }
 0x560   : > { %3656 = vmatpush3.bf16.msra.mxu0 %v5603_v1  ;;  %3678 = vmatpush3.bf16.msra.mxu1 %v5606_v6 }
 0x561   : > { %3657 = vmatprep.subr.bf16.mxu0 %v5609_v8  ;;  %3679 = vmatprep.subr.bf16.mxu1 %v5612_v29  ;;  %v5630_v29 = vld [vmem:[#allocation5 + $0x98] sm:$0xff]  }
 0x562   : > { %6580 = vst [vmem:[#allocation39_spill] sm:$0xff] %v5630_v29 }
 0x564   : > { %3658 = vmatpush3.bf16.msra.mxu0 %v5615_v42  ;;  %3680 = vmatpush3.bf16.msra.mxu1 %v5618_v40  ;;  %v5633_v42 = vld [vmem:[#allocation5 + $0x60] sm:$0xff]  }
 0x565   : > { %3659 = vmatprep.subr.bf16.mxu0 %v5621_v39  ;;  %3681 = vmatprep.subr.bf16.mxu1 %v5624_v36  ;;  %6581 = vst [vmem:[#allocation40_spill] sm:$0xff] %v5633_v42  ;;  %v5636_v40 = vld [vmem:[#allocation5 + $0xe0] sm:$0xff]  }
 0x566   : > { %6582 = vst [vmem:[#allocation41_spill] sm:$0xff] %v5636_v40  ;;  %v5639_v39 = vld [vmem:[#allocation5 + $0x20] sm:$0xff]  }
 0x567   : > { %6583 = vst [vmem:[#allocation42_spill] sm:$0xff] %v5639_v39  ;;  %v5642_v36 = vld [vmem:[#allocation5 + $0xa0] sm:$0xff]  }
 0x568   : > { %3660 = vmatpush3.bf16.msra.mxu0 %v5627_v35  ;;  %3682 = vmatpush3.bf16.msra.mxu1 %v5630_v29  ;;  %6584 = vst [vmem:[#allocation43_spill] sm:$0xff] %v5642_v36  ;;  %v5645_v35 = vld [vmem:[#allocation5 + $0x68] sm:$0xff]  }
 0x569   : > { %3661 = vmatprep.subr.bf16.mxu0 %v5633_v42  ;;  %3683 = vmatprep.subr.bf16.mxu1 %v5636_v40  ;;  %6585 = vst [vmem:[#allocation52_spill] sm:$0xff] %v5645_v35  ;;  %v5648_v29 = vld [vmem:[#allocation5 + $0xe8] sm:$0xff]  }
 0x56a   : > { %6586 = vst [vmem:[#allocation44_spill] sm:$0xff] %v5648_v29  ;;  %v5651_v42 = vld [vmem:[#allocation5 + $0x28] sm:$0xff]  }
 0x56b   : > { %6587 = vst [vmem:[#allocation54_spill] sm:$0xff] %v5651_v42  ;;  %v5654_v40 = vld [vmem:[#allocation5 + $0xa8] sm:$0xff]  }
 0x56c   : > { %3662 = vmatpush3.bf16.msra.mxu0 %v5639_v39  ;;  %3684 = vmatpush3.bf16.msra.mxu1 %v5642_v36  ;;  %6588 = vst [vmem:[#allocation55_spill] sm:$0xff] %v5654_v40  ;;  %v5657_v39 = vld [vmem:[#allocation5 + $0x70] sm:$0xff]  }
 0x56d   : > { %3663 = vmatprep.subr.bf16.mxu0 %v5645_v35  ;;  %3685 = vmatprep.subr.bf16.mxu1 %v5648_v29  ;;  %6589 = vst [vmem:[#allocation45_spill] sm:$0xff] %v5657_v39  ;;  %v5660_v36 = vld [vmem:[#allocation5 + $0xf0] sm:$0xff]  }
 0x56e   : > { %6590 = vst [vmem:[#allocation56_spill] sm:$0xff] %v5660_v36  ;;  %v5663_v35 = vld [vmem:[#allocation5 + $0x30] sm:$0xff]  }
 0x56f   : > { %6591 = vst [vmem:[#allocation57_spill] sm:$0xff] %v5663_v35  ;;  %v5666_v29 = vld [vmem:[#allocation5 + $0xb0] sm:$0xff]  }
 0x570   : > { %3664 = vmatpush3.bf16.msra.mxu0 %v5651_v42  ;;  %3686 = vmatpush3.bf16.msra.mxu1 %v5654_v40  ;;  %6592 = vst [vmem:[#allocation46_spill] sm:$0xff] %v5666_v29  ;;  %v5669_v42 = vld [vmem:[#allocation5 + $0x78] sm:$0xff]  }
 0x571   : > { %3665 = vmatprep.subr.bf16.mxu0 %v5657_v39  ;;  %3687 = vmatprep.subr.bf16.mxu1 %v5660_v36  ;;  %6593 = vst [vmem:[#allocation58_spill] sm:$0xff] %v5669_v42  ;;  %v5672_v40 = vld [vmem:[#allocation5 + $0xf8] sm:$0xff]  }
 0x572   : > { %6594 = vst [vmem:[#allocation59_spill] sm:$0xff] %v5672_v40  ;;  %v5675_v39 = vld [vmem:[#allocation5 + $0x38] sm:$0xff]  }
 0x573   : > { %6595 = vst [vmem:[#allocation47_spill] sm:$0xff] %v5675_v39  ;;  %v5678_v36 = vld [vmem:[#allocation5 + $0xb8] sm:$0xff]  }
 0x574   : > { %3666 = vmatpush3.bf16.msra.mxu0 %v5663_v35  ;;  %3688 = vmatpush3.bf16.msra.mxu1 %v5666_v29  ;;  %6596 = vst [vmem:[#allocation60_spill] sm:$0xff] %v5678_v36  ;;  %v5681_v35 = vld [vmem:[#allocation5 + $0x140] sm:$0xff]  }
 0x575   : > { %3667 = vmatprep.subr.bf16.mxu0 %v5669_v42  ;;  %3689 = vmatprep.subr.bf16.mxu1 %v5672_v40  ;;  %6597 = vst [vmem:[#allocation61_spill] sm:$0xff] %v5681_v35 }
 0x578   : > { %3668 = vmatpush3.bf16.msra.mxu0 %v5675_v39  ;;  %3690 = vmatpush3.bf16.msra.mxu1 %v5678_v36 }
 0x579   : > { %3697 = vmatprep.subr.bf16.mxu0 %v5681_v35  ;;  %4034 = vmatprep.subr.bf16.mxu1 %v6464_v28 }
 0x60e   : > { %v1668_v29 = vpop.f32.mrb[28].mxu0  ;;  %v1709_v42 = vpop.f32.mrb[28].mxu1 }
 0x60f   : > { %v5686_v8 = vadd.f32 %v1668_v29, %v6410_v19  ;;  %v5689_v40 = vadd.f32 %v1709_v42, %v6409_v21  ;;  %v1670_v6 = vpop.f32.mrb[29].mxu0  ;;  %v1711_v39 = vpop.f32.mrb[29].mxu1 }
 0x610   : > { %v5692_v1 = vadd.f32 %v1670_v6, %v6408_v20  ;;  %v5695_v36 = vadd.f32 %v1711_v39, %v6407_v22  ;;  %v1672_v61 = vpop.f32.mrb[30].mxu0  ;;  %v1713_v35 = vpop.f32.mrb[30].mxu1 }
 0x611   : > { %6598 = vst [vmem:[#allocation48_spill] sm:$0xff] %v5686_v8  ;;  %v1797_v26 = vmul.f32 0.0625, %v5686_v8  ;;  %v1799_v15 = vmul.f32 0.0625, %v5689_v40  ;;  %v1673_v62 = vpop.f32.mrb[31].mxu0  ;;  %v1714_v29 = vpop.f32.mrb[31].mxu1 }
 0x612   : > { %v1798_v19 = vmul.f32 0.0625, %v5692_v1  ;;  %v1800_v42 = vmul.f32 0.0625, %v5695_v36  ;;  %v5705_v62 = vld [vmem:[#allocation5 + $0x100] sm:$0xff]  }
 0x613   : > { %v1804_v21 = vadd.f32 %v4787_v3, %v1797_v26  ;;  %v1806_v6 = vadd.f32 %v4779_v5, %v1799_v15  ;;  %v5708_v29 = vld [vmem:[#allocation5 + $0x180] sm:$0xff]   ;;  %v5711_v15 = vld [vmem:[#allocation5 + $0x148] sm:$0xff]   ;;  %v5730_v26 = vld [vmem:[#allocation5 + $0x190] sm:$0xff]  }
 0x614   : > { %v1805_v20 = vadd.f32 %v4783_v4, %v1798_v19  ;;  %v1807_v39 = vadd.f32 %v4775_v9, %v1800_v42  ;;  %v5717_v19 = vld [vmem:[#allocation5 + $0x108] sm:$0xff]   ;;  %6603 = vst [vmem:[#allocation62_spill] sm:$0xff] %v5730_v26  ;;  %v5737_v42 = vld [vmem:[#allocation5 + $0x118] sm:$0xff]  }
 0x615   : > { %v1811_v22 = vpack.c.bf16 %v1804_v21, %v1804_v21  ;;  %v1813_v8 = vpack.c.bf16 %v1806_v6, %v1806_v6  ;;  %6599 = vst [vmem:[#allocation49_spill] sm:$0xff] %v5717_v19  ;;  %v5723_v21 = vld [vmem:[#allocation5 + $0x150] sm:$0xff]   ;;  %6605 = vst [vmem:[#allocation64_spill] sm:$0xff] %v5737_v42  ;;  %v5740_v6 = vld [vmem:[#allocation5 + $0x198] sm:$0xff]  }
 0x616   : > { %v1812_v61 = vpack.c.bf16 %v1805_v20, %v1805_v20  ;;  %v1814_v35 = vpack.c.bf16 %v1807_v39, %v1807_v39  ;;  %v5720_v20 = vld [vmem:[#allocation5 + $0x188] sm:$0xff]   ;;  %6601 = vst [vmem:[#allocation51_spill] sm:$0xff] %v5723_v21  ;;  %6606 = vst [vmem:[#allocation65_spill] sm:$0xff] %v5740_v6  ;;  %v5743_v39 = vld [vmem:[#allocation5 + $0x160] sm:$0xff]  }
 0x617   : > { %6600 = vst [vmem:[#allocation50_spill] sm:$0xff] %v5720_v20  ;;  %6607 = vst [vmem:[#allocation66_spill] sm:$0xff] %v5743_v39 }
 0x618   : > { %1850 = vmatprep.mubr.bf16.mxu0 %v1812_v61  ;;  %1890 = vmatprep.mubr.bf16.mxu1 %v1814_v35  ;;  %v5747_v61 = vld [vmem:[#allocation5 + $0x120] sm:$0xff]  }
 0x619   : > { %1851 = vmatmul.mubr.bf16.vlgmr.msra.gmra.mrb[36].mxu0 %v1811_v22  ;;  %1891 = vmatmul.mubr.bf16.vlgmr.msra.gmra.mrb[36].mxu1 %v1813_v8  ;;  %v5727_v22 = vld [vmem:[#allocation5 + $0x110] sm:$0xff]   ;;  %v5733_v8 = vld [vmem:[#allocation5 + $0x158] sm:$0xff]   ;;  %6608 = vst [vmem:[#allocation67_spill] sm:$0xff] %v5747_v61  ;;  %v5750_v35 = vld [vmem:[#allocation5 + $0x1a0] sm:$0xff]  }
 0x61a   : > { %3698 = vmatpush3.bf16.msra.mxu0 %v5705_v62  ;;  %4035 = vmatpush3.bf16.msra.mxu1 %v5708_v29  ;;  %6602 = vst [vmem:[#allocation53_spill] sm:$0xff] %v5727_v22  ;;  %6604 = vst [vmem:[#allocation63_spill] sm:$0xff] %v5733_v8 }
 0x61b   : > { %3699 = vmatprep.subr.bf16.mxu0 %v5711_v15  ;;  %4036 = vmatprep.subr.bf16.mxu1 %v6464_v28  ;;  %6609 = vst [vmem:[#allocation68_spill] sm:$0xff] %v5750_v35 }
 0x61c   : > { %4050 = vmatprep.mubr.msk.bf16.mxu1 %vm4803_vm0, %v6464_v28 }
 0x61e   : > { %3700 = vmatpush3.bf16.msra.mxu0 %v5717_v19  ;;  %4037 = vmatpush3.bf16.msra.mxu1 %v5720_v20 }
 0x61f   : > { %3701 = vmatprep.subr.bf16.mxu0 %v5723_v21  ;;  %4038 = vmatprep.subr.bf16.mxu1 %v6464_v28  ;;  %v5769_v21 = vld [vmem:[#allocation5 + $0x170] sm:$0xff]  }
 0x620   : > { %6613 = vst [vmem:[#allocation72_spill] sm:$0xff] %v5769_v21 }
 0x622   : > { %3702 = vmatpush3.bf16.msra.mxu0 %v5727_v22  ;;  %4039 = vmatpush3.bf16.msra.mxu1 %v5730_v26  ;;  %v5757_v26 = vld [vmem:[#allocation5 + $0x128] sm:$0xff]  }
 0x623   : > { %3703 = vmatprep.subr.bf16.mxu0 %v5733_v8  ;;  %4040 = vmatprep.subr.bf16.mxu1 %v6464_v28  ;;  %v5753_v8 = vld [vmem:[#allocation5 + $0x168] sm:$0xff]   ;;  %6611 = vst [vmem:[#allocation70_spill] sm:$0xff] %v5757_v26 }
 0x624   : > { %6610 = vst [vmem:[#allocation69_spill] sm:$0xff] %v5753_v8 }
 0x626   : > { %3704 = vmatpush3.bf16.msra.mxu0 %v5737_v42  ;;  %4041 = vmatpush3.bf16.msra.mxu1 %v5740_v6 }
 0x627   : > { %3705 = vmatprep.subr.bf16.mxu0 %v5743_v39  ;;  %4042 = vmatprep.subr.bf16.mxu1 %v6464_v28  ;;  %v5760_v39 = vld [vmem:[#allocation5 + $0x1a8] sm:$0xff]  }
 0x628   : > { %6612 = vst [vmem:[#allocation71_spill] sm:$0xff] %v5760_v39 }
 0x62a   : > { %3706 = vmatpush3.bf16.msra.mxu0 %v5747_v61  ;;  %4043 = vmatpush3.bf16.msra.mxu1 %v5750_v35 }
 0x62b   : > { %3707 = vmatprep.subr.bf16.mxu0 %v5753_v8  ;;  %4044 = vmatprep.subr.bf16.mxu1 %v6464_v28 }
 0x62e   : > { %v1750_v6 = vpop.f32.mrb[32].mxu0  ;;  %v1791_v42 = vpop.f32.mrb[32].mxu1  ;;  %3708 = vmatpush3.bf16.msra.mxu0 %v5757_v26  ;;  %4045 = vmatpush3.bf16.msra.mxu1 %v5760_v39 }
 0x62f   : > { %v5764_v61 = vadd.f32 %v1750_v6, %v6504_v41  ;;  %v5767_v35 = vadd.f32 %v1791_v42, %v6506_v43  ;;  %v1752_v22 = vpop.f32.mrb[33].mxu0  ;;  %v4032_v8 = vpop.f32.mrb[33].mxu1  ;;  %3709 = vmatprep.subr.bf16.mxu0 %v5769_v21  ;;  %4046 = vmatprep.subr.bf16.mxu1 %v6464_v28  ;;  %v5782_v21 = vld [vmem:[#allocation5 + $0x1b0] sm:$0xff]  }
 0x630   : > { %v5774_v26 = vadd.f32 %v1752_v22, %v6509_v48  ;;  %v1754_v20 = vpop.f32.mrb[34].mxu0  ;;  %v1794_v19 = vpop.f32.mrb[34].mxu1  ;;  %v5779_v8 = vld [vmem:[#allocation5 + $0x130] sm:$0xff]   ;;  %6616 = vst [vmem:[#allocation75_spill] sm:$0xff] %v5782_v21 }
 0x631   : > { %v1801_v39 = vmul.f32 0.0625, %v5764_v61  ;;  %v1803_v6 = vmul.f32 0.0625, %v5767_v35  ;;  %v1755_v41 = vpop.f32.mrb[35].mxu0  ;;  %v4033_v42 = vpop.f32.mrb[35].mxu1  ;;  %6615 = vst [vmem:[#allocation74_spill] sm:$0xff] %v5779_v8  ;;  %v5787_v20 = vld [vmem:[#allocation5 + $0x178] sm:$0xff]  }
 0x632   : > { %6614 = vst [vmem:[#allocation73_spill] sm:$0xff] %v5774_v26  ;;  %v1802_v43 = vmul.f32 0.0625, %v5774_v26  ;;  %3710 = vmatpush3.bf16.msra.mxu0 %v5779_v8  ;;  %4047 = vmatpush3.bf16.msra.mxu1 %v5782_v21  ;;  %6617 = vst [vmem:[#allocation76_spill] sm:$0xff] %v5787_v20  ;;  %v5792_v42 = vld [vmem:[#allocation5 + $0x138] sm:$0xff]  }
 0x633   : > { %v1808_v22 = vadd.f32 %v6513_v60, %v1801_v39  ;;  %v1810_v19 = vadd.f32 %v6514_v0, %v1803_v6  ;;  %3711 = vmatprep.subr.bf16.mxu0 %v5787_v20  ;;  %4048 = vmatprep.subr.bf16.mxu1 %v6464_v28  ;;  %6618 = vst [vmem:[#allocation77_spill] sm:$0xff] %v5792_v42  ;;  %v5795_v8 = vld [vmem:[#allocation5 + $0x1b8] sm:$0xff]   ;;  %v5799_v6 = vld [vmem:[#allocation8 + $0x4] ss:$28 sps:$4 sm:$0xff]  }
 0x634   : > { %v1809_v41 = vadd.f32 %v6516_v7, %v1802_v43  ;;  %6619 = vst [vmem:[#allocation78_spill] sm:$0xff] %v5795_v8  ;;  %6620 = vst [vmem:[#allocation79_spill] sm:$0xff] %v5799_v6  ;;  %v5802_v43 = vld [vmem:[#allocation7] sm:$0xff]  }
 0x635   : > { %v1815_v39 = vpack.c.bf16 %v1808_v22, %v1808_v22  ;;  %v1817_v60 = vpack.c.bf16 %v1810_v19, %v1810_v19  ;;  %6621 = vst [vmem:[#allocation80_spill] sm:$0xff] %v5802_v43  ;;  %v5808_v22 = vld [vmem:[#allocation8] ss:$28 sps:$4 sm:$0xff]  }
 0x636   : > { %3712 = vmatpush3.bf16.msra.mxu0 %v5792_v42  ;;  %4049 = vmatpush3.bf16.msra.mxu1 %v5795_v8  ;;  %v1816_v21 = vpack.c.bf16 %v1809_v41, %v1809_v41  ;;  %6622 = vst [vmem:[#allocation81_spill] sm:$0xff] %v5808_v22  ;;  %v5811_v19 = vld [vmem:[#allocation8 + $0x3c] ss:$28 sps:$4 sm:$0xff]   ;;  %v5822_v41 = vld [vmem:[#allocation8 + $0x74] ss:$28 sps:$4 sm:$0xff]  }
 0x637   : > { %4054 = vmatprep.subr.bf16.mxu0 %v6464_v28  ;;  %2022 = vmatprep.subr.bf16.mxu1 %v5799_v6  ;;  %6623 = vst [vmem:[#allocation82_spill] sm:$0xff] %v5811_v19  ;;  %6626 = vst [vmem:[#allocation85_spill] sm:$0xff] %v5822_v41 }
 0x638   : > { %1930 = vmatprep.mubr.bf16.mxu0 %v1816_v21  ;;  %v5819_v21 = vld [vmem:[#allocation8 + $0x38] ss:$28 sps:$4 sm:$0xff]  }
 0x639   : > { %1931 = vmatmul.mubr.bf16.vlgmr.msra.gmra.mrb[40].mxu0 %v1815_v39  ;;  %4051 = vmatmul.mubr.bf16.vlgmr.msra.gmra.mrb[40].mxu1 %v1817_v60  ;;  %v5815_v60 = vld [vmem:[#allocation7 + $0x8] sm:$0xff]   ;;  %6625 = vst [vmem:[#allocation84_spill] sm:$0xff] %v5819_v21  ;;  %v5825_v39 = vld [vmem:[#allocation7 + $0x10] sm:$0xff]  }
 0x63a   : > { %4055 = vmatpush3.bf16.msra.mxu0 %v5802_v43  ;;  %4070 = vmatprep.mubr.msk.bf16.mxu0 %vm4803_vm0, %v6464_v28  ;;  %6624 = vst [vmem:[#allocation83_spill] sm:$0xff] %v5815_v60  ;;  %6627 = vst [vmem:[#allocation86_spill] sm:$0xff] %v5825_v39 }
 0x63b   : > { %4056 = vmatprep.subr.bf16.mxu0 %v6464_v28  ;;  %2023 = vmatpush1.bf16.msra.mxu1 %v5808_v22  ;;  %v5835_v22 = vld [vmem:[#allocation7 + $0x18] sm:$0xff]  }
 0x63c   : > { %2024 = vmatprep.subr.bf16.mxu1 %v5811_v19  ;;  %2054 = vmatprep.mubr.bf16.mxu1 %v6470_v14  ;;  %v5829_v19 = vld [vmem:[#allocation8 + $0x70] ss:$28 sps:$4 sm:$0xff]   ;;  %6630 = vst [vmem:[#allocation89_spill] sm:$0xff] %v5835_v22 }
 0x63d   : > { %6628 = vst [vmem:[#allocation87_spill] sm:$0xff] %v5829_v19 }
 0x63e   : > { %4057 = vmatpush3.bf16.msra.mxu0 %v5815_v60  ;;  %v5832_v60 = vld [vmem:[#allocation8 + $0xac] ss:$28 sps:$4 sm:$0xff]  }
 0x63f   : > { %4058 = vmatprep.subr.bf16.mxu0 %v6464_v28  ;;  %2025 = vmatpush1.bf16.msra.mxu1 %v5819_v21  ;;  %6629 = vst [vmem:[#allocation88_spill] sm:$0xff] %v5832_v60  ;;  %v5845_v21 = vld [vmem:[#allocation7 + $0x20] sm:$0xff]  }
 0x640   : > { %2026 = vmatprep.subr.bf16.mxu1 %v5822_v41  ;;  %v5839_v41 = vld [vmem:[#allocation8 + $0xa8] ss:$28 sps:$4 sm:$0xff]   ;;  %6633 = vst [vmem:[#allocation92_spill] sm:$0xff] %v5845_v21 }
 0x641   : > { %6631 = vst [vmem:[#allocation90_spill] sm:$0xff] %v5839_v41 }
 0x642   : > { %4059 = vmatpush3.bf16.msra.mxu0 %v5825_v39  ;;  %v5842_v39 = vld [vmem:[#allocation8 + $0xe4] ss:$28 sps:$4 sm:$0xff]  }
 0x643   : > { %4060 = vmatprep.subr.bf16.mxu0 %v6464_v28  ;;  %2027 = vmatpush1.bf16.msra.mxu1 %v5829_v19  ;;  %6632 = vst [vmem:[#allocation91_spill] sm:$0xff] %v5842_v39 }
 0x644   : > { %2028 = vmatprep.subr.bf16.mxu1 %v5832_v60 }
 0x646   : > { %4061 = vmatpush3.bf16.msra.mxu0 %v5835_v22  ;;  %v5851_v22 = vld [vmem:[#allocation7 + $0x28] sm:$0xff]  }
 0x647   : > { %4062 = vmatprep.subr.bf16.mxu0 %v6464_v28  ;;  %2029 = vmatpush1.bf16.msra.mxu1 %v5839_v41  ;;  %6634 = vst [vmem:[#allocation93_spill] sm:$0xff] %v5851_v22 }
 0x648   : > { %2030 = vmatprep.subr.bf16.mxu1 %v5842_v39  ;;  %v5857_v39 = vld [vmem:[#allocation7 + $0x30] sm:$0xff]  }
 0x649   : > { %6635 = vst [vmem:[#allocation94_spill] sm:$0xff] %v5857_v39 }
 0x64a   : > { %4063 = vmatpush3.bf16.msra.mxu0 %v5845_v21 }
 0x64b   : > { %4064 = vmatprep.subr.bf16.mxu0 %v6464_v28  ;;  %2031 = vmatpush1.bf16.msra.mxu1 %v5267_v18  ;;  %v5863_v18 = vld [vmem:[#allocation7 + $0x38] sm:$0xff]  }
 0x64c   : > { %2032 = vmatprep.subr.bf16.mxu1 %v5273_v27  ;;  %6636 = vst [vmem:[#allocation102_spill] sm:$0xff] %v5863_v18  ;;  %v5866_v27 = vld [vmem:[#allocation8 + $0xc] ss:$28 sps:$4 sm:$0xff]  }
 0x64d   : > { %6637 = vst [vmem:[#allocation103_spill] sm:$0xff] %v5866_v27 }
 0x64e   : > { %4065 = vmatpush3.bf16.msra.mxu0 %v5851_v22 }
 0x64f   : > { %4066 = vmatprep.subr.bf16.mxu0 %v6464_v28  ;;  %2033 = vmatpush1.bf16.msra.mxu1 %v5277_v30 }
 0x650   : > { %2034 = vmatprep.subr.bf16.mxu1 %v5285_v63 }
 0x652   : > { %4067 = vmatpush3.bf16.msra.mxu0 %v5857_v39 }
 0x653   : > { %4068 = vmatprep.subr.bf16.mxu0 %v6464_v28  ;;  %2035 = vmatpush1.bf16.msra.mxu1 %v5289_v59 }
 0x654   : > { %2036 = vmatprep.subr.bf16.mxu1 %v5297_v10 }
 0x656   : > { %4069 = vmatpush3.bf16.msra.mxu0 %v5863_v18 }
 0x657   : > { %2063 = vmatprep.subr.bf16.mxu0 %v5866_v27  ;;  %2037 = vmatpush1.bf16.msra.mxu1 %v5301_v23 }
 0x658   : > { %2104 = vmatprep.subr.bf16.mxu1 %v5309_v32 }
 0x6ec   : > { %v3669_v30 = vpop.f32.mrb[36].mxu0  ;;  %v3691_v63 = vpop.f32.mrb[36].mxu1 }
 0x6ed   : > { %v3670_v39 = vpop.f32.mrb[37].mxu0  ;;  %v3692_v22 = vpop.f32.mrb[37].mxu1 }
 0x6ee   : > { %v3671_v21 = vadd.f32 %v3670_v39, %v3669_v30  ;;  %v3693_v59 = vadd.f32 %v3692_v22, %v3691_v63  ;;  %v3672_v41 = vpop.f32.mrb[38].mxu0  ;;  %v3694_v10 = vpop.f32.mrb[38].mxu1  ;;  %v5909_v39 = vld [vmem:[#allocation8 + $0x158] ss:$28 sps:$4 sm:$0xff]  }
 0x6ef   : > { %v3673_v60 = vpop.f32.mrb[39].mxu0  ;;  %v3695_v19 = vpop.f32.mrb[39].mxu1 }
 0x6f0   : > { %v1853_v18 = vadd.f32 %v3671_v21, %v4937_v16  ;;  %v5872_v60 = vld [vmem:[#allocation8 + $0x8] ss:$28 sps:$4 sm:$0xff]   ;;  %v5906_v21 = vld [vmem:[#allocation8 + $0x15c] ss:$28 sps:$4 sm:$0xff]  }
 0x6f1   : > { %v5876_v19 = vld [vmem:[#allocation8 + $0x44] ss:$28 sps:$4 sm:$0xff]  }
 0x6f2   : > { %v1893_v43 = vadd.f32 %v3693_v59, %v1853_v18  ;;  %v5912_v18 = vld [vmem:[#allocation8 + $0x194] ss:$28 sps:$4 sm:$0xff]  }
 0x70c   : > { %v3713_v6 = vpop.f32.mrb[40].mxu0  ;;  %v1972_v8 = vpop.f32.mrb[40].mxu1 }
 0x70d   : > { %v3714_v27 = vpop.f32.mrb[41].mxu0  ;;  %v4052_v42 = vpop.f32.mrb[41].mxu1 }
 0x70e   : > { %v3715_v23 = vadd.f32 %v3714_v27, %v3713_v6  ;;  %v3716_v7 = vpop.f32.mrb[42].mxu0  ;;  %v1975_v32 = vpop.f32.mrb[42].mxu1  ;;  %v5897_v42 = vld [vmem:[#allocation8 + $0xe8] ss:$28 sps:$4 sm:$0xff]   ;;  %v5915_v27 = vld [vmem:[#allocation8 + $0x190] ss:$28 sps:$4 sm:$0xff]  }
 0x70f   : > { %v3717_v20 = vpop.f32.mrb[43].mxu0  ;;  %v4053_v0 = vpop.f32.mrb[43].mxu1  ;;  %v5879_v7 = vld [vmem:[#allocation8 + $0x40] ss:$28 sps:$4 sm:$0xff]  }
 0x710   : > { %v1933_v48 = vadd.f32 %v3715_v23, %v1893_v43  ;;  %v5882_v0 = vld [vmem:[#allocation8 + $0x7c] ss:$28 sps:$4 sm:$0xff]   ;;  %v5894_v20 = vld [vmem:[#allocation8 + $0xec] ss:$28 sps:$4 sm:$0xff]   ;;  %v5900_v6 = vld [vmem:[#allocation8 + $0x124] ss:$28 sps:$4 sm:$0xff]  }
 0x711   : > { %v5903_v43 = vld [vmem:[#allocation8 + $0x120] ss:$28 sps:$4 sm:$0xff]  }
 0x712   : > { %v1973_v26 = vadd.f32 %v1972_v8, %v1933_v48  ;;  %v5885_v48 = vld [vmem:[#allocation8 + $0x78] ss:$28 sps:$4 sm:$0xff]   ;;  %v5891_v8 = vld [vmem:[#allocation8 + $0xb0] ss:$28 sps:$4 sm:$0xff]  }
 0x714   : > { %4405 = vtanh.f32 %v1973_v26  ;;  %v5888_v26 = vld [vmem:[#allocation8 + $0xb4] ss:$28 sps:$4 sm:$0xff]  }
 0x71e   : > { %v4406_v22 = vpop.eup %4405 }
 0x71f   : > { %v1979_v41 = vpack.c.bf16 %v4406_v22, %v4406_v22 }
 0x721   : > { %4071 = vmatmul.mubr.bf16.vlgmr.msra.gmra.mrb[44].mxu0 %v1979_v41  ;;  %v6663_v41 = vld [vmem:[#allocation46_spill] sm:$0xff] }
 0x722   : > { %2064 = vmatpush1.bf16.msra.mxu0 %v5872_v60  ;;  %2095 = vmatprep.mubr.bf16.mxu0 %v6470_v14 }
 0x723   : > { %2065 = vmatprep.subr.bf16.mxu0 %v5876_v19 }
 0x726   : > { %2066 = vmatpush1.bf16.msra.mxu0 %v5879_v7 }
 0x727   : > { %2067 = vmatprep.subr.bf16.mxu0 %v5882_v0 }
 0x72a   : > { %2068 = vmatpush1.bf16.msra.mxu0 %v5885_v48 }
 0x72b   : > { %2069 = vmatprep.subr.bf16.mxu0 %v5888_v26 }
 0x72e   : > { %2070 = vmatpush1.bf16.msra.mxu0 %v5891_v8 }
 0x72f   : > { %2071 = vmatprep.subr.bf16.mxu0 %v5894_v20 }
 0x732   : > { %2072 = vmatpush1.bf16.msra.mxu0 %v5897_v42 }
 0x733   : > { %2073 = vmatprep.subr.bf16.mxu0 %v5900_v6 }
 0x736   : > { %2074 = vmatpush1.bf16.msra.mxu0 %v5903_v43 }
 0x737   : > { %2075 = vmatprep.subr.bf16.mxu0 %v5906_v21 }
 0x73a   : > { %2076 = vmatpush1.bf16.msra.mxu0 %v5909_v39 }
 0x73b   : > { %2077 = vmatprep.subr.bf16.mxu0 %v5912_v18 }
 0x73e   : > { %2078 = vmatpush1.bf16.msra.mxu0 %v5915_v27 }
 0x73f   : > { %4074 = vmatprep.subr.bf16.mxu0 %v6464_v28 }
 0x7f4   : > { %v2014_v30 = vpop.f32.mrb[44].mxu0 }
 0x7f5   : > { %v2015_v63 = vadd.f32 %v4942_v17, %v2014_v30  ;;  %v4072_v59 = vpop.f32.mrb[45].mxu0  ;;  %v6664_v30 = vld [vmem:[#allocation58_spill] sm:$0xff] }
 0x7f6   : > { %v2017_v10 = vpop.f32.mrb[46].mxu0  ;;  %v6666_v59 = vld [vmem:[#allocation47_spill] sm:$0xff] }
 0x7f7   : > { %4407 = vtanh.f32 %v2015_v63  ;;  %v4073_v23 = vpop.f32.mrb[47].mxu0  ;;  %v6665_v63 = vld [vmem:[#allocation59_spill] sm:$0xff]  ;;  %v6667_v10 = vld [vmem:[#allocation60_spill] sm:$0xff] }
 0x7f8   : > { %v6668_v23 = vld [vmem:[#allocation61_spill] sm:$0xff] }
 0x801   : > { %v4408_v32 = vpop.eup %4407 }
 0x802   : > { %v2021_v22 = vpack.c.bf16 %v4408_v32, %v4408_v32  ;;  %v6669_v32 = vld [vmem:[#allocation48_spill] sm:$0xff] }
 0x804   : > { %2055 = vmatmul.mubr.bf16.vlgmr.msra.gmra.mrb[44].mxu1 %v2021_v22  ;;  %2096 = vmatmul.mubr.bf16.vlgmr.msra.gmra.mrb[48].mxu0 %v2021_v22 }
 0x805   : > { %2105 = vmatpush1.bf16.msra.mxu1 %v5316_v31  ;;  %4075 = vmatpush3.bf16.msra.mxu0 %v6551_v33  ;;  %v6638_v31 = vld [vmem:[#allocation95_spill] sm:$0xff]  ;;  %v6641_v33 = vld [vmem:[#allocation29_spill] sm:$0xff] }
 0x806   : > { %2106 = vmatprep.subr.bf16.mxu1 %v6552_v34  ;;  %4076 = vmatprep.subr.bf16.mxu0 %v6464_v28  ;;  %v6642_v34 = vld [vmem:[#allocation30_spill] sm:$0xff] }
 0x807   : > { %2136 = vmatprep.mubr.bf16.mxu1 %v6470_v14  ;;  %4090 = vmatprep.mubr.msk.bf16.mxu0 %vm4803_vm0, %v6464_v28 }
 0x809   : > { %2107 = vmatpush1.bf16.msra.mxu1 %v6553_v37  ;;  %4077 = vmatpush3.bf16.msra.mxu0 %v6554_v38  ;;  %v6643_v37 = vld [vmem:[#allocation32_spill] sm:$0xff]  ;;  %v6644_v38 = vld [vmem:[#allocation31_spill] sm:$0xff] }
 0x80a   : > { %2108 = vmatprep.subr.bf16.mxu1 %v6555_v45  ;;  %4078 = vmatprep.subr.bf16.mxu0 %v6464_v28  ;;  %v6648_v45 = vld [vmem:[#allocation36_spill] sm:$0xff] }
 0x80d   : > { %2109 = vmatpush1.bf16.msra.mxu1 %v6556_v46  ;;  %4079 = vmatpush3.bf16.msra.mxu0 %v6557_v47  ;;  %v6649_v46 = vld [vmem:[#allocation38_spill] sm:$0xff]  ;;  %v6650_v47 = vld [vmem:[#allocation37_spill] sm:$0xff] }
 0x80e   : > { %2110 = vmatprep.subr.bf16.mxu1 %v6558_v50  ;;  %4080 = vmatprep.subr.bf16.mxu0 %v6464_v28  ;;  %v6651_v50 = vld [vmem:[#allocation39_spill] sm:$0xff] }
 0x811   : > { %2111 = vmatpush1.bf16.msra.mxu1 %v6559_v51  ;;  %4081 = vmatpush3.bf16.msra.mxu0 %v6560_v44  ;;  %v6652_v51 = vld [vmem:[#allocation40_spill] sm:$0xff]  ;;  %v6653_v44 = vld [vmem:[#allocation41_spill] sm:$0xff] }
 0x812   : > { %2112 = vmatprep.subr.bf16.mxu1 %v6561_v49  ;;  %4082 = vmatprep.subr.bf16.mxu0 %v6464_v28  ;;  %v6654_v49 = vld [vmem:[#allocation42_spill] sm:$0xff] }
 0x815   : > { %2113 = vmatpush1.bf16.msra.mxu1 %v6562_v52  ;;  %4083 = vmatpush3.bf16.msra.mxu0 %v6563_v2  ;;  %v6655_v52 = vld [vmem:[#allocation43_spill] sm:$0xff]  ;;  %v6656_v2 = vld [vmem:[#allocation52_spill] sm:$0xff] }
 0x816   : > { %2114 = vmatprep.subr.bf16.mxu1 %v6564_v53  ;;  %4084 = vmatprep.subr.bf16.mxu0 %v6464_v28  ;;  %v6657_v53 = vld [vmem:[#allocation44_spill] sm:$0xff] }
 0x819   : > { %2115 = vmatpush1.bf16.msra.mxu1 %v5367_v25  ;;  %4085 = vmatpush3.bf16.msra.mxu0 %v6565_v54  ;;  %v6639_v25 = vld [vmem:[#allocation96_spill] sm:$0xff]  ;;  %v6658_v54 = vld [vmem:[#allocation54_spill] sm:$0xff] }
 0x81a   : > { %2116 = vmatprep.subr.bf16.mxu1 %v6566_v55  ;;  %4086 = vmatprep.subr.bf16.mxu0 %v6464_v28  ;;  %v6659_v55 = vld [vmem:[#allocation55_spill] sm:$0xff] }
 0x81d   : > { %2117 = vmatpush1.bf16.msra.mxu1 %v5377_v13  ;;  %4087 = vmatpush3.bf16.msra.mxu0 %v6567_v56  ;;  %v6640_v13 = vld [vmem:[#allocation97_spill] sm:$0xff] }
 0x81e   : > { %2118 = vmatprep.subr.bf16.mxu1 %v6568_v57  ;;  %4088 = vmatprep.subr.bf16.mxu0 %v6464_v28  ;;  %v6660_v56 = vld [vmem:[#allocation45_spill] sm:$0xff]  ;;  %v6661_v57 = vld [vmem:[#allocation56_spill] sm:$0xff] }
 0x821   : > { %2119 = vmatpush1.bf16.msra.mxu1 %v6569_v58  ;;  %4089 = vmatpush3.bf16.msra.mxu0 %v5389_v24  ;;  %v6645_v24 = vld [vmem:[#allocation33_spill] sm:$0xff] }
 0x822   : > { %3746 = vmatprep.subr.bf16.mxu1 %v5395_v11  ;;  %3768 = vmatprep.subr.bf16.mxu0 %v5398_v12  ;;  %v6646_v11 = vld [vmem:[#allocation35_spill] sm:$0xff]  ;;  %v6647_v12 = vld [vmem:[#allocation34_spill] sm:$0xff]  ;;  %v6662_v58 = vld [vmem:[#allocation57_spill] sm:$0xff] }
 0x824   : > { %2137 = vmatmul.mubr.bf16.vlgmr.msra.gmra.mrb[48].mxu1 %v2021_v22  ;;  %4091 = vmatmul.mubr.bf16.vlgmr.msra.gmra.mrb[52].mxu0 %v2021_v22  ;;  %v2573_v22 = vmul.f32 2.0, %v6669_v32 }
 0x825   : > { %3747 = vmatpush3.bf16.msra.mxu1 %v6638_v31  ;;  %3769 = vmatpush3.bf16.msra.mxu0 %v6639_v25  ;;  %v2575_v31 = vmul.f32 2.0, %v5689_v40  ;;  %v2574_v25 = vmul.f32 2.0, %v5692_v1 }
 0x826   : > { %3748 = vmatprep.subr.bf16.mxu1 %v6640_v13  ;;  %3770 = vmatprep.subr.bf16.mxu0 %v6641_v33  ;;  %v2576_v13 = vmul.f32 2.0, %v5695_v36 }
 0x829   : > { %3749 = vmatpush3.bf16.msra.mxu1 %v6642_v34  ;;  %3771 = vmatpush3.bf16.msra.mxu0 %v6643_v37  ;;  %v6670_v37 = vld [vmem:[#allocation98_spill] sm:$0xff] }
 0x82a   : > { %3750 = vmatprep.subr.bf16.mxu1 %v6644_v38  ;;  %3772 = vmatprep.subr.bf16.mxu0 %v6645_v24  ;;  %v2580_v38 = vadd.f32 %v2573_v22, %v6670_v37  ;;  %v6671_v24 = vld [vmem:[#allocation99_spill] sm:$0xff] }
 0x82d   : > { %3751 = vmatpush3.bf16.msra.mxu1 %v6646_v11  ;;  %3773 = vmatpush3.bf16.msra.mxu0 %v6647_v12  ;;  %v2582_v11 = vadd.f32 %v2575_v31, %v6671_v24  ;;  %v6672_v12 = vld [vmem:[#allocation16_spill] sm:$0xff] }
 0x82e   : > { %3752 = vmatprep.subr.bf16.mxu1 %v6648_v45  ;;  %3774 = vmatprep.subr.bf16.mxu0 %v6649_v46  ;;  %v6673_v46 = vld [vmem:[#allocation18_spill] sm:$0xff] }
 0x831   : > { %3753 = vmatpush3.bf16.msra.mxu1 %v6650_v47  ;;  %3775 = vmatpush3.bf16.msra.mxu0 %v6651_v50 }
 0x832   : > { %3754 = vmatprep.subr.bf16.mxu1 %v6652_v51  ;;  %3776 = vmatprep.subr.bf16.mxu0 %v6653_v44  ;;  %v6674_v44 = vld [vmem:[#allocation100_spill] sm:$0xff] }
 0x835   : > { %3755 = vmatpush3.bf16.msra.mxu1 %v6654_v49  ;;  %3777 = vmatpush3.bf16.msra.mxu0 %v6655_v52  ;;  %v2581_v49 = vadd.f32 %v2574_v25, %v6674_v44  ;;  %v6675_v52 = vld [vmem:[#allocation101_spill] sm:$0xff]  ;;  %v6680_v44 = vld [vmem:[#allocation51_spill] sm:$0xff] }
 0x836   : > { %3756 = vmatprep.subr.bf16.mxu1 %v6656_v2  ;;  %3778 = vmatprep.subr.bf16.mxu0 %v6657_v53  ;;  %v2583_v40 = vadd.f32 %v2576_v13, %v6675_v52  ;;  %v6676_v2 = vld [vmem:[#allocation17_spill] sm:$0xff]  ;;  %v6677_v53 = vld [vmem:[#allocation19_spill] sm:$0xff] }
 0x837   : > { %v6685_v52 = vld [vmem:[#allocation65_spill] sm:$0xff] }
 0x839   : > { %3757 = vmatpush3.bf16.msra.mxu1 %v6658_v54  ;;  %3779 = vmatpush3.bf16.msra.mxu0 %v6659_v55 }
 0x83a   : > { %3758 = vmatprep.subr.bf16.mxu1 %v6660_v56  ;;  %3780 = vmatprep.subr.bf16.mxu0 %v6661_v57 }
 0x83d   : > { %3759 = vmatpush3.bf16.msra.mxu1 %v6662_v58  ;;  %3781 = vmatpush3.bf16.msra.mxu0 %v6663_v41 }
 0x83e   : > { %3760 = vmatprep.subr.bf16.mxu1 %v6664_v30  ;;  %3782 = vmatprep.subr.bf16.mxu0 %v6665_v63 }
 0x841   : > { %3761 = vmatpush3.bf16.msra.mxu1 %v6666_v59  ;;  %3783 = vmatpush3.bf16.msra.mxu0 %v6667_v10 }
 0x842   : > { %3790 = vmatprep.subr.bf16.mxu1 %v6668_v23  ;;  %4094 = vmatprep.subr.bf16.mxu0 %v6464_v28 }
 0x8d7   : > { %v2056_v33 = vpop.f32.mrb[44].mxu1  ;;  %v2097_v34 = vpop.f32.mrb[48].mxu0 }
 0x8d8   : > { %v2057_v45 = vadd.f32 %v2056_v33, %v6672_v12  ;;  %v2098_v47 = vadd.f32 %v2097_v34, %v6673_v46  ;;  %v2058_v50 = vpop.f32.mrb[45].mxu1  ;;  %v2099_v51 = vpop.f32.mrb[49].mxu0 }
 0x8d9   : > { %v2059_v1 = vadd.f32 %v2058_v50, %v6676_v2  ;;  %v2100_v36 = vadd.f32 %v2099_v51, %v6677_v53  ;;  %v2060_v54 = vpop.f32.mrb[46].mxu1  ;;  %v2101_v55 = vpop.f32.mrb[50].mxu0 }
 0x8da   : > { %v2185_v56 = vmul.f32 0.125, %v2057_v45  ;;  %v2587_v57 = vmul.f32 2.0, %v2057_v45  ;;  %v2187_v58 = vmul.f32 0.125, %v2098_v47  ;;  %v2589_v41 = vmul.f32 2.0, %v2098_v47  ;;  %v2061_v30 = vpop.f32.mrb[47].mxu1  ;;  %v2102_v63 = vpop.f32.mrb[51].mxu0 }
 0x8db   : > { %v2186_v59 = vmul.f32 0.125, %v2059_v1  ;;  %v2588_v10 = vmul.f32 2.0, %v2059_v1  ;;  %v2188_v23 = vmul.f32 0.125, %v2100_v36  ;;  %v2590_v32 = vmul.f32 2.0, %v2100_v36  ;;  %v6687_v1 = vld [vmem:[#allocation67_spill] sm:$0xff]  ;;  %v6688_v36 = vld [vmem:[#allocation68_spill] sm:$0xff] }
 0x8dc   : > { %v2192_v22 = vadd.f32 %v4787_v3, %v2185_v56  ;;  %v2194_v31 = vadd.f32 %v4779_v5, %v2187_v58  ;;  %v6001_v25 = vadd.f32 %v2587_v57, %v2580_v38  ;;  %v6003_v13 = vadd.f32 %v2589_v41, %v2582_v11  ;;  %v6678_v38 = vld [vmem:[#allocation49_spill] sm:$0xff]  ;;  %v6679_v11 = vld [vmem:[#allocation50_spill] sm:$0xff] }
 0x8dd   : > { %v2193_v33 = vadd.f32 %v4783_v4, %v2186_v59  ;;  %v2195_v34 = vadd.f32 %v4775_v9, %v2188_v23  ;;  %v6007_v37 = vadd.f32 %v2588_v10, %v2581_v49  ;;  %v6009_v24 = vadd.f32 %v2590_v32, %v2583_v40  ;;  %v6681_v49 = vld [vmem:[#allocation53_spill] sm:$0xff]  ;;  %v6686_v40 = vld [vmem:[#allocation66_spill] sm:$0xff]  ;;  %v6692_v59 = vld [vmem:[#allocation71_spill] sm:$0xff] }
 0x8de   : > { %v2199_v50 = vpack.c.bf16 %v2192_v22, %v2192_v22  ;;  %v2201_v51 = vpack.c.bf16 %v2194_v31, %v2194_v31  ;;  %v6689_v54 = vld [vmem:[#allocation69_spill] sm:$0xff]  ;;  %v2577_v55 = vmul.f32 2.0, %v5764_v61  ;;  %v2579_v56 = vmul.f32 2.0, %v5767_v35  ;;  %v6691_v63 = vld [vmem:[#allocation70_spill] sm:$0xff]  ;;  %v6693_v10 = vld [vmem:[#allocation20_spill] sm:$0xff] }
 0x8df   : > { %v2200_v45 = vpack.c.bf16 %v2193_v33, %v2193_v33  ;;  %v2202_v47 = vpack.c.bf16 %v2195_v34, %v2195_v34  ;;  %v6690_v57 = vld [vmem:[#allocation73_spill] sm:$0xff]  ;;  %v6694_v23 = vmov %v6693_v10  ;;  %v6695_v22 = vld [vmem:[#allocation22_spill] sm:$0xff] }
 0x8e0   : > { %v2578_v58 = vmul.f32 2.0, %v6690_v57  ;;  %v6697_v61 = vld [vmem:[#allocation26_spill] sm:$0xff] }
 0x8e1   : > { %2238 = vmatprep.mubr.bf16.mxu1 %v2200_v45  ;;  %2278 = vmatprep.mubr.bf16.mxu0 %v2202_v47  ;;  %v6696_v45 = vld [vmem:[#allocation72_spill] sm:$0xff]  ;;  %v2584_v35 = vadd.f32 %v2577_v55, %v6697_v61  ;;  %v6698_v47 = vld [vmem:[#allocation21_spill] sm:$0xff]  ;;  %v6708_v61 = vld [vmem:[#allocation78_spill] sm:$0xff] }
 0x8e2   : > { %2239 = vmatmul.mubr.bf16.vlgmr.msra.gmra.mrb[52].mxu1 %v2199_v50  ;;  %2279 = vmatmul.mubr.bf16.vlgmr.msra.gmra.mrb[56].mxu0 %v2201_v51  ;;  %v6703_v55 = vld [vmem:[#allocation25_spill] sm:$0xff] }
 0x8e3   : > { %3791 = vmatpush3.bf16.msra.mxu1 %v5705_v62  ;;  %4095 = vmatpush3.bf16.msra.mxu0 %v5708_v29  ;;  %v6682_v62 = vld [vmem:[#allocation62_spill] sm:$0xff]  ;;  %v6683_v29 = vld [vmem:[#allocation63_spill] sm:$0xff] }
 0x8e4   : > { %3792 = vmatprep.subr.bf16.mxu1 %v5711_v15  ;;  %4096 = vmatprep.subr.bf16.mxu0 %v6464_v28  ;;  %v6684_v15 = vld [vmem:[#allocation64_spill] sm:$0xff] }
 0x8e5   : > { %4110 = vmatprep.mubr.msk.bf16.mxu0 %vm4803_vm0, %v6464_v28 }
 0x8e7   : > { %3793 = vmatpush3.bf16.msra.mxu1 %v6678_v38  ;;  %4097 = vmatpush3.bf16.msra.mxu0 %v6679_v11 }
 0x8e8   : > { %3794 = vmatprep.subr.bf16.mxu1 %v6680_v44  ;;  %4098 = vmatprep.subr.bf16.mxu0 %v6464_v28 }
 0x8eb   : > { %3795 = vmatpush3.bf16.msra.mxu1 %v6681_v49  ;;  %4099 = vmatpush3.bf16.msra.mxu0 %v6682_v62 }
 0x8ec   : > { %3796 = vmatprep.subr.bf16.mxu1 %v6683_v29  ;;  %4100 = vmatprep.subr.bf16.mxu0 %v6464_v28 }
 0x8ef   : > { %3797 = vmatpush3.bf16.msra.mxu1 %v6684_v15  ;;  %4101 = vmatpush3.bf16.msra.mxu0 %v6685_v52  ;;  %v6699_v52 = vld [vmem:[#allocation27_spill] sm:$0xff] }
 0x8f0   : > { %3798 = vmatprep.subr.bf16.mxu1 %v6686_v40  ;;  %4102 = vmatprep.subr.bf16.mxu0 %v6464_v28  ;;  %v2586_v40 = vadd.f32 %v2579_v56, %v6699_v52  ;;  %v6716_v52 = vld [vmem:[#allocation86_spill] sm:$0xff] }
 0x8f3   : > { %3799 = vmatpush3.bf16.msra.mxu1 %v6687_v1  ;;  %4103 = vmatpush3.bf16.msra.mxu0 %v6688_v36  ;;  %v6700_v1 = vld [vmem:[#allocation28_spill] sm:$0xff] }
 0x8f4   : > { %3800 = vmatprep.subr.bf16.mxu1 %v6689_v54  ;;  %4104 = vmatprep.subr.bf16.mxu0 %v6464_v28  ;;  %v2585_v36 = vadd.f32 %v2578_v58, %v6700_v1  ;;  %v6718_v1 = vld [vmem:[#allocation88_spill] sm:$0xff] }
 0x8f7   : > { %v2138_v41 = vpop.f32.mrb[48].mxu1  ;;  %v2179_v30 = vpop.f32.mrb[52].mxu0  ;;  %3801 = vmatpush3.bf16.msra.mxu1 %v6691_v63  ;;  %4105 = vmatpush3.bf16.msra.mxu0 %v6692_v59  ;;  %v6704_v59 = vld [vmem:[#allocation23_spill] sm:$0xff] }
 0x8f8   : > { %v2139_v32 = vadd.f32 %v2138_v41, %v6693_v10  ;;  %v2180_v31 = vadd.f32 %v2179_v30, %v6695_v22  ;;  %v2140_v33 = vpop.f32.mrb[49].mxu1  ;;  %v4092_v34 = vpop.f32.mrb[53].mxu0  ;;  %3802 = vmatprep.subr.bf16.mxu1 %v6696_v45  ;;  %4106 = vmatprep.subr.bf16.mxu0 %v6464_v28  ;;  %v6701_v41 = vld [vmem:[#allocation74_spill] sm:$0xff]  ;;  %v6702_v30 = vld [vmem:[#allocation75_spill] sm:$0xff]  ;;  %v6707_v45 = vld [vmem:[#allocation77_spill] sm:$0xff] }
 0x8f9   : > { %v2141_v50 = vadd.f32 %v2140_v33, %v6698_v47  ;;  %v2142_v51 = vpop.f32.mrb[50].mxu1  ;;  %v2182_v38 = vpop.f32.mrb[54].mxu0  ;;  %v6705_v33 = vld [vmem:[#allocation76_spill] sm:$0xff] }
 0x8fa   : > { %v2189_v11 = vmul.f32 0.125, %v2139_v32  ;;  %v2591_v44 = vmul.f32 2.0, %v2139_v32  ;;  %v2191_v49 = vmul.f32 0.125, %v2180_v31  ;;  %v2593_v62 = vmul.f32 2.0, %v2180_v31  ;;  %v2143_v29 = vpop.f32.mrb[51].mxu1  ;;  %v4093_v15 = vpop.f32.mrb[55].mxu0 }
 0x8fb   : > { %v2190_v54 = vmul.f32 0.125, %v2141_v50  ;;  %v2592_v57 = vmul.f32 2.0, %v2141_v50  ;;  %3803 = vmatpush3.bf16.msra.mxu1 %v6701_v41  ;;  %4107 = vmatpush3.bf16.msra.mxu0 %v6702_v30  ;;  %v6706_v31 = vld [vmem:[#allocation24_spill] sm:$0xff]  ;;  %v6715_v15 = vld [vmem:[#allocation85_spill] sm:$0xff]  ;;  %v4502_v30 = vld [vmem:[#allocation8 + $0xe0] ss:$28 sps:$4 sm:$0xff]  }
 0x8fc   : > { %v2196_v63 = vadd.f32 %v6703_v55, %v2189_v11  ;;  %v2198_v10 = vadd.f32 %v6704_v59, %v2191_v49  ;;  %3804 = vmatprep.subr.bf16.mxu1 %v6705_v33  ;;  %4108 = vmatprep.subr.bf16.mxu0 %v6464_v28  ;;  %v6052_v32 = vadd.f32 %v2591_v44, %v2584_v35  ;;  %v6709_v11 = vld [vmem:[#allocation79_spill] sm:$0xff]  ;;  %v6710_v35 = vld [vmem:[#allocation80_spill] sm:$0xff]  ;;  %v6711_v44 = vld [vmem:[#allocation81_spill] sm:$0xff] }
 0x8fd   : > { %v2197_v56 = vadd.f32 %v6706_v31, %v2190_v54  ;;  %v6055_v34 = vadd.f32 %v2593_v62, %v2586_v40  ;;  %v6057_v58 = vadd.f32 %v2592_v57, %v2585_v36  ;;  %v6712_v49 = vld [vmem:[#allocation82_spill] sm:$0xff]  ;;  %v6713_v62 = vld [vmem:[#allocation83_spill] sm:$0xff]  ;;  %v6714_v29 = vld [vmem:[#allocation84_spill] sm:$0xff] }
 0x8fe   : > { %v2203_v51 = vpack.c.bf16 %v2196_v63, %v2196_v63  ;;  %v2205_v38 = vpack.c.bf16 %v2198_v10, %v2198_v10  ;;  %v6717_v40 = vld [vmem:[#allocation87_spill] sm:$0xff]  ;;  %v6719_v36 = vld [vmem:[#allocation89_spill] sm:$0xff]  ;;  %v6720_v54 = vld [vmem:[#allocation90_spill] sm:$0xff] }
 0x8ff   : > { %3805 = vmatpush3.bf16.msra.mxu1 %v6707_v45  ;;  %4109 = vmatpush3.bf16.msra.mxu0 %v6708_v61  ;;  %v2204_v50 = vpack.c.bf16 %v2197_v56, %v2197_v56  ;;  %v6721_v57 = vld [vmem:[#allocation91_spill] sm:$0xff]  ;;  %v6722_v41 = vld [vmem:[#allocation92_spill] sm:$0xff]  ;;  %v4503_v63 = vld [vmem:[#allocation8 + $0x11c] ss:$28 sps:$4 sm:$0xff]  }
 0x900   : > { %4114 = vmatprep.subr.bf16.mxu1 %v6464_v28  ;;  %2410 = vmatprep.subr.bf16.mxu0 %v6709_v11  ;;  %v6723_v10 = vld [vmem:[#allocation93_spill] sm:$0xff]  ;;  %v6724_v45 = vld [vmem:[#allocation94_spill] sm:$0xff]  ;;  %v4508_v11 = vld [vmem:[#allocation8 + $0x188] ss:$28 sps:$4 sm:$0xff]  }
 0x901   : > { %2318 = vmatprep.mubr.bf16.mxu1 %v2204_v50  ;;  %v4504_v33 = vld [vmem:[#allocation8 + $0x118] ss:$28 sps:$4 sm:$0xff]   ;;  %v4506_v61 = vld [vmem:[#allocation8 + $0x150] ss:$28 sps:$4 sm:$0xff]  }
 0x902   : > { %2319 = vmatmul.mubr.bf16.vlgmr.msra.gmra.mrb[56].mxu1 %v2203_v51  ;;  %4111 = vmatmul.mubr.bf16.vlgmr.msra.gmra.mrb[60].mxu0 %v2205_v38  ;;  %v4505_v56 = vld [vmem:[#allocation8 + $0x154] ss:$28 sps:$4 sm:$0xff]   ;;  %v4507_v50 = vld [vmem:[#allocation8 + $0x18c] ss:$28 sps:$4 sm:$0xff]   ;;  %v6725_v51 = vld [vmem:[#allocation102_spill] sm:$0xff] }
 0x903   : > { %4115 = vmatpush3.bf16.msra.mxu1 %v6710_v35  ;;  %4130 = vmatprep.mubr.msk.bf16.mxu1 %vm4803_vm0, %v6464_v28  ;;  %v6726_v38 = vld [vmem:[#allocation103_spill] sm:$0xff]  ;;  %v4509_v35 = vld [vmem:[#allocation8 + $0x14] ss:$28 sps:$4 sm:$0xff]  }
 0x904   : > { %4116 = vmatprep.subr.bf16.mxu1 %v6464_v28  ;;  %2411 = vmatpush1.bf16.msra.mxu0 %v6711_v44 }
 0x905   : > { %2412 = vmatprep.subr.bf16.mxu0 %v6712_v49  ;;  %2442 = vmatprep.mubr.bf16.mxu0 %v6470_v14 }
 0x907   : > { %4117 = vmatpush3.bf16.msra.mxu1 %v6713_v62 }
 0x908   : > { %4118 = vmatprep.subr.bf16.mxu1 %v6464_v28  ;;  %2413 = vmatpush1.bf16.msra.mxu0 %v6714_v29 }
 0x909   : > { %2414 = vmatprep.subr.bf16.mxu0 %v6715_v15 }
 0x90b   : > { %4119 = vmatpush3.bf16.msra.mxu1 %v6716_v52 }
 0x90c   : > { %4120 = vmatprep.subr.bf16.mxu1 %v6464_v28  ;;  %2415 = vmatpush1.bf16.msra.mxu0 %v6717_v40 }
 0x90d   : > { %2416 = vmatprep.subr.bf16.mxu0 %v6718_v1 }
 0x90f   : > { %4121 = vmatpush3.bf16.msra.mxu1 %v6719_v36 }
 0x910   : > { %4122 = vmatprep.subr.bf16.mxu1 %v6464_v28  ;;  %2417 = vmatpush1.bf16.msra.mxu0 %v6720_v54 }
 0x911   : > { %2418 = vmatprep.subr.bf16.mxu0 %v6721_v57 }
 0x913   : > { %4123 = vmatpush3.bf16.msra.mxu1 %v6722_v41 }
 0x914   : > { %4124 = vmatprep.subr.bf16.mxu1 %v6464_v28  ;;  %2419 = vmatpush1.bf16.msra.mxu0 %v4502_v30 }
 0x915   : > { %2420 = vmatprep.subr.bf16.mxu0 %v4503_v63 }
 0x917   : > { %4125 = vmatpush3.bf16.msra.mxu1 %v6723_v10 }
 0x918   : > { %4126 = vmatprep.subr.bf16.mxu1 %v6464_v28  ;;  %2421 = vmatpush1.bf16.msra.mxu0 %v4504_v33 }
 0x919   : > { %2422 = vmatprep.subr.bf16.mxu0 %v4505_v56 }
 0x91b   : > { %4127 = vmatpush3.bf16.msra.mxu1 %v6724_v45 }
 0x91c   : > { %4128 = vmatprep.subr.bf16.mxu1 %v6464_v28  ;;  %2423 = vmatpush1.bf16.msra.mxu0 %v4506_v61 }
 0x91d   : > { %2424 = vmatprep.subr.bf16.mxu0 %v4507_v50 }
 0x91f   : > { %4129 = vmatpush3.bf16.msra.mxu1 %v6725_v51 }
 0x920   : > { %2451 = vmatprep.subr.bf16.mxu1 %v6726_v38  ;;  %2425 = vmatpush1.bf16.msra.mxu0 %v4508_v11 }
 0x921   : > { %2492 = vmatprep.subr.bf16.mxu0 %v4509_v35 }
 0x9b5   : > { %v3762_v44 = vpop.f32.mrb[52].mxu1  ;;  %v3784_v49 = vpop.f32.mrb[56].mxu0 }
 0x9b6   : > { %v3763_v62 = vpop.f32.mrb[53].mxu1  ;;  %v3785_v29 = vpop.f32.mrb[57].mxu0 }
 0x9b7   : > { %v3764_v15 = vadd.f32 %v3763_v62, %v3762_v44  ;;  %v3786_v52 = vadd.f32 %v3785_v29, %v3784_v49  ;;  %v3765_v40 = vpop.f32.mrb[54].mxu1  ;;  %v3787_v1 = vpop.f32.mrb[58].mxu0  ;;  %v4518_v49 = vld [vmem:[#allocation8 + $0xbc] ss:$28 sps:$4 sm:$0xff]   ;;  %v4521_v29 = vld [vmem:[#allocation8 + $0xf4] ss:$28 sps:$4 sm:$0xff]  }
 0x9b8   : > { %v3766_v36 = vpop.f32.mrb[55].mxu1  ;;  %v3788_v54 = vpop.f32.mrb[59].mxu0  ;;  %v4520_v62 = vld [vmem:[#allocation8 + $0xc0] ss:$28 sps:$4 sm:$0xff]   ;;  %v4524_v40 = vld [vmem:[#allocation8 + $0x12c] ss:$28 sps:$4 sm:$0xff]  }
 0x9b9   : > { %v2241_v57 = vadd.f32 %v3764_v15, %v4937_v16  ;;  %v4522_v15 = vld [vmem:[#allocation8 + $0xf0] ss:$28 sps:$4 sm:$0xff]   ;;  %v4525_v1 = vld [vmem:[#allocation8 + $0x128] ss:$28 sps:$4 sm:$0xff]  }
 0x9ba   : > { %v4526_v36 = vld [vmem:[#allocation8 + $0x130] ss:$28 sps:$4 sm:$0xff]   ;;  %v4527_v54 = vld [vmem:[#allocation8 + $0x164] ss:$28 sps:$4 sm:$0xff]  }
 0x9bb   : > { %v2281_v41 = vadd.f32 %v3786_v52, %v2241_v57  ;;  %v4523_v52 = vld [vmem:[#allocation8 + $0xf8] ss:$28 sps:$4 sm:$0xff]   ;;  %v4528_v57 = vld [vmem:[#allocation8 + $0x160] ss:$28 sps:$4 sm:$0xff]  }
 0x9bc   :  { %v4542_v16 = vld [vmem:[#allocation10 + $0x10] sm:$0xff] (%p160_p12)  }
 0x9d5   : > { %v3806_v30 = vpop.f32.mrb[56].mxu1  ;;  %v2360_v63 = vpop.f32.mrb[60].mxu0 }
 0x9d6   : > { %v3807_v10 = vpop.f32.mrb[57].mxu1  ;;  %v4112_v33 = vpop.f32.mrb[61].mxu0 }
 0x9d7   : > { %v3808_v56 = vadd.f32 %v3807_v10, %v3806_v30  ;;  %v3809_v45 = vpop.f32.mrb[58].mxu1  ;;  %v2363_v61 = vpop.f32.mrb[62].mxu0  ;;  %v4530_v30 = vld [vmem:[#allocation8 + $0x19c] ss:$28 sps:$4 sm:$0xff]  }
 0x9d8   : > { %v3810_v50 = vpop.f32.mrb[59].mxu1  ;;  %v4113_v51 = vpop.f32.mrb[63].mxu0  ;;  %v4532_v10 = vld [vmem:[#allocation8 + $0x1a0] ss:$28 sps:$4 sm:$0xff]  }
 0x9d9   : > { %v2321_v38 = vadd.f32 %v3808_v56, %v2281_v41  ;;  %v4529_v41 = vld [vmem:[#allocation8 + $0x168] ss:$28 sps:$4 sm:$0xff]  }
 0x9db   : > { %v2361_v11 = vadd.f32 %v2360_v63, %v2321_v38  ;;  %v4531_v63 = vld [vmem:[#allocation8 + $0x198] ss:$28 sps:$4 sm:$0xff]  }
 0x9dd   : > { %4409 = vtanh.f32 %v2361_v11 }
 0x9e7   : > { %v4410_v35 = vpop.eup %4409 }
 0x9e8   : > { %v2367_v44 = vpack.c.bf16 %v4410_v35, %v4410_v35 }
 0x9ea   : > { %4131 = vmatmul.mubr.bf16.vlgmr.msra.gmra.mrb[60].mxu1 %v2367_v44 }
 0x9eb   : > { %2452 = vmatpush1.bf16.msra.mxu1 %v5872_v60  ;;  %2483 = vmatprep.mubr.bf16.mxu1 %v6470_v14 }
 0x9ec   : > { %2453 = vmatprep.subr.bf16.mxu1 %v5876_v19 }
 0x9ef   : > { %2454 = vmatpush1.bf16.msra.mxu1 %v5879_v7 }
 0x9f0   : > { %2455 = vmatprep.subr.bf16.mxu1 %v5882_v0 }
 0x9f3   : > { %2456 = vmatpush1.bf16.msra.mxu1 %v5885_v48 }
 0x9f4   : > { %2457 = vmatprep.subr.bf16.mxu1 %v5888_v26 }
 0x9f7   : > { %2458 = vmatpush1.bf16.msra.mxu1 %v5891_v8 }
 0x9f8   : > { %2459 = vmatprep.subr.bf16.mxu1 %v5894_v20  ;;  %v4510_v20 = vld [vmem:[#allocation8 + $0x10] ss:$28 sps:$4 sm:$0xff]  }
 0x9fb   : > { %2460 = vmatpush1.bf16.msra.mxu1 %v5897_v42  ;;  %v4511_v42 = vld [vmem:[#allocation8 + $0x18] ss:$28 sps:$4 sm:$0xff]  }
 0x9fc   : > { %2461 = vmatprep.subr.bf16.mxu1 %v5900_v6  ;;  %v4512_v6 = vld [vmem:[#allocation8 + $0x4c] ss:$28 sps:$4 sm:$0xff]  }
 0x9ff   : > { %2462 = vmatpush1.bf16.msra.mxu1 %v5903_v43  ;;  %v4513_v43 = vld [vmem:[#allocation8 + $0x48] ss:$28 sps:$4 sm:$0xff]  }
 0xa00   : > { %2463 = vmatprep.subr.bf16.mxu1 %v5906_v21  ;;  %v4514_v21 = vld [vmem:[#allocation8 + $0x50] ss:$28 sps:$4 sm:$0xff]  }
 0xa03   : > { %2464 = vmatpush1.bf16.msra.mxu1 %v5909_v39  ;;  %v4515_v39 = vld [vmem:[#allocation8 + $0x84] ss:$28 sps:$4 sm:$0xff]  }
 0xa04   : > { %2465 = vmatprep.subr.bf16.mxu1 %v5912_v18  ;;  %v4516_v18 = vld [vmem:[#allocation8 + $0x80] ss:$28 sps:$4 sm:$0xff]  }
 0xa07   : > { %2466 = vmatpush1.bf16.msra.mxu1 %v5915_v27  ;;  %v4517_v27 = vld [vmem:[#allocation8 + $0x88] ss:$28 sps:$4 sm:$0xff]  }
 0xa08   : > { %4134 = vmatprep.subr.bf16.mxu1 %v6464_v28 }
 0xabd   : > { %v2402_v60 = vpop.f32.mrb[60].mxu1 }
 0xabe   : > { %v2403_v19 = vadd.f32 %v4942_v17, %v2402_v60  ;;  %v4132_v7 = vpop.f32.mrb[61].mxu1  ;;  %v4543_v17 = vld [vmem:[#allocation10 + $0xd0] sm:$0xff] (%p160_p12)  }
 0xabf   : > { %v2405_v0 = vpop.f32.mrb[62].mxu1 }
 0xac0   : > { %4411 = vtanh.f32 %v2403_v19  ;;  %v4133_v48 = vpop.f32.mrb[63].mxu1 }
 0xaca   : > { %v4412_v26 = vpop.eup %4411 }
 0xacb   : > { %v2409_v8 = vpack.c.bf16 %v4412_v26, %v4412_v26 }
 0xacd   : > { %2443 = vmatmul.mubr.bf16.vlgmr.msra.gmra.mrb[64].mxu0 %v2409_v8  ;;  %2484 = vmatmul.mubr.bf16.vlgmr.msra.gmra.mrb[64].mxu1 %v2409_v8 }
 0xace   : > { %2493 = vmatpush1.bf16.msra.mxu0 %v4510_v20  ;;  %4135 = vmatpush3.bf16.msra.mxu1 %v4511_v42 }
 0xacf   : > { %2494 = vmatprep.subr.bf16.mxu0 %v4512_v6  ;;  %4136 = vmatprep.subr.bf16.mxu1 %v6464_v28 }
 0xad0   : > { %2524 = vmatprep.mubr.bf16.mxu0 %v6470_v14  ;;  %4150 = vmatprep.mubr.msk.bf16.mxu1 %vm4803_vm0, %v6464_v28  ;;  %v4519_v14 = vld [vmem:[#allocation8 + $0xb8] ss:$28 sps:$4 sm:$0xff]  }
 0xad2   : > { %2495 = vmatpush1.bf16.msra.mxu0 %v4513_v43  ;;  %4137 = vmatpush3.bf16.msra.mxu1 %v4514_v21 }
 0xad3   : > { %2496 = vmatprep.subr.bf16.mxu0 %v4515_v39  ;;  %4138 = vmatprep.subr.bf16.mxu1 %v6464_v28 }
 0xad6   : > { %2497 = vmatpush1.bf16.msra.mxu0 %v4516_v18  ;;  %4139 = vmatpush3.bf16.msra.mxu1 %v4517_v27 }
 0xad7   : > { %2498 = vmatprep.subr.bf16.mxu0 %v4518_v49  ;;  %4140 = vmatprep.subr.bf16.mxu1 %v6464_v28 }
 0xada   : > { %2499 = vmatpush1.bf16.msra.mxu0 %v4519_v14  ;;  %4141 = vmatpush3.bf16.msra.mxu1 %v4520_v62 }
 0xadb   : > { %2500 = vmatprep.subr.bf16.mxu0 %v4521_v29  ;;  %4142 = vmatprep.subr.bf16.mxu1 %v6464_v28 }
 0xade   : > { %2501 = vmatpush1.bf16.msra.mxu0 %v4522_v15  ;;  %4143 = vmatpush3.bf16.msra.mxu1 %v4523_v52 }
 0xadf   : > { %2502 = vmatprep.subr.bf16.mxu0 %v4524_v40  ;;  %4144 = vmatprep.subr.bf16.mxu1 %v6464_v28 }
 0xae2   : > { %2503 = vmatpush1.bf16.msra.mxu0 %v4525_v1  ;;  %4145 = vmatpush3.bf16.msra.mxu1 %v4526_v36  ;;  %v4537_v1 = vld [vmem:[#allocation10 + $0x48] sm:$0xff] (%p160_p12)  }
 0xae3   : > { %2504 = vmatprep.subr.bf16.mxu0 %v4527_v54  ;;  %4146 = vmatprep.subr.bf16.mxu1 %v6464_v28  ;;  %v4538_v36 = vld [vmem:[#allocation10 + $0x8] sm:$0xff] (%p160_p12)  }
 0xae4   :  { %v4539_v54 = vld [vmem:[#allocation10 + $0xc8] sm:$0xff] (%p160_p12)  }
 0xae6   : > { %2505 = vmatpush1.bf16.msra.mxu0 %v4528_v57  ;;  %4147 = vmatpush3.bf16.msra.mxu1 %v4529_v41  ;;  %v4540_v57 = vld [vmem:[#allocation10 + $0x88] sm:$0xff] (%p160_p12)   ;;  %v4541_v41 = vld [vmem:[#allocation10 + $0x50] sm:$0xff] (%p160_p12)  }
 0xae7   : > { %2506 = vmatprep.subr.bf16.mxu0 %v4530_v30  ;;  %4148 = vmatprep.subr.bf16.mxu1 %v6464_v28  ;;  %v4548_v30 = vld [vmem:[#allocation10 + $0x98] sm:$0xff] (%p160_p12)  }
 0xaea   : > { %2507 = vmatpush1.bf16.msra.mxu0 %v4531_v63  ;;  %4149 = vmatpush3.bf16.msra.mxu1 %v4532_v10  ;;  %v4549_v63 = vld [vmem:[#allocation10 + $0x60] sm:$0xff] (%p160_p12)  }
 0xaed   : > { %2525 = vmatmul.mubr.bf16.vlgmr.msra.gmra.mrb[68].mxu0 %v2409_v8  ;;  %4151 = vmatmul.mubr.bf16.vlgmr.msra.gmra.mrb[68].mxu1 %v2409_v8 }
 0xba0   : > { %v2444_v33 = vpop.f32.mrb[64].mxu0  ;;  %v2485_v56 = vpop.f32.mrb[64].mxu1 }
 0xba1   : > { %v2445_v45 = vadd.f32 %v2444_v33, %v6672_v12  ;;  %v2486_v61 = vadd.f32 %v2485_v56, %v6673_v46  ;;  %v2446_v50 = vpop.f32.mrb[65].mxu0  ;;  %v2487_v51 = vpop.f32.mrb[65].mxu1  ;;  %v4551_v33 = vld [vmem:[#allocation10 + $0xe0] sm:$0xff] (%p160_p12)  }
 0xba2   : > { %v2447_v38 = vadd.f32 %v2446_v50, %v6676_v2  ;;  %v2488_v11 = vadd.f32 %v2487_v51, %v6677_v53  ;;  %v2448_v35 = vpop.f32.mrb[66].mxu0  ;;  %v2489_v28 = vpop.f32.mrb[66].mxu1  ;;  %v4552_v56 = vld [vmem:[#allocation10 + $0xa0] sm:$0xff] (%p160_p12)   ;;  %v4555_v50 = vld [vmem:[#allocation10 + $0xe8] sm:$0xff] (%p160_p12)  }
 0xba3   : > { %v2601_v44 = vadd.f32 %v6001_v25, %v2445_v45  ;;  %v2603_v60 = vadd.f32 %v6003_v13, %v2486_v61  ;;  %v2449_v19 = vpop.f32.mrb[67].mxu0  ;;  %v2490_v7 = vpop.f32.mrb[67].mxu1  ;;  %v4553_v45 = vld [vmem:[#allocation10 + $0x68] sm:$0xff] (%p160_p12)   ;;  %v4559_v35 = vld [vmem:[#allocation10 + $0xf0] sm:$0xff] (%p160_p12)  }
 0xba4   : > { %v2602_v0 = vadd.f32 %v6007_v37, %v2447_v38  ;;  %v2604_v12 = vadd.f32 %v6009_v24, %v2488_v11  ;;  %v4554_v61 = vld [vmem:[#allocation10 + $0x28] sm:$0xff] (%p160_p12)   ;;  %v4557_v38 = vld [vmem:[#allocation10 + $0x70] sm:$0xff] (%p160_p12)   ;;  %v4563_v19 = vld [vmem:[#allocation10 + $0xf8] sm:$0xff] (%p160_p12)  }
 0xba5   : > { %v2608_v48 = vmul.f32 0.020833334, %v2601_v44  ;;  %v2610_v46 = vmul.f32 0.020833334, %v2603_v60  ;;  %v4556_v51 = vld [vmem:[#allocation10 + $0xa8] sm:$0xff] (%p160_p12)   ;;  %v4560_v28 = vld [vmem:[#allocation10 + $0xb0] sm:$0xff] (%p160_p12)  }
 0xba6   : > { %v2609_v26 = vmul.f32 0.020833334, %v2602_v0  ;;  %v2611_v8 = vmul.f32 0.020833334, %v2604_v12  ;;  %v4561_v44 = vld [vmem:[#allocation10 + $0x78] sm:$0xff] (%p160_p12)   ;;  %v4565_v12 = vld [vmem:[#allocation10 + $0x140] sm:$0xff] (%p160_p12)  }
 0xba7   : > { %v6128_v3 = vadd.f32 %v4787_v3, %v2608_v48   ;;  %v6131_v5 = vadd.f32 %v4779_v5, %v2610_v46   ;;  %v4562_v60 = vld [vmem:[#allocation10 + $0x38] sm:$0xff] (%p160_p12)  }
 0xba8   : > { %v2616_v25 = vadd.f32 %v4783_v4, %v2609_v26   ;;  %v2618_v13 = vadd.f32 %v4775_v9, %v2611_v8   ;;  %v4564_v0 = vld [vmem:[#allocation10 + $0xb8] sm:$0xff] (%p160_p12)   ;;  %v4566_v26 = vld [vmem:[#allocation10 + $0x100] sm:$0xff] (%p160_p12)  }
 0xba9   : > { %v6727_v2 = vmov %v6128_v3  ;;  %v6728_v53 = vmov %v6131_v5  ;;  %v4567_v8 = vld [vmem:[#allocation10 + $0x180] sm:$0xff] (%p160_p12)  }
 0xbaa   :  { %v2629_v7 = vpack.c.bf16 (%p160_p12), %v6727_v2, %v6727_v2  ;;  %v2631_v48 = vpack.c.bf16 (%p160_p12), %v6728_v53, %v6728_v53 }
 0xbc0   : > { %v2526_v20 = vpop.f32.mrb[68].mxu0  ;;  %v2567_v42 = vpop.f32.mrb[68].mxu1 }
 0xbc1   : > { %v2527_v37 = vadd.f32 %v2526_v20, %v6694_v23  ;;  %v2568_v24 = vadd.f32 %v2567_v42, %v6695_v22  ;;  %v2528_v6 = vpop.f32.mrb[69].mxu0  ;;  %v4152_v43 = vpop.f32.mrb[69].mxu1  ;;  %v4544_v23 = vld [vmem:[#allocation10 + $0x90] sm:$0xff] (%p160_p12)   ;;  %v4545_v22 = vld [vmem:[#allocation10 + $0x58] sm:$0xff] (%p160_p12)   ;;  %v4570_v20 = vld [vmem:[#allocation10 + $0x188] sm:$0xff] (%p160_p12)  }
 0xbc2   : > { %v2529_v21 = vadd.f32 %v2528_v6, %v6698_v47  ;;  %v2530_v39 = vpop.f32.mrb[70].mxu0  ;;  %v2570_v18 = vpop.f32.mrb[70].mxu1  ;;  %v4546_v47 = vld [vmem:[#allocation10 + $0x18] sm:$0xff] (%p160_p12)   ;;  %v4572_v42 = vld [vmem:[#allocation10 + $0x110] sm:$0xff] (%p160_p12)   ;;  %v4577_v43 = vld [vmem:[#allocation10 + $0x160] sm:$0xff] (%p160_p12)  }
 0xbc3   : > { %v2605_v3 = vadd.f32 %v6052_v32, %v2527_v37  ;;  %v2607_v5 = vadd.f32 %v6055_v34, %v2568_v24  ;;  %v2531_v27 = vpop.f32.mrb[71].mxu0  ;;  %v4153_v4 = vpop.f32.mrb[71].mxu1  ;;  %v2632_v32 = vpack.c.bf16 (%p160_p12), %v2618_v13, %v2618_v13  ;;  %v4535_v34 = vld [vmem:[#allocation10 + $0xc0] sm:$0xff] (%p160_p12)   ;;  %v4573_v37 = vld [vmem:[#allocation10 + $0x190] sm:$0xff] (%p160_p12)   ;;  %v4574_v24 = vld [vmem:[#allocation10 + $0x158] sm:$0xff] (%p160_p12)  }
 0xbc4   : > { %v2606_v9 = vadd.f32 %v6057_v58, %v2529_v21  ;;  %v6737_v4 = vmov %v2616_v25  ;;  %v4536_v58 = vld [vmem:[#allocation10 + $0x80] sm:$0xff] (%p160_p12)   ;;  %3861 = vmatprep.subr.bf16.mxu1 (%p160_p12), %v4535_v34  ;;  %v4575_v6 = vld [vmem:[#allocation10 + $0x118] sm:$0xff] (%p160_p12)   ;;  %v4580_v18 = vld [vmem:[#allocation10 + $0x168] sm:$0xff] (%p160_p12)  }
 0xbc5   : > { %v2612_v49 = vmul.f32 0.020833334, %v2605_v3  ;;  %v2614_v14 = vmul.f32 0.020833334, %v2607_v5  ;;  %v6736_v5 = vmov %v6728_v53  ;;  %v6738_v3 = vmov %v6727_v2  ;;  %162 = sbr.rel (!%p160_p12) target bundleno = 102 (0x66), region = 83  ;;  %3156 = vmatprep.mubr.bf16.mxu1 (%p160_p12), %v2632_v32  ;;  %3862 = vmatpush3.bf16.msra.mxu1 (%p160_p12), %v4536_v58  ;;  %v4569_v2 = vld [vmem:[#allocation10 + $0x108] sm:$0xff] (%p160_p12)  }
 0xbc6   : > { %v2613_v62 = vmul.f32 0.020833334, %v2606_v9  ;;  %v6735_v9 = vmov %v2618_v13  ;;  %3863 = vmatprep.subr.bf16.mxu1 (%p160_p12), %v4539_v54  ;;  %v4568_v13 = vld [vmem:[#allocation10 + $0x148] sm:$0xff] (%p160_p12)   ;;  %v4571_v53 = vld [vmem:[#allocation10 + $0x150] sm:$0xff] (%p160_p12)   ;;  %v4576_v21 = vld [vmem:[#allocation10 + $0x198] sm:$0xff] (%p160_p12)  }
 0xbc7   : > { %v6142_v10 = vadd.f32 %v6703_v55, %v2612_v49   ;;  %v6145_v15 = vadd.f32 %v6704_v59, %v2614_v14   ;;  %v4533_v55 = vld [vmem:[#allocation10 + $0x40] sm:$0xff] (%p160_p12)   ;;  %v2630_v59 = vpack.c.bf16 (%p160_p12), %v2616_v25, %v2616_v25  ;;  %v4805_v25 = vmov (%p160_p12), 0.0   ;;  %v4581_v5 = vld [vmem:[#allocation10 + $0x128] sm:$0xff] (%p160_p12)   ;;  %v4583_v27 = vld [vmem:[#allocation10 + $0x170] sm:$0xff] (%p160_p12)  }
 0xbc8   : > { %v6148_v11 = vadd.f32 %v6706_v31, %v2613_v62   ;;  %v4534_v31 = vld [vmem:[#allocation10] sm:$0xff] (%p160_p12)   ;;  %3839 = vmatprep.subr.bf16.mxu0 (%p160_p12), %v4533_v55  ;;  %v4582_v4 = vld [vmem:[#allocation10 + $0x1a8] sm:$0xff] (%p160_p12)   ;;  %v4584_v9 = vld [vmem:[#allocation10 + $0x130] sm:$0xff] (%p160_p12)  }
 0xbc9   : > { %v6729_v29 = vmov %v6142_v10  ;;  %v6730_v52 = vmov %v6145_v15  ;;  %3116 = vmatprep.mubr.bf16.mxu0 (%p160_p12), %v2630_v59  ;;  %3840 = vmatpush3.bf16.msra.mxu0 (%p160_p12), %v4534_v31  ;;  %v4578_v39 = vld [vmem:[#allocation10 + $0x120] sm:$0xff] (%p160_p12)   ;;  %v4586_v49 = vld [vmem:[#allocation10 + $0x178] sm:$0xff] (%p160_p12)   ;;  %v4585_v14 = vld [vmem:[#allocation10 + $0x1b0] sm:$0xff] (%p160_p12)  }
 0xbca   : > { %v6731_v40 = vmov %v6148_v11  ;;  %v6732_v15 = vmov %v6730_v52  ;;  %v6734_v10 = vmov %v6729_v29  ;;  %3841 = vmatprep.subr.bf16.mxu0 (%p160_p12), %v4537_v1  ;;  %3864 = vmatpush3.bf16.msra.mxu1 (%p160_p12), %v4540_v57  ;;  %v4579_v3 = vld [vmem:[#allocation10 + $0x1a0] sm:$0xff] (%p160_p12)   ;;  %v4587_v62 = vld [vmem:[#allocation10 + $0x138] sm:$0xff] (%p160_p12)   ;;  %v2633_v55 = vpack.c.bf16 (%p160_p12), %v6729_v29, %v6729_v29  ;;  %v3410_v31 = vld [vmem:[%s6205_s8] ss:$0 sm:$0xff] (%p160_p12)  ;;  %s3251_s8 = sshll.u32 (%p160_p12), %s4807_s12, 4  ;;  %s3252_s8 = int_to_ptr.vmem [resolvable:$true] %s3251_s8 }
 0xbcb   : > { %v6733_v11 = vmov %v6731_v40  ;;  %3865 = vmatprep.subr.bf16.mxu1 (%p160_p12), %v4543_v17  ;;  %v4547_v15 = vld [vmem:[#allocation10 + $0xd8] sm:$0xff] (%p160_p12)   ;;  %v4550_v10 = vld [vmem:[#allocation10 + $0x20] sm:$0xff] (%p160_p12)   ;;  %v2634_v46 = vpack.c.bf16 (%p160_p12), %v6731_v40, %v6731_v40  ;;  %v2635_v59 = vpack.c.bf16 (%p160_p12), %v6730_v52, %v6730_v52  ;;  %s4699_s1 = scalar_lea.vmem (%p160_p12), %s3252_s8, 128  ;;  %p4704_p0 = scmp.lt.s32.totalorder (%p160_p12), %s3252_s8, %s3252_s8 }
 0xbcc   :  { %v4558_v11 = vld [vmem:[#allocation10 + $0x30] sm:$0xff]   ;;  %v4588_v40 = vld [vmem:[#allocation10 + $0x1b8] sm:$0xff]   ;;  %p4700_p13 = scmp.ne.s32.totalorder %s3252_s8, %s4699_s1  ;;  %p4705_p1 = scmp.lt.s32.totalorder %s4699_s1, %s4699_s1 }
 0xbcd   :  { %3842 = vmatpush3.bf16.msra.mxu0 %v4538_v36 }
 0xbce   :  { %3843 = vmatprep.subr.bf16.mxu0 %v4541_v41  ;;  %3866 = vmatpush3.bf16.msra.mxu1 %v4544_v23  ;;  %p4706_p2 = por %p4705_p1, %p4704_p0 }
 0xbcf   :  { %3867 = vmatprep.subr.bf16.mxu1 %v4547_v15 }
 0xbd0   :  { %p4707_p3 = pnand %p4706_p2, %p4700_p13 }
 0xbd1   :  { %3844 = vmatpush3.bf16.msra.mxu0 %v4542_v16 }
 0xbd2   :  { %3845 = vmatprep.subr.bf16.mxu0 %v4545_v22  ;;  %3868 = vmatpush3.bf16.msra.mxu1 %v4548_v30 }
 0xbd3   :  { %3869 = vmatprep.subr.bf16.mxu1 %v4551_v33 }
 0xbd5   :  { %3846 = vmatpush3.bf16.msra.mxu0 %v4546_v47 }
 0xbd6   :  { %3847 = vmatprep.subr.bf16.mxu0 %v4549_v63  ;;  %3870 = vmatpush3.bf16.msra.mxu1 %v4552_v56 }
 0xbd7   :  { %3871 = vmatprep.subr.bf16.mxu1 %v4555_v50 }
 0xbd9   :  { %3848 = vmatpush3.bf16.msra.mxu0 %v4550_v10 }
 0xbda   :  { %3849 = vmatprep.subr.bf16.mxu0 %v4553_v45  ;;  %3872 = vmatpush3.bf16.msra.mxu1 %v4556_v51 }
 0xbdb   :  { %3873 = vmatprep.subr.bf16.mxu1 %v4559_v35 }
 0xbdd   :  { %3850 = vmatpush3.bf16.msra.mxu0 %v4554_v61 }
 0xbde   :  { %3851 = vmatprep.subr.bf16.mxu0 %v4557_v38  ;;  %3874 = vmatpush3.bf16.msra.mxu1 %v4560_v28 }
 0xbdf   :  { %3875 = vmatprep.subr.bf16.mxu1 %v4563_v19 }
 0xbe1   :  { %3852 = vmatpush3.bf16.msra.mxu0 %v4558_v11 }
 0xbe2   :  { %3853 = vmatprep.subr.bf16.mxu0 %v4561_v44  ;;  %3876 = vmatpush3.bf16.msra.mxu1 %v4564_v0 }
 0xbe3   :  { %4154 = vmatprep.subr.bf16.mxu1 %v4805_v25 }
 0xbe5   :  { %3854 = vmatpush3.bf16.msra.mxu0 %v4562_v60  ;;  %3157 = vmatmul.mubr.bf16.vlgmr.msra.gmra.mrb[0].mxu1 %v2631_v48 }
 0xbe6   :  { %3883 = vmatprep.subr.bf16.mxu0 %v4565_v12  ;;  %4155 = vmatpush3.bf16.msra.mxu1 %v4567_v8 }
 0xbe7   :  { %4156 = vmatprep.subr.bf16.mxu1 %v4805_v25  ;;  %4170 = vmatprep.mubr.msk.bf16.mxu1 %vm4806_vm1, %v4805_v25 }
 0xbe8   :  { %3117 = vmatmul.mubr.bf16.vlgmr.msra.gmra.mrb[0].mxu0 %v2629_v7 }
 0xbe9   :  { %3884 = vmatpush3.bf16.msra.mxu0 %v4566_v26  ;;  %3196 = vmatprep.mubr.bf16.mxu0 %v2634_v46 }
 0xbea   :  { %3885 = vmatprep.subr.bf16.mxu0 %v4568_v13  ;;  %4157 = vmatpush3.bf16.msra.mxu1 %v4570_v20 }
 0xbeb   :  { %4158 = vmatprep.subr.bf16.mxu1 %v4805_v25 }
 0xbed   :  { %3886 = vmatpush3.bf16.msra.mxu0 %v4569_v2 }
 0xbee   :  { %3887 = vmatprep.subr.bf16.mxu0 %v4571_v53  ;;  %4159 = vmatpush3.bf16.msra.mxu1 %v4573_v37 }
 0xbef   :  { %4160 = vmatprep.subr.bf16.mxu1 %v4805_v25 }
 0xbf1   :  { %3888 = vmatpush3.bf16.msra.mxu0 %v4572_v42 }
 0xbf2   :  { %3889 = vmatprep.subr.bf16.mxu0 %v4574_v24  ;;  %4161 = vmatpush3.bf16.msra.mxu1 %v4576_v21 }
 0xbf3   :  { %4162 = vmatprep.subr.bf16.mxu1 %v4805_v25 }
 0xbf5   :  { %3890 = vmatpush3.bf16.msra.mxu0 %v4575_v6 }
 0xbf6   :  { %3891 = vmatprep.subr.bf16.mxu0 %v4577_v43  ;;  %4163 = vmatpush3.bf16.msra.mxu1 %v4579_v3 }
 0xbf7   :  { %4164 = vmatprep.subr.bf16.mxu1 %v4805_v25 }
 0xbf9   :  { %3892 = vmatpush3.bf16.msra.mxu0 %v4578_v39 }
 0xbfa   :  { %3893 = vmatprep.subr.bf16.mxu0 %v4580_v18  ;;  %4165 = vmatpush3.bf16.msra.mxu1 %v4582_v4 }
 0xbfb   :  { %4166 = vmatprep.subr.bf16.mxu1 %v4805_v25 }
 0xbfd   :  { %3894 = vmatpush3.bf16.msra.mxu0 %v4581_v5 }
 0xbfe   :  { %3895 = vmatprep.subr.bf16.mxu0 %v4583_v27  ;;  %4167 = vmatpush3.bf16.msra.mxu1 %v4585_v14 }
 0xbff   :  { %4168 = vmatprep.subr.bf16.mxu1 %v4805_v25 }
 0xc01   :  { %3896 = vmatpush3.bf16.msra.mxu0 %v4584_v9 }
 0xc02   :  { %3897 = vmatprep.subr.bf16.mxu0 %v4586_v49  ;;  %4169 = vmatpush3.bf16.msra.mxu1 %v4588_v40 }
 0xc05   :  { %3898 = vmatpush3.bf16.msra.mxu0 %v4587_v62  ;;  %4171 = vmatmul.mubr.bf16.vlgmr.msra.gmra.mrb[4].mxu1 %v2635_v59 }
 0xc08   :  { %3197 = vmatmul.mubr.bf16.vlgmr.msra.gmra.mrb[4].mxu0 %v2633_v55 }
 0xcb8   :  { %v3877_v36 = vpop.f32.mrb[0].mxu1 }
 0xcb9   :  { %v3878_v57 = vpop.f32.mrb[1].mxu1 }
 0xcba   :  { %v3879_v29 = vadd.f32 %v3878_v57, %v3877_v36  ;;  %v3880_v16 = vpop.f32.mrb[2].mxu1 }
 0xcbb   :  { %v3855_v32 = vpop.f32.mrb[0].mxu0  ;;  %v3881_v17 = vpop.f32.mrb[3].mxu1 }
 0xcbc   :  { %v3856_v34 = vpop.f32.mrb[1].mxu0 }
 0xcbd   :  { %v3857_v58 = vadd.f32 %v3856_v34, %v3855_v32  ;;  %v3858_v1 = vpop.f32.mrb[2].mxu0 }
 0xcbe   :  { %v3859_v54 = vpop.f32.mrb[3].mxu0 }
 0xcbf   :  { %v3119_v41 = vadd.f32 %v3857_v58, %v3410_v31 }
 0xcc1   :  { %v3159_v23 = vadd.f32 %v3879_v29, %v3119_v41 }
 0xcd8   :  { %v3238_v30 = vpop.f32.mrb[4].mxu1 }
 0xcd9   :  { %v4172_v10 = vpop.f32.mrb[5].mxu1 }
 0xcda   :  { %v3241_v56 = vpop.f32.mrb[6].mxu1 }
 0xcdb   :  { %v3899_v52 = vpop.f32.mrb[4].mxu0  ;;  %v4173_v45 = vpop.f32.mrb[7].mxu1 }
 0xcdc   :  { %v3900_v22 = vpop.f32.mrb[5].mxu0 }
 0xcdd   :  { %v3901_v47 = vadd.f32 %v3900_v22, %v3899_v52  ;;  %v3902_v15 = vpop.f32.mrb[6].mxu0 }
 0xcde   :  { %v3903_v63 = vpop.f32.mrb[7].mxu0 }
 0xcdf   :  { %v3199_v33 = vadd.f32 %v3901_v47, %v3159_v23 }
 0xce1   :  { %v3239_v61 = vadd.f32 %v3238_v30, %v3199_v33 }
 0xce3   :  { %3244 = vst [vmem:[#allocation11] sm:$0xff] %v3239_v61 }
 0xce4   :  { %4710 = shalt.err (!%p4707_p3)
}
 0xce5   :  { %s4711_s14 = scalar_lea.hbm %s6206_s9, 128 }
 0xce6   :  { %p4712_p4 = scmp.ne.s32.totalorder %s6206_s9, %s4711_s14  ;;  %p4715_p5 = scmp.lt.u32.totalorder %s4711_s14, %s6206_s9 }
 0xce8   :  { %p4717_p6 = pnand %p4715_p5, %p4712_p4 }
 0xcea   :  { %4720 = shalt.err (!%p4717_p6)
}
 0xceb   :  { %3254 = dma.vmem_to_hbm [thread:$0]  %s3252_s8, 128, %s6206_s9, [#allocation4]  }
 0xcec   :  { %4759 = dma.done.wait [#allocation4], 128  }
 0xced   :  { %4760 = vsyncadd [#allocation4], 4294967168 }
 0xcee   :  { %3258 = vsyncpa [#allocation3], 1 }
 0xcef   :  { %3259 = vsyncpa [#allocation6], 1 }
 0xcf0   :  { %3260 = vsyncpa [#allocation9], 1 }
 0xcf1   :  { %3261 = vsyncpa [#allocation4], 1 }

</bundles_post_ra>
